<compile_context>
chip_gen: v7x
topology: tpu7x:2x2x1
jax: 0.10.0
libtpu: 0.0.40
codegen_flags: <defaults>
</compile_context>

<pallas_src>
import jax
import jax.numpy as jnp
from jax.experimental import pallas as pl
from jax.experimental.pallas import tpu as pltpu


# --------------------------- Pallas kernels ---------------------------------

def _conv_relu_pool_kernel(cols_ref, w_ref, b_ref, o_ref):
    """cols_ref: (4, Mq, K) pooling-quadrant patch matrices.
    o = relu(max_t(cols[t] @ w) + b)   -- exact fusion of conv+bias+pool+relu."""
    w = w_ref[...]
    y = jnp.dot(cols_ref[0], w, preferred_element_type=jnp.float32)
    for t in range(1, 4):
        y = jnp.maximum(
            y, jnp.dot(cols_ref[t], w, preferred_element_type=jnp.float32))
    y = y + b_ref[...]
    o_ref[...] = jnp.maximum(y, 0.0).astype(o_ref.dtype)


def conv_relu_pool(cols_q, w, b):
    """cols_q: (4, Mq, K), w: (K, N), b: (N,) -> (Mq, N). Single VMEM block."""
    _, Mq, K = cols_q.shape
    K2, N = w.shape
    assert K == K2
    return pl.pallas_call(
        _conv_relu_pool_kernel,
        out_shape=jax.ShapeDtypeStruct((Mq, N), jnp.float32),
        grid=(1,),
        in_specs=[
            pl.BlockSpec((4, Mq, K), lambda i: (0, 0, 0)),
            pl.BlockSpec((K, N), lambda i: (0, 0)),
            pl.BlockSpec((1, N), lambda i: (0, 0)),
        ],
        out_specs=pl.BlockSpec((Mq, N), lambda i: (0, 0)),
        compiler_params=pltpu.CompilerParams(
            dimension_semantics=("arbitrary",)),
    )(cols_q, w, b.reshape(1, N))


def _head_kernel(x_ref, w1_ref, b1_ref, w2_ref, b2_ref, o_ref):
    """Fused fc1 + ReLU + fc2 + log_softmax (class axis = lanes)."""
    h = jnp.dot(x_ref[...], w1_ref[...], preferred_element_type=jnp.float32)
    h = jnp.maximum(h + b1_ref[...], 0.0)
    logits = jnp.dot(h, w2_ref[...], preferred_element_type=jnp.float32)
    logits = logits + b2_ref[...]
    m = jnp.max(logits, axis=1, keepdims=True)
    lse = m + jnp.log(jnp.sum(jnp.exp(logits - m), axis=1, keepdims=True))
    o_ref[...] = (logits - lse).astype(o_ref.dtype)


def mlp_head(x, w1, b1, w2, b2):
    """x:(B,D) -> log_softmax(relu(x@w1+b1) @ w2 + b2), all resident in VMEM."""
    B, D = x.shape
    H = w1.shape[1]
    N = w2.shape[1]
    return pl.pallas_call(
        _head_kernel,
        out_shape=jax.ShapeDtypeStruct((B, N), jnp.float32),
        grid=(1,),
        in_specs=[
            pl.BlockSpec((B, D), lambda i: (0, 0)),
            pl.BlockSpec((D, H), lambda i: (0, 0)),
            pl.BlockSpec((1, H), lambda i: (0, 0)),
            pl.BlockSpec((H, N), lambda i: (0, 0)),
            pl.BlockSpec((1, N), lambda i: (0, 0)),
        ],
        out_specs=pl.BlockSpec((B, N), lambda i: (0, 0)),
        compiler_params=pltpu.CompilerParams(
            dimension_semantics=("arbitrary",)),
    )(x, w1, b1.reshape(1, H), w2, b2.reshape(1, N))


# ------------------------------- glue ----------------------------------------

def im2col_pooled(x, k):
    """x: (B,H,W,C) NHWC. Valid conv (stride 1, kernel k) followed by a 2x2/2
    max-pool.  Returns the patch matrix pre-split into the 4 pooling quadrants:
    (4, B*Hp*Wp, C*k*k), with patch element ordering ci*k*k + i*k + j
    (matches torch weight.reshape(Cout, Cin*k*k)).  Pure-JAX slicing glue."""
    B, H, W, C = x.shape
    Ho, Wo = H - k + 1, W - k + 1
    Hp, Wp = Ho // 2, Wo // 2
    cols = jnp.stack(
        [x[:, i:i + Ho, j:j + Wo, :] for i in range(k) for j in range(k)],
        axis=3)                                        # (B, Ho, Wo, k*k, C)
    cols = jnp.transpose(cols, (0, 1, 2, 4, 3))        # (B, Ho, Wo, C, k*k)
    cols = cols.reshape(B, Ho, Wo, C * k * k)
    quads = jnp.stack(
        [cols[:, 0::2, 0::2], cols[:, 0::2, 1::2],
         cols[:, 1::2, 0::2], cols[:, 1::2, 1::2]], axis=0)  # (4,B,Hp,Wp,CKK)
    return quads.reshape(4, B * Hp * Wp, C * k * k), Hp, Wp


def init_params(key):
    """Deterministic synthetic params; PyTorch-style uniform(-1/sqrt(fan_in), .)."""
    ks = jax.random.split(key, 8)

    def uni(k, shape, fan_in):
        bound = 1.0 / jnp.sqrt(jnp.float32(fan_in))
        return jax.random.uniform(k, shape, jnp.float32, -bound, bound)

    return {
        "w1": uni(ks[0], (20, 1, 5, 5), 1 * 5 * 5),     # conv1: Cout,Cin,kh,kw
        "b1": uni(ks[1], (20,), 1 * 5 * 5),
        "w2": uni(ks[2], (50, 20, 5, 5), 20 * 5 * 5),   # conv2
        "b2": uni(ks[3], (50,), 20 * 5 * 5),
        "wfc1": uni(ks[4], (500, 800), 800),            # fc1: out,in (torch layout)
        "bfc1": uni(ks[5], (500,), 800),
        "wfc2": uni(ks[6], (10, 500), 500),             # fc2
        "bfc2": uni(ks[7], (10,), 500),
    }


def net_forward(params, x_nchw):
    B = x_nchw.shape[0]
    x = jnp.transpose(x_nchw, (0, 2, 3, 1))                     # NCHW -> NHWC

    # conv1 (1->20, 5x5, stride 1) + ReLU + maxpool 2x2  (one fused kernel)
    cols_q, Hp, Wp = im2col_pooled(x, 5)                        # (4, B*144, 25)
    w1 = params["w1"].reshape(20, 25).T                         # (25, 20)
    y = conv_relu_pool(cols_q, w1, params["b1"])                # (B*144, 20)
    y = y.reshape(B, Hp, Wp, 20)                                # (B,12,12,20)

    # conv2 (20->50, 5x5, stride 1) + ReLU + maxpool 2x2 (one fused kernel)
    cols_q, Hp, Wp = im2col_pooled(y, 5)                        # (4, B*16, 500)
    w2 = params["w2"].reshape(50, 500).T                        # (500, 50)
    y = conv_relu_pool(cols_q, w2, params["b2"])                # (B*16, 50)
    y = y.reshape(B, Hp, Wp, 50)                                # (B,4,4,50)

    # flatten in PyTorch NCHW order: view(-1, 4*4*50)
    y = jnp.transpose(y, (0, 3, 1, 2)).reshape(B, 4 * 4 * 50)   # (B, 800)

    # fc1 + ReLU + fc2 + log_softmax (one fused kernel)
    return mlp_head(y, params["wfc1"].T, params["bfc1"],
                    params["wfc2"].T, params["bfc2"])            # (B, 10)


if __name__ == "__main__":
    key = jax.random.PRNGKey(0)
    pkey, xkey = jax.random.split(key)
    params = init_params(pkey)
    x = jax.random.normal(xkey, (2, 1, 28, 28), jnp.float32)    # MNIST-sized input

    out = jax.jit(net_forward)(params, x)
    out = jax.block_until_ready(out)

    assert out.shape == (2, 10)
    assert bool(jnp.all(jnp.isfinite(out)))
    # log_softmax rows must exponentiate-sum to ~1
    assert bool(jnp.allclose(jnp.sum(jnp.exp(out), axis=1), 1.0, atol=1e-4))
    print("KERNEL_OK")
</pallas_src>

<mosaic_0001>
module attributes {stable_mosaic.version = 11 : i64} {
  func.func @_conv_relu_pool_kernel(%arg0: i32, %arg1: memref<4x288x25xf32, #tpu.memory_space<vmem>>, %arg2: memref<25x20xf32, #tpu.memory_space<vmem>>, %arg3: memref<1x20xf32, #tpu.memory_space<vmem>>, %arg4: memref<288x20xf32, #tpu.memory_space<vmem>>) attributes {dimension_semantics = [#tpu.dimension_semantics<arbitrary>], iteration_bounds = array<i64: 1>, scalar_prefetch = 0 : i64, scratch_operands = 0 : i64, tpu.core_type = #tpu.core_type<tc>, window_params = [{pipeline_mode = #tpu.pipeline_mode<synchronous>, transform_indices = @transform_0, window_bounds = array<i64: 4, 288, 25>}, {pipeline_mode = #tpu.pipeline_mode<synchronous>, transform_indices = @transform_1, window_bounds = array<i64: 25, 20>}, {pipeline_mode = #tpu.pipeline_mode<synchronous>, transform_indices = @transform_2, window_bounds = array<i64: 1, 20>}, {pipeline_mode = #tpu.pipeline_mode<synchronous>, transform_indices = @transform_3, window_bounds = array<i64: 288, 20>}]} {
    %c0 = arith.constant 0 : index
    %c0_0 = arith.constant 0 : index
    %0 = vector.load %arg2[%c0, %c0_0] : memref<25x20xf32, #tpu.memory_space<vmem>>, vector<25x20xf32>
    %c0_1 = arith.constant 0 : index
    %c0_2 = arith.constant 0 : index
    %c0_3 = arith.constant 0 : index
    %1 = vector.load %arg1[%c0_1, %c0_2, %c0_3] : memref<4x288x25xf32, #tpu.memory_space<vmem>>, vector<1x288x25xf32>
    %2 = vector.shape_cast %1 : vector<1x288x25xf32> to vector<288x25xf32>
    %cst = arith.constant dense<0.000000e+00> : vector<288x20xf32>
    %3 = tpu.matmul %2, %0, %cst {dimension_numbers = #tpu.dot_dimension_numbers<[1], [0], [0], [1], [0, 0, 1, 1], [], []>} : vector<288x25xf32>, vector<25x20xf32>, vector<288x20xf32> -> vector<288x20xf32>
    %c1 = arith.constant 1 : index
    %c0_4 = arith.constant 0 : index
    %c0_5 = arith.constant 0 : index
    %4 = vector.load %arg1[%c1, %c0_4, %c0_5] : memref<4x288x25xf32, #tpu.memory_space<vmem>>, vector<1x288x25xf32>
    %5 = vector.shape_cast %4 : vector<1x288x25xf32> to vector<288x25xf32>
    %cst_6 = arith.constant dense<0.000000e+00> : vector<288x20xf32>
    %6 = tpu.matmul %5, %0, %cst_6 {dimension_numbers = #tpu.dot_dimension_numbers<[1], [0], [0], [1], [0, 0, 1, 1], [], []>} : vector<288x25xf32>, vector<25x20xf32>, vector<288x20xf32> -> vector<288x20xf32>
    %7 = arith.maximumf %3, %6 : vector<288x20xf32>
    %c2 = arith.constant 2 : index
    %c0_7 = arith.constant 0 : index
    %c0_8 = arith.constant 0 : index
    %8 = vector.load %arg1[%c2, %c0_7, %c0_8] : memref<4x288x25xf32, #tpu.memory_space<vmem>>, vector<1x288x25xf32>
    %9 = vector.shape_cast %8 : vector<1x288x25xf32> to vector<288x25xf32>
    %cst_9 = arith.constant dense<0.000000e+00> : vector<288x20xf32>
    %10 = tpu.matmul %9, %0, %cst_9 {dimension_numbers = #tpu.dot_dimension_numbers<[1], [0], [0], [1], [0, 0, 1, 1], [], []>} : vector<288x25xf32>, vector<25x20xf32>, vector<288x20xf32> -> vector<288x20xf32>
    %11 = arith.maximumf %7, %10 : vector<288x20xf32>
    %c3 = arith.constant 3 : index
    %c0_10 = arith.constant 0 : index
    %c0_11 = arith.constant 0 : index
    %12 = vector.load %arg1[%c3, %c0_10, %c0_11] : memref<4x288x25xf32, #tpu.memory_space<vmem>>, vector<1x288x25xf32>
    %13 = vector.shape_cast %12 : vector<1x288x25xf32> to vector<288x25xf32>
    %cst_12 = arith.constant dense<0.000000e+00> : vector<288x20xf32>
    %14 = tpu.matmul %13, %0, %cst_12 {dimension_numbers = #tpu.dot_dimension_numbers<[1], [0], [0], [1], [0, 0, 1, 1], [], []>} : vector<288x25xf32>, vector<25x20xf32>, vector<288x20xf32> -> vector<288x20xf32>
    %15 = arith.maximumf %11, %14 : vector<288x20xf32>
    %c0_13 = arith.constant 0 : index
    %c0_14 = arith.constant 0 : index
    %16 = vector.load %arg3[%c0_13, %c0_14] : memref<1x20xf32, #tpu.memory_space<vmem>>, vector<1x20xf32>
    %17 = vector.broadcast %16 : vector<1x20xf32> to vector<288x20xf32>
    %18 = arith.addf %15, %17 : vector<288x20xf32>
    %cst_15 = arith.constant 0.000000e+00 : f32
    %19 = vector.broadcast %cst_15 : f32 to vector<288x20xf32>
    %20 = arith.maximumf %18, %19 : vector<288x20xf32>
    %c0_16 = arith.constant 0 : index
    %c0_17 = arith.constant 0 : index
    %21 = vector.load %arg4[%c0_16, %c0_17] : memref<288x20xf32, #tpu.memory_space<vmem>>, vector<288x20xf32>
    tpu.vector_store %arg4[%c0_16, %c0_17], %20 {strides = array<i32>} : memref<288x20xf32, #tpu.memory_space<vmem>>, vector<288x20xf32>,
    return
  }
  func.func @transform_0(%arg0: i32) -> (i32, i32, i32) {
    %c0_i32 = arith.constant 0 : i32
    %c0_i32_0 = arith.constant 0 : i32
    %c0_i32_1 = arith.constant 0 : i32
    %c0_i32_2 = arith.constant 0 : i32
    return %c0_i32, %c0_i32_0, %c0_i32_1 : i32, i32, i32
  }
  func.func @transform_1(%arg0: i32) -> (i32, i32) {
    %c0_i32 = arith.constant 0 : i32
    %c0_i32_0 = arith.constant 0 : i32
    %c0_i32_1 = arith.constant 0 : i32
    return %c0_i32, %c0_i32_0 : i32, i32
  }
  func.func @transform_2(%arg0: i32) -> (i32, i32) {
    %c0_i32 = arith.constant 0 : i32
    %c0_i32_0 = arith.constant 0 : i32
    %c0_i32_1 = arith.constant 0 : i32
    return %c0_i32, %c0_i32_0 : i32, i32
  }
  func.func @transform_3(%arg0: i32) -> (i32, i32) {
    %c0_i32 = arith.constant 0 : i32
    %c0_i32_0 = arith.constant 0 : i32
    %c0_i32_1 = arith.constant 0 : i32
    return %c0_i32, %c0_i32_0 : i32, i32
  }
}

module attributes {stable_mosaic.version = 11 : i64} {
  func.func @_conv_relu_pool_kernel(%arg0: i32, %arg1: memref<4x32x500xf32, #tpu.memory_space<vmem>>, %arg2: memref<500x50xf32, #tpu.memory_space<vmem>>, %arg3: memref<1x50xf32, #tpu.memory_space<vmem>>, %arg4: memref<32x50xf32, #tpu.memory_space<vmem>>) attributes {dimension_semantics = [#tpu.dimension_semantics<arbitrary>], iteration_bounds = array<i64: 1>, scalar_prefetch = 0 : i64, scratch_operands = 0 : i64, tpu.core_type = #tpu.core_type<tc>, window_params = [{pipeline_mode = #tpu.pipeline_mode<synchronous>, transform_indices = @transform_0, window_bounds = array<i64: 4, 32, 500>}, {pipeline_mode = #tpu.pipeline_mode<synchronous>, transform_indices = @transform_1, window_bounds = array<i64: 500, 50>}, {pipeline_mode = #tpu.pipeline_mode<synchronous>, transform_indices = @transform_2, window_bounds = array<i64: 1, 50>}, {pipeline_mode = #tpu.pipeline_mode<synchronous>, transform_indices = @transform_3, window_bounds = array<i64: 32, 50>}]} {
    %c0 = arith.constant 0 : index
    %c0_0 = arith.constant 0 : index
    %0 = vector.load %arg2[%c0, %c0_0] : memref<500x50xf32, #tpu.memory_space<vmem>>, vector<500x50xf32>
    %c0_1 = arith.constant 0 : index
    %c0_2 = arith.constant 0 : index
    %c0_3 = arith.constant 0 : index
    %1 = vector.load %arg1[%c0_1, %c0_2, %c0_3] : memref<4x32x500xf32, #tpu.memory_space<vmem>>, vector<1x32x500xf32>
    %2 = vector.shape_cast %1 : vector<1x32x500xf32> to vector<32x500xf32>
    %cst = arith.constant dense<0.000000e+00> : vector<32x50xf32>
    %3 = tpu.matmul %2, %0, %cst {dimension_numbers = #tpu.dot_dimension_numbers<[1], [0], [0], [1], [0, 0, 1, 1], [], []>} : vector<32x500xf32>, vector<500x50xf32>, vector<32x50xf32> -> vector<32x50xf32>
    %c1 = arith.constant 1 : index
    %c0_4 = arith.constant 0 : index
    %c0_5 = arith.constant 0 : index
    %4 = vector.load %arg1[%c1, %c0_4, %c0_5] : memref<4x32x500xf32, #tpu.memory_space<vmem>>, vector<1x32x500xf32>
    %5 = vector.shape_cast %4 : vector<1x32x500xf32> to vector<32x500xf32>
    %cst_6 = arith.constant dense<0.000000e+00> : vector<32x50xf32>
    %6 = tpu.matmul %5, %0, %cst_6 {dimension_numbers = #tpu.dot_dimension_numbers<[1], [0], [0], [1], [0, 0, 1, 1], [], []>} : vector<32x500xf32>, vector<500x50xf32>, vector<32x50xf32> -> vector<32x50xf32>
    %7 = arith.maximumf %3, %6 : vector<32x50xf32>
    %c2 = arith.constant 2 : index
    %c0_7 = arith.constant 0 : index
    %c0_8 = arith.constant 0 : index
    %8 = vector.load %arg1[%c2, %c0_7, %c0_8] : memref<4x32x500xf32, #tpu.memory_space<vmem>>, vector<1x32x500xf32>
    %9 = vector.shape_cast %8 : vector<1x32x500xf32> to vector<32x500xf32>
    %cst_9 = arith.constant dense<0.000000e+00> : vector<32x50xf32>
    %10 = tpu.matmul %9, %0, %cst_9 {dimension_numbers = #tpu.dot_dimension_numbers<[1], [0], [0], [1], [0, 0, 1, 1], [], []>} : vector<32x500xf32>, vector<500x50xf32>, vector<32x50xf32> -> vector<32x50xf32>
    %11 = arith.maximumf %7, %10 : vector<32x50xf32>
    %c3 = arith.constant 3 : index
    %c0_10 = arith.constant 0 : index
    %c0_11 = arith.constant 0 : index
    %12 = vector.load %arg1[%c3, %c0_10, %c0_11] : memref<4x32x500xf32, #tpu.memory_space<vmem>>, vector<1x32x500xf32>
    %13 = vector.shape_cast %12 : vector<1x32x500xf32> to vector<32x500xf32>
    %cst_12 = arith.constant dense<0.000000e+00> : vector<32x50xf32>
    %14 = tpu.matmul %13, %0, %cst_12 {dimension_numbers = #tpu.dot_dimension_numbers<[1], [0], [0], [1], [0, 0, 1, 1], [], []>} : vector<32x500xf32>, vector<500x50xf32>, vector<32x50xf32> -> vector<32x50xf32>
    %15 = arith.maximumf %11, %14 : vector<32x50xf32>
    %c0_13 = arith.constant 0 : index
    %c0_14 = arith.constant 0 : index
    %16 = vector.load %arg3[%c0_13, %c0_14] : memref<1x50xf32, #tpu.memory_space<vmem>>, vector<1x50xf32>
    %17 = vector.broadcast %16 : vector<1x50xf32> to vector<32x50xf32>
    %18 = arith.addf %15, %17 : vector<32x50xf32>
    %cst_15 = arith.constant 0.000000e+00 : f32
    %19 = vector.broadcast %cst_15 : f32 to vector<32x50xf32>
    %20 = arith.maximumf %18, %19 : vector<32x50xf32>
    %c0_16 = arith.constant 0 : index
    %c0_17 = arith.constant 0 : index
    %21 = vector.load %arg4[%c0_16, %c0_17] : memref<32x50xf32, #tpu.memory_space<vmem>>, vector<32x50xf32>
    tpu.vector_store %arg4[%c0_16, %c0_17], %20 {strides = array<i32>} : memref<32x50xf32, #tpu.memory_space<vmem>>, vector<32x50xf32>,
    return
  }
  func.func @transform_0(%arg0: i32) -> (i32, i32, i32) {
    %c0_i32 = arith.constant 0 : i32
    %c0_i32_0 = arith.constant 0 : i32
    %c0_i32_1 = arith.constant 0 : i32
    %c0_i32_2 = arith.constant 0 : i32
    return %c0_i32, %c0_i32_0, %c0_i32_1 : i32, i32, i32
  }
  func.func @transform_1(%arg0: i32) -> (i32, i32) {
    %c0_i32 = arith.constant 0 : i32
    %c0_i32_0 = arith.constant 0 : i32
    %c0_i32_1 = arith.constant 0 : i32
    return %c0_i32, %c0_i32_0 : i32, i32
  }
  func.func @transform_2(%arg0: i32) -> (i32, i32) {
    %c0_i32 = arith.constant 0 : i32
    %c0_i32_0 = arith.constant 0 : i32
    %c0_i32_1 = arith.constant 0 : i32
    return %c0_i32, %c0_i32_0 : i32, i32
  }
  func.func @transform_3(%arg0: i32) -> (i32, i32) {
    %c0_i32 = arith.constant 0 : i32
    %c0_i32_0 = arith.constant 0 : i32
    %c0_i32_1 = arith.constant 0 : i32
    return %c0_i32, %c0_i32_0 : i32, i32
  }
}

module attributes {stable_mosaic.version = 11 : i64} {
  func.func @_head_kernel(%arg0: i32, %arg1: memref<2x800xf32, #tpu.memory_space<vmem>>, %arg2: memref<800x500xf32, #tpu.memory_space<vmem>>, %arg3: memref<1x500xf32, #tpu.memory_space<vmem>>, %arg4: memref<500x10xf32, #tpu.memory_space<vmem>>, %arg5: memref<1x10xf32, #tpu.memory_space<vmem>>, %arg6: memref<2x10xf32, #tpu.memory_space<vmem>>) attributes {dimension_semantics = [#tpu.dimension_semantics<arbitrary>], iteration_bounds = array<i64: 1>, scalar_prefetch = 0 : i64, scratch_operands = 0 : i64, tpu.core_type = #tpu.core_type<tc>, window_params = [{pipeline_mode = #tpu.pipeline_mode<synchronous>, transform_indices = @transform_0, window_bounds = array<i64: 2, 800>}, {pipeline_mode = #tpu.pipeline_mode<synchronous>, transform_indices = @transform_1, window_bounds = array<i64: 800, 500>}, {pipeline_mode = #tpu.pipeline_mode<synchronous>, transform_indices = @transform_2, window_bounds = array<i64: 1, 500>}, {pipeline_mode = #tpu.pipeline_mode<synchronous>, transform_indices = @transform_3, window_bounds = array<i64: 500, 10>}, {pipeline_mode = #tpu.pipeline_mode<synchronous>, transform_indices = @transform_4, window_bounds = array<i64: 1, 10>}, {pipeline_mode = #tpu.pipeline_mode<synchronous>, transform_indices = @transform_5, window_bounds = array<i64: 2, 10>}]} {
    %c0 = arith.constant 0 : index
    %c0_0 = arith.constant 0 : index
    %0 = vector.load %arg1[%c0, %c0_0] : memref<2x800xf32, #tpu.memory_space<vmem>>, vector<2x800xf32>
    %c0_1 = arith.constant 0 : index
    %c0_2 = arith.constant 0 : index
    %1 = vector.load %arg2[%c0_1, %c0_2] : memref<800x500xf32, #tpu.memory_space<vmem>>, vector<800x500xf32>
    %cst = arith.constant dense<0.000000e+00> : vector<2x500xf32>
    %2 = tpu.matmul %0, %1, %cst {dimension_numbers = #tpu.dot_dimension_numbers<[1], [0], [0], [1], [0, 0, 1, 1], [], []>} : vector<2x800xf32>, vector<800x500xf32>, vector<2x500xf32> -> vector<2x500xf32>
    %c0_3 = arith.constant 0 : index
    %c0_4 = arith.constant 0 : index
    %3 = vector.load %arg3[%c0_3, %c0_4] : memref<1x500xf32, #tpu.memory_space<vmem>>, vector<1x500xf32>
    %4 = vector.broadcast %3 : vector<1x500xf32> to vector<2x500xf32>
    %5 = arith.addf %2, %4 : vector<2x500xf32>
    %cst_5 = arith.constant 0.000000e+00 : f32
    %6 = vector.broadcast %cst_5 : f32 to vector<2x500xf32>
    %7 = arith.maximumf %5, %6 : vector<2x500xf32>
    %c0_6 = arith.constant 0 : index
    %c0_7 = arith.constant 0 : index
    %8 = vector.load %arg4[%c0_6, %c0_7] : memref<500x10xf32, #tpu.memory_space<vmem>>, vector<500x10xf32>
    %cst_8 = arith.constant dense<0.000000e+00> : vector<2x10xf32>
    %9 = tpu.matmul %7, %8, %cst_8 {dimension_numbers = #tpu.dot_dimension_numbers<[1], [0], [0], [1], [0, 0, 1, 1], [], []>} : vector<2x500xf32>, vector<500x10xf32>, vector<2x10xf32> -> vector<2x10xf32>
    %c0_9 = arith.constant 0 : index
    %c0_10 = arith.constant 0 : index
    %10 = vector.load %arg5[%c0_9, %c0_10] : memref<1x10xf32, #tpu.memory_space<vmem>>, vector<1x10xf32>
    %11 = vector.broadcast %10 : vector<1x10xf32> to vector<2x10xf32>
    %12 = arith.addf %9, %11 : vector<2x10xf32>
    %cst_11 = arith.constant dense<0xFF800000> : vector<2xf32>
    %13 = vector.multi_reduction <maximumf>, %12, %cst_11 [1] : vector<2x10xf32> to vector<2xf32>
    %14 = vector.shape_cast %13 : vector<2xf32> to vector<2x1xf32>
    %15 = vector.broadcast %14 : vector<2x1xf32> to vector<2x10xf32>
    %16 = arith.subf %12, %15 : vector<2x10xf32>
    %17 = math.exp %16 : vector<2x10xf32>
    %cst_12 = arith.constant dense<0.000000e+00> : vector<2xf32>
    %18 = vector.multi_reduction <add>, %17, %cst_12 [1] : vector<2x10xf32> to vector<2xf32>
    %19 = vector.shape_cast %18 : vector<2xf32> to vector<2x1xf32>
    %20 = math.log %19 : vector<2x1xf32>
    %21 = arith.addf %14, %20 : vector<2x1xf32>
    %22 = vector.broadcast %21 : vector<2x1xf32> to vector<2x10xf32>
    %23 = arith.subf %12, %22 : vector<2x10xf32>
    %c0_13 = arith.constant 0 : index
    %c0_14 = arith.constant 0 : index
    %24 = vector.load %arg6[%c0_13, %c0_14] : memref<2x10xf32, #tpu.memory_space<vmem>>, vector<2x10xf32>
    tpu.vector_store %arg6[%c0_13, %c0_14], %23 {strides = array<i32>} : memref<2x10xf32, #tpu.memory_space<vmem>>, vector<2x10xf32>,
    return
  }
  func.func @transform_0(%arg0: i32) -> (i32, i32) {
    %c0_i32 = arith.constant 0 : i32
    %c0_i32_0 = arith.constant 0 : i32
    %c0_i32_1 = arith.constant 0 : i32
    return %c0_i32, %c0_i32_0 : i32, i32
  }
  func.func @transform_1(%arg0: i32) -> (i32, i32) {
    %c0_i32 = arith.constant 0 : i32
    %c0_i32_0 = arith.constant 0 : i32
    %c0_i32_1 = arith.constant 0 : i32
    return %c0_i32, %c0_i32_0 : i32, i32
  }
  func.func @transform_2(%arg0: i32) -> (i32, i32) {
    %c0_i32 = arith.constant 0 : i32
    %c0_i32_0 = arith.constant 0 : i32
    %c0_i32_1 = arith.constant 0 : i32
    return %c0_i32, %c0_i32_0 : i32, i32
  }
  func.func @transform_3(%arg0: i32) -> (i32, i32) {
    %c0_i32 = arith.constant 0 : i32
    %c0_i32_0 = arith.constant 0 : i32
    %c0_i32_1 = arith.constant 0 : i32
    return %c0_i32, %c0_i32_0 : i32, i32
  }
  func.func @transform_4(%arg0: i32) -> (i32, i32) {
    %c0_i32 = arith.constant 0 : i32
    %c0_i32_0 = arith.constant 0 : i32
    %c0_i32_1 = arith.constant 0 : i32
    return %c0_i32, %c0_i32_0 : i32, i32
  }
  func.func @transform_5(%arg0: i32) -> (i32, i32) {
    %c0_i32 = arith.constant 0 : i32
    %c0_i32_0 = arith.constant 0 : i32
    %c0_i32_1 = arith.constant 0 : i32
    return %c0_i32, %c0_i32_0 : i32, i32
  }
}

</mosaic_0001>

<bundles_post_ra>
// kernel: net_forward.3
= control target key start
LH: loop header
LB: loop body
LE: loop exit
PB: predicated region body
PF: predicated region fallthrough
CT: control target
= control target key end

     0   :  { %vm163_vm0 = vcmask 1040384   ;;  %vm54_vm1 = vcmask 203776   ;;  %vm2516_vm2 = vmmov 1   ;;  %vm1769_vm4 = vcmask 162816   ;;  %s3654_s1 = inlined_call_operand.vmem [shape: f32[25,20], index: 1, kind: input, shape index: {}]   ;;  %s3655_s0 = inlined_call_operand.vmem [shape: f32[4,288,25], index: 0, kind: input, shape index: {}]   ;;  %s3656_s2 = inlined_call_operand.vmem [shape: f32[1,20], index: 2, kind: input, shape index: {}]   ;;  %s3657_s3 = inlined_call_operand.vmem [shape: f32[288,20], index: 3, kind: output, shape index: {}]  }
   0x1   :  { %v14_v0 = vld [vmem:[%s3654_s1] sm:$0xff]  ;;  %v15_v1 = vld [vmem:[%s3654_s1 + $0x8] sm:$0xff]  ;;  %v16_v2 = vld [vmem:[%s3654_s1 + $0x10] sm:$0xff] }
   0x2   :  { %v2475_v3 = vpack.c.bf16 %v15_v1, %v14_v0  ;;  %v17_v4 = vld [vmem:[%s3654_s1 + $0x18] sm:$0x1]  ;;  %v18_v5 = vld [vmem:[%s3655_s0] sm:$0xff]  ;;  %vm2552_vm3 = vmpackc.low %vm163_vm0, %vm2516_vm2 }
   0x3   :  { %v2479_v6 = vpack.c.bf16 %v17_v4, %v16_v2  ;;  %2235 = vmatprep.mubr.msk.f32.mxu0 %vm54_vm1, %v18_v5  ;;  %v1847_v8 = vld [vmem:[%s3655_s0 + $0x120] sm:$0xff]  ;;  %v19_v9 = vld [vmem:[%s3655_s0 + $0x8] sm:$0xff]  ;;  %v20_v11 = vld [vmem:[%s3655_s0 + $0x10] sm:$0xff] }
   0x4   :  { %2476 = vmatprep.subr.bf16.mxu0 %v2475_v3  ;;  %2486 = vmatprep.subr.bf16.mxu1 %v2475_v3  ;;  %v1848_v10 = vld [vmem:[%s3655_s0 + $0x128] sm:$0xff]  ;;  %v1849_v12 = vld [vmem:[%s3655_s0 + $0x130] sm:$0xff]  ;;  %v21_v13 = vld [vmem:[%s3655_s0 + $0x18] sm:$0xff] }
   0x5   :  { %2478 = vmatpush3.bf16.msra.mxu0 %v2475_v3  ;;  %2488 = vmatpush3.bf16.msra.mxu1 %v2475_v3  ;;  %v1850_v14 = vld [vmem:[%s3655_s0 + $0x138] sm:$0xff]  ;;  %v22_v15 = vld [vmem:[%s3655_s0 + $0x20] sm:$0xff]  ;;  %v23_v17 = vld [vmem:[%s3655_s0 + $0x28] sm:$0xff] }
   0x6   :  { %2481 = vmatprep.subr.msk.bf16.mxu0 %vm2552_vm3, %v2479_v6  ;;  %2491 = vmatprep.subr.msk.bf16.mxu1 %vm2552_vm3, %v2479_v6  ;;  %v1851_v16 = vld [vmem:[%s3655_s0 + $0x140] sm:$0xff]  ;;  %v1852_v18 = vld [vmem:[%s3655_s0 + $0x148] sm:$0xff]  ;;  %v24_v19 = vld [vmem:[%s3655_s0 + $0x30] sm:$0xff] }
   0x7   :  { %2297 = vmatprep.mubr.msk.f32.mxu1 %vm54_vm1, %v1847_v8  ;;  %v1853_v20 = vld [vmem:[%s3655_s0 + $0x150] sm:$0xff]  ;;  %v25_v21 = vld [vmem:[%s3655_s0 + $0x38] sm:$0xff]  ;;  %v26_v23 = vld [vmem:[%s3655_s0 + $0x40] sm:$0xff] }
   0x8   :  { %v1854_v22 = vld [vmem:[%s3655_s0 + $0x158] sm:$0xff]  ;;  %v1855_v24 = vld [vmem:[%s3655_s0 + $0x160] sm:$0xff]  ;;  %v27_v25 = vld [vmem:[%s3655_s0 + $0x48] sm:$0xff] }
   0x9   :  { %2484 = vmatpush3.bf16.msk.msra.mxu0 %vm2552_vm3, %v2479_v6  ;;  %2494 = vmatpush3.bf16.msk.msra.mxu1 %vm2552_vm3, %v2479_v6  ;;  %v1856_v26 = vld [vmem:[%s3655_s0 + $0x168] sm:$0xff]  ;;  %v28_v27 = vld [vmem:[%s3655_s0 + $0x50] sm:$0xff]  ;;  %v29_v29 = vld [vmem:[%s3655_s0 + $0x58] sm:$0xff] }
   0xa   :  { %2496 = vmatprep.subr.bf16.mxu0 %v2475_v3  ;;  %2506 = vmatprep.subr.bf16.mxu1 %v2475_v3  ;;  %v1857_v28 = vld [vmem:[%s3655_s0 + $0x170] sm:$0xff]  ;;  %v1858_v30 = vld [vmem:[%s3655_s0 + $0x178] sm:$0xff]  ;;  %v30_v31 = vld [vmem:[%s3655_s0 + $0x60] sm:$0xff] }
   0xb   :  { %v1859_v32 = vld [vmem:[%s3655_s0 + $0x180] sm:$0xff]  ;;  %v31_v33 = vld [vmem:[%s3655_s0 + $0x68] sm:$0xff]  ;;  %v32_v35 = vld [vmem:[%s3655_s0 + $0x70] sm:$0xff] }
   0xc   :  { %2236 = vmatmul.mubr.msk.f32.vlgmr.msra.gmra.mrb[0].mxu0 %vm54_vm1, %v19_v9  ;;  %2298 = vmatmul.mubr.msk.f32.vlgmr.msra.gmra.mrb[0].mxu1 %vm54_vm1, %v1848_v10  ;;  %v1860_v34 = vld [vmem:[%s3655_s0 + $0x188] sm:$0xff]  ;;  %v1861_v36 = vld [vmem:[%s3655_s0 + $0x190] sm:$0xff]  ;;  %v33_v37 = vld [vmem:[%s3655_s0 + $0x78] sm:$0xff] }
   0xd   :  { %2498 = vmatpush3.bf16.msra.mxu0 %v2475_v3  ;;  %2238 = vmatprep.mubr.msk.f32.mxu0 %vm54_vm1, %v20_v11  ;;  %v1862_v38 = vld [vmem:[%s3655_s0 + $0x198] sm:$0xff]  ;;  %v34_v39 = vld [vmem:[%s3655_s0 + $0x80] sm:$0xff]  ;;  %v35_v41 = vld [vmem:[%s3655_s0 + $0x88] sm:$0xff] }
   0xe   :  { %2300 = vmatprep.mubr.msk.f32.mxu1 %vm54_vm1, %v1849_v12  ;;  %2508 = vmatpush3.bf16.msra.mxu1 %v2475_v3  ;;  %v1863_v40 = vld [vmem:[%s3655_s0 + $0x1a0] sm:$0xff]  ;;  %v1864_v42 = vld [vmem:[%s3655_s0 + $0x1a8] sm:$0xff]  ;;  %v36_v43 = vld [vmem:[%s3655_s0 + $0x90] sm:$0xff] }
   0xf   :  { %2501 = vmatprep.subr.msk.bf16.mxu0 %vm2552_vm3, %v2479_v6  ;;  %2511 = vmatprep.subr.msk.bf16.mxu1 %vm2552_vm3, %v2479_v6  ;;  %v1865_v44 = vld [vmem:[%s3655_s0 + $0x1b0] sm:$0xff]  ;;  %v37_v45 = vld [vmem:[%s3655_s0 + $0x98] sm:$0xff]  ;;  %v38_v47 = vld [vmem:[%s3655_s0 + $0xa0] sm:$0xff] }
  0x10   :  { %2239 = vmatmul.mubr.msk.f32.gmra.mrb[2].mxu0 %vm54_vm1, %v21_v13  ;;  %2301 = vmatmul.mubr.msk.f32.gmra.mrb[2].mxu1 %vm54_vm1, %v1850_v14  ;;  %v1866_v46 = vld [vmem:[%s3655_s0 + $0x1b8] sm:$0xff]  ;;  %v1867_v48 = vld [vmem:[%s3655_s0 + $0x1c0] sm:$0xff]  ;;  %v39_v49 = vld [vmem:[%s3655_s0 + $0xa8] sm:$0xff] }
  0x11   :  { %2241 = vmatprep.mubr.msk.f32.mxu0 %vm54_vm1, %v22_v15  ;;  %2303 = vmatprep.mubr.msk.f32.mxu1 %vm54_vm1, %v1851_v16  ;;  %v1868_v50 = vld [vmem:[%s3655_s0 + $0x1c8] sm:$0xff]  ;;  %v40_v51 = vld [vmem:[%s3655_s0 + $0xb0] sm:$0xff]  ;;  %v41_v53 = vld [vmem:[%s3655_s0 + $0xb8] sm:$0xff] }
  0x12   :  { %2504 = vmatpush3.bf16.msk.msra.mxu0 %vm2552_vm3, %v2479_v6  ;;  %2514 = vmatpush3.bf16.msk.msra.mxu1 %vm2552_vm3, %v2479_v6  ;;  %v1869_v52 = vld [vmem:[%s3655_s0 + $0x1d0] sm:$0xff]  ;;  %v1870_v54 = vld [vmem:[%s3655_s0 + $0x1d8] sm:$0xff]  ;;  %v42_v55 = vld [vmem:[%s3655_s0 + $0xc0] sm:$0xff] }
  0x13   :  { %v1871_v56 = vld [vmem:[%s3655_s0 + $0x1e0] sm:$0xff]  ;;  %v43_v57 = vld [vmem:[%s3655_s0 + $0xc8] sm:$0xff]  ;;  %v44_v59 = vld [vmem:[%s3655_s0 + $0xd0] sm:$0xff] }
  0x14   :  { %2242 = vmatmul.mubr.msk.f32.gmra.mrb[4].mxu0 %vm54_vm1, %v23_v17  ;;  %2304 = vmatmul.mubr.msk.f32.gmra.mrb[4].mxu1 %vm54_vm1, %v1852_v18  ;;  %v1872_v58 = vld [vmem:[%s3655_s0 + $0x1e8] sm:$0xff]  ;;  %v1873_v60 = vld [vmem:[%s3655_s0 + $0x1f0] sm:$0xff]  ;;  %v45_v61 = vld [vmem:[%s3655_s0 + $0xd8] sm:$0xff] }
  0x15   :  { %2244 = vmatprep.mubr.msk.f32.mxu0 %vm54_vm1, %v24_v19  ;;  %2306 = vmatprep.mubr.msk.f32.mxu1 %vm54_vm1, %v1853_v20  ;;  %v1874_v62 = vld [vmem:[%s3655_s0 + $0x1f8] sm:$0xff]  ;;  %v46_v63 = vld [vmem:[%s3655_s0 + $0xe0] sm:$0xff]  ;;  %v47_v1 = vld [vmem:[%s3655_s0 + $0xe8] sm:$0xff] }
  0x16   :  { %v1875_v0 = vld [vmem:[%s3655_s0 + $0x200] sm:$0xff]  ;;  %v1876_v2 = vld [vmem:[%s3655_s0 + $0x208] sm:$0xff]  ;;  %v48_v3 = vld [vmem:[%s3655_s0 + $0xf0] sm:$0xff] }
  0x17   :  { %v1877_v4 = vld [vmem:[%s3655_s0 + $0x210] sm:$0xff]  ;;  %v49_v5 = vld [vmem:[%s3655_s0 + $0xf8] sm:$0xff]  ;;  %v50_v7 = vld [vmem:[%s3655_s0 + $0x100] sm:$0xff] }
  0x18   :  { %2245 = vmatmul.mubr.msk.f32.gmra.mrb[6].mxu0 %vm54_vm1, %v25_v21  ;;  %2307 = vmatmul.mubr.msk.f32.gmra.mrb[6].mxu1 %vm54_vm1, %v1854_v22  ;;  %v1878_v6 = vld [vmem:[%s3655_s0 + $0x218] sm:$0xff]  ;;  %v1879_v8 = vld [vmem:[%s3655_s0 + $0x220] sm:$0xff]  ;;  %v51_v9 = vld [vmem:[%s3655_s0 + $0x108] sm:$0xff] }
  0x19   :  { %2247 = vmatprep.mubr.msk.f32.mxu0 %vm54_vm1, %v26_v23  ;;  %2309 = vmatprep.mubr.msk.f32.mxu1 %vm54_vm1, %v1855_v24  ;;  %v1880_v10 = vld [vmem:[%s3655_s0 + $0x228] sm:$0xff]  ;;  %v52_v11 = vld [vmem:[%s3655_s0 + $0x110] sm:$0xff]  ;;  %v53_v13 = vld [vmem:[%s3655_s0 + $0x118] sm:$0xff] }
  0x1a   :  { %v1881_v12 = vld [vmem:[%s3655_s0 + $0x230] sm:$0xff]  ;;  %v1882_v14 = vld [vmem:[%s3655_s0 + $0x238] sm:$0xff]  ;;  %v1920_v15 = vld [vmem:[%s3655_s0 + $0x240] sm:$0xff] }
  0x1b   :  { %v1993_v16 = vld [vmem:[%s3655_s0 + $0x360] sm:$0xff]  ;;  %v1921_v17 = vld [vmem:[%s3655_s0 + $0x248] sm:$0xff]  ;;  %v1922_v19 = vld [vmem:[%s3655_s0 + $0x250] sm:$0xff] }
  0x1c   :  { %2248 = vmatmul.mubr.msk.f32.gmra.mrb[8].mxu0 %vm54_vm1, %v27_v25  ;;  %2310 = vmatmul.mubr.msk.f32.gmra.mrb[8].mxu1 %vm54_vm1, %v1856_v26  ;;  %v1994_v18 = vld [vmem:[%s3655_s0 + $0x368] sm:$0xff]  ;;  %v1995_v20 = vld [vmem:[%s3655_s0 + $0x370] sm:$0xff]  ;;  %v1923_v21 = vld [vmem:[%s3655_s0 + $0x258] sm:$0xff] }
  0x1d   :  { %2250 = vmatprep.mubr.msk.f32.mxu0 %vm54_vm1, %v28_v27  ;;  %2312 = vmatprep.mubr.msk.f32.mxu1 %vm54_vm1, %v1857_v28  ;;  %v1996_v22 = vld [vmem:[%s3655_s0 + $0x378] sm:$0xff]  ;;  %v1924_v23 = vld [vmem:[%s3655_s0 + $0x260] sm:$0xff]  ;;  %v1925_v25 = vld [vmem:[%s3655_s0 + $0x268] sm:$0xff] }
  0x1e   :  { %v1997_v24 = vld [vmem:[%s3655_s0 + $0x380] sm:$0xff]  ;;  %v1998_v26 = vld [vmem:[%s3655_s0 + $0x388] sm:$0xff]  ;;  %v1926_v27 = vld [vmem:[%s3655_s0 + $0x270] sm:$0xff] }
  0x1f   :  { %v1999_v28 = vld [vmem:[%s3655_s0 + $0x390] sm:$0xff] }
  0x20   :  { %2251 = vmatmul.mubr.msk.f32.gmra.mrb[10].mxu0 %vm54_vm1, %v29_v29  ;;  %2313 = vmatmul.mubr.msk.f32.gmra.mrb[10].mxu1 %vm54_vm1, %v1858_v30  ;;  %v1927_v29 = vld [vmem:[%s3655_s0 + $0x278] sm:$0xff] }
  0x21   :  { %2253 = vmatprep.mubr.msk.f32.mxu0 %vm54_vm1, %v30_v31  ;;  %2315 = vmatprep.mubr.msk.f32.mxu1 %vm54_vm1, %v1859_v32  ;;  %v2000_v30 = vld [vmem:[%s3655_s0 + $0x398] sm:$0xff]  ;;  %v1928_v31 = vld [vmem:[%s3655_s0 + $0x280] sm:$0xff] }
  0x22   :  { %v2001_v32 = vld [vmem:[%s3655_s0 + $0x3a0] sm:$0xff] }
  0x24   :  { %2254 = vmatmul.mubr.msk.f32.gmra.mrb[12].mxu0 %vm54_vm1, %v31_v33  ;;  %2316 = vmatmul.mubr.msk.f32.gmra.mrb[12].mxu1 %vm54_vm1, %v1860_v34  ;;  %v1929_v33 = vld [vmem:[%s3655_s0 + $0x288] sm:$0xff] }
  0x25   :  { %2256 = vmatprep.mubr.msk.f32.mxu0 %vm54_vm1, %v32_v35  ;;  %2318 = vmatprep.mubr.msk.f32.mxu1 %vm54_vm1, %v1861_v36  ;;  %v2002_v34 = vld [vmem:[%s3655_s0 + $0x3a8] sm:$0xff]  ;;  %v1930_v35 = vld [vmem:[%s3655_s0 + $0x290] sm:$0xff] }
  0x26   :  { %v2003_v36 = vld [vmem:[%s3655_s0 + $0x3b0] sm:$0xff] }
  0x28   :  { %2257 = vmatmul.mubr.msk.f32.gmra.mrb[14].mxu0 %vm54_vm1, %v33_v37  ;;  %2319 = vmatmul.mubr.msk.f32.gmra.mrb[14].mxu1 %vm54_vm1, %v1862_v38  ;;  %v1931_v37 = vld [vmem:[%s3655_s0 + $0x298] sm:$0xff] }
  0x29   :  { %2259 = vmatprep.mubr.msk.f32.mxu0 %vm54_vm1, %v34_v39  ;;  %2321 = vmatprep.mubr.msk.f32.mxu1 %vm54_vm1, %v1863_v40  ;;  %v2004_v38 = vld [vmem:[%s3655_s0 + $0x3b8] sm:$0xff]  ;;  %v1932_v39 = vld [vmem:[%s3655_s0 + $0x2a0] sm:$0xff] }
  0x2a   :  { %v2005_v40 = vld [vmem:[%s3655_s0 + $0x3c0] sm:$0xff] }
  0x2c   :  { %2260 = vmatmul.mubr.msk.f32.gmra.mrb[16].mxu0 %vm54_vm1, %v35_v41  ;;  %2322 = vmatmul.mubr.msk.f32.gmra.mrb[16].mxu1 %vm54_vm1, %v1864_v42  ;;  %v1933_v41 = vld [vmem:[%s3655_s0 + $0x2a8] sm:$0xff] }
  0x2d   :  { %2262 = vmatprep.mubr.msk.f32.mxu0 %vm54_vm1, %v36_v43  ;;  %2324 = vmatprep.mubr.msk.f32.mxu1 %vm54_vm1, %v1865_v44  ;;  %v2006_v42 = vld [vmem:[%s3655_s0 + $0x3c8] sm:$0xff]  ;;  %v1934_v43 = vld [vmem:[%s3655_s0 + $0x2b0] sm:$0xff] }
  0x2e   :  { %v2007_v44 = vld [vmem:[%s3655_s0 + $0x3d0] sm:$0xff] }
  0x30   :  { %2263 = vmatmul.mubr.msk.f32.gmra.mrb[18].mxu0 %vm54_vm1, %v37_v45  ;;  %2325 = vmatmul.mubr.msk.f32.gmra.mrb[18].mxu1 %vm54_vm1, %v1866_v46  ;;  %v1935_v45 = vld [vmem:[%s3655_s0 + $0x2b8] sm:$0xff] }
  0x31   :  { %2265 = vmatprep.mubr.msk.f32.mxu0 %vm54_vm1, %v38_v47  ;;  %2327 = vmatprep.mubr.msk.f32.mxu1 %vm54_vm1, %v1867_v48  ;;  %v2008_v46 = vld [vmem:[%s3655_s0 + $0x3d8] sm:$0xff]  ;;  %v1936_v47 = vld [vmem:[%s3655_s0 + $0x2c0] sm:$0xff] }
  0x32   :  { %v2009_v48 = vld [vmem:[%s3655_s0 + $0x3e0] sm:$0xff] }
  0x34   :  { %2266 = vmatmul.mubr.msk.f32.gmra.mrb[20].mxu0 %vm54_vm1, %v39_v49  ;;  %2328 = vmatmul.mubr.msk.f32.gmra.mrb[20].mxu1 %vm54_vm1, %v1868_v50  ;;  %v1937_v49 = vld [vmem:[%s3655_s0 + $0x2c8] sm:$0xff] }
  0x35   :  { %2268 = vmatprep.mubr.msk.f32.mxu0 %vm54_vm1, %v40_v51  ;;  %2330 = vmatprep.mubr.msk.f32.mxu1 %vm54_vm1, %v1869_v52  ;;  %v2010_v50 = vld [vmem:[%s3655_s0 + $0x3e8] sm:$0xff]  ;;  %v1938_v51 = vld [vmem:[%s3655_s0 + $0x2d0] sm:$0xff] }
  0x36   :  { %v2011_v52 = vld [vmem:[%s3655_s0 + $0x3f0] sm:$0xff] }
  0x38   :  { %2269 = vmatmul.mubr.msk.f32.gmra.mrb[22].mxu0 %vm54_vm1, %v41_v53  ;;  %2331 = vmatmul.mubr.msk.f32.gmra.mrb[22].mxu1 %vm54_vm1, %v1870_v54  ;;  %v1939_v53 = vld [vmem:[%s3655_s0 + $0x2d8] sm:$0xff] }
  0x39   :  { %2271 = vmatprep.mubr.msk.f32.mxu0 %vm54_vm1, %v42_v55  ;;  %2333 = vmatprep.mubr.msk.f32.mxu1 %vm54_vm1, %v1871_v56  ;;  %v2012_v54 = vld [vmem:[%s3655_s0 + $0x3f8] sm:$0xff]  ;;  %v1940_v55 = vld [vmem:[%s3655_s0 + $0x2e0] sm:$0xff] }
  0x3a   :  { %v2013_v56 = vld [vmem:[%s3655_s0 + $0x400] sm:$0xff] }
  0x3c   :  { %2272 = vmatmul.mubr.msk.f32.gmra.mrb[24].mxu0 %vm54_vm1, %v43_v57  ;;  %2334 = vmatmul.mubr.msk.f32.gmra.mrb[24].mxu1 %vm54_vm1, %v1872_v58  ;;  %v1941_v57 = vld [vmem:[%s3655_s0 + $0x2e8] sm:$0xff] }
  0x3d   :  { %2274 = vmatprep.mubr.msk.f32.mxu0 %vm54_vm1, %v44_v59  ;;  %2336 = vmatprep.mubr.msk.f32.mxu1 %vm54_vm1, %v1873_v60  ;;  %v2014_v58 = vld [vmem:[%s3655_s0 + $0x408] sm:$0xff]  ;;  %v1942_v59 = vld [vmem:[%s3655_s0 + $0x2f0] sm:$0xff] }
  0x3e   :  { %v2015_v60 = vld [vmem:[%s3655_s0 + $0x410] sm:$0xff] }
  0x40   :  { %2275 = vmatmul.mubr.msk.f32.gmra.mrb[26].mxu0 %vm54_vm1, %v45_v61  ;;  %2337 = vmatmul.mubr.msk.f32.gmra.mrb[26].mxu1 %vm54_vm1, %v1874_v62  ;;  %v1943_v61 = vld [vmem:[%s3655_s0 + $0x2f8] sm:$0xff] }
  0x41   :  { %2277 = vmatprep.mubr.msk.f32.mxu0 %vm54_vm1, %v46_v63  ;;  %2339 = vmatprep.mubr.msk.f32.mxu1 %vm54_vm1, %v1875_v0  ;;  %v2016_v62 = vld [vmem:[%s3655_s0 + $0x418] sm:$0xff]  ;;  %v1944_v63 = vld [vmem:[%s3655_s0 + $0x300] sm:$0xff] }
  0x42   :  { %v2017_v0 = vld [vmem:[%s3655_s0 + $0x420] sm:$0xff] }
  0x44   :  { %2278 = vmatmul.mubr.msk.f32.gmra.mrb[28].mxu0 %vm54_vm1, %v47_v1  ;;  %2340 = vmatmul.mubr.msk.f32.gmra.mrb[28].mxu1 %vm54_vm1, %v1876_v2  ;;  %v1945_v1 = vld [vmem:[%s3655_s0 + $0x308] sm:$0xff] }
  0x45   :  { %2280 = vmatprep.mubr.msk.f32.mxu0 %vm54_vm1, %v48_v3  ;;  %2342 = vmatprep.mubr.msk.f32.mxu1 %vm54_vm1, %v1877_v4  ;;  %v2018_v2 = vld [vmem:[%s3655_s0 + $0x428] sm:$0xff]  ;;  %v1946_v3 = vld [vmem:[%s3655_s0 + $0x310] sm:$0xff] }
  0x46   :  { %v2019_v4 = vld [vmem:[%s3655_s0 + $0x430] sm:$0xff] }
  0x48   :  { %2281 = vmatmul.mubr.msk.f32.gmra.mrb[30].mxu0 %vm54_vm1, %v49_v5  ;;  %2343 = vmatmul.mubr.msk.f32.gmra.mrb[30].mxu1 %vm54_vm1, %v1878_v6  ;;  %v1947_v5 = vld [vmem:[%s3655_s0 + $0x318] sm:$0xff] }
  0x49   :  { %2283 = vmatprep.mubr.msk.f32.mxu0 %vm54_vm1, %v50_v7  ;;  %2345 = vmatprep.mubr.msk.f32.mxu1 %vm54_vm1, %v1879_v8  ;;  %v2020_v6 = vld [vmem:[%s3655_s0 + $0x438] sm:$0xff]  ;;  %v1948_v7 = vld [vmem:[%s3655_s0 + $0x320] sm:$0xff] }
  0x4a   :  { %v2021_v8 = vld [vmem:[%s3655_s0 + $0x440] sm:$0xff] }
  0x4c   :  { %2284 = vmatmul.mubr.msk.f32.gmra.mrb[32].mxu0 %vm54_vm1, %v51_v9  ;;  %2346 = vmatmul.mubr.msk.f32.gmra.mrb[32].mxu1 %vm54_vm1, %v1880_v10  ;;  %v1949_v9 = vld [vmem:[%s3655_s0 + $0x328] sm:$0xff] }
  0x4d   :  { %2286 = vmatprep.mubr.msk.f32.mxu0 %vm54_vm1, %v52_v11  ;;  %2348 = vmatprep.mubr.msk.f32.mxu1 %vm54_vm1, %v1881_v12  ;;  %v2022_v10 = vld [vmem:[%s3655_s0 + $0x448] sm:$0xff]  ;;  %v1950_v11 = vld [vmem:[%s3655_s0 + $0x330] sm:$0xff] }
  0x4e   :  { %v2023_v12 = vld [vmem:[%s3655_s0 + $0x450] sm:$0xff] }
  0x50   :  { %2287 = vmatmul.mubr.msk.f32.gmra.mrb[34].mxu0 %vm54_vm1, %v53_v13  ;;  %2349 = vmatmul.mubr.msk.f32.gmra.mrb[34].mxu1 %vm54_vm1, %v1882_v14  ;;  %v1951_v13 = vld [vmem:[%s3655_s0 + $0x338] sm:$0xff] }
  0x51   :  { %2359 = vmatprep.mubr.msk.f32.mxu0 %vm54_vm1, %v1920_v15  ;;  %2421 = vmatprep.mubr.msk.f32.mxu1 %vm54_vm1, %v1993_v16  ;;  %v2024_v14 = vld [vmem:[%s3655_s0 + $0x458] sm:$0xff]  ;;  %v1952_v15 = vld [vmem:[%s3655_s0 + $0x340] sm:$0xff] }
  0x52   :  { %v2025_v16 = vld [vmem:[%s3655_s0 + $0x460] sm:$0xff] }
  0x54   :  { %2360 = vmatmul.mubr.msk.f32.vlgmr.msra.gmra.mrb[36].mxu0 %vm54_vm1, %v1921_v17  ;;  %2422 = vmatmul.mubr.msk.f32.vlgmr.msra.gmra.mrb[36].mxu1 %vm54_vm1, %v1994_v18  ;;  %v1953_v17 = vld [vmem:[%s3655_s0 + $0x348] sm:$0xff] }
  0x55   :  { %2362 = vmatprep.mubr.msk.f32.mxu0 %vm54_vm1, %v1922_v19  ;;  %2424 = vmatprep.mubr.msk.f32.mxu1 %vm54_vm1, %v1995_v20  ;;  %v2026_v18 = vld [vmem:[%s3655_s0 + $0x468] sm:$0xff]  ;;  %v1954_v19 = vld [vmem:[%s3655_s0 + $0x350] sm:$0xff] }
  0x56   :  { %v2027_v20 = vld [vmem:[%s3655_s0 + $0x470] sm:$0xff] }
  0x58   :  { %2363 = vmatmul.mubr.msk.f32.gmra.mrb[38].mxu0 %vm54_vm1, %v1923_v21  ;;  %2425 = vmatmul.mubr.msk.f32.gmra.mrb[38].mxu1 %vm54_vm1, %v1996_v22  ;;  %v1955_v21 = vld [vmem:[%s3655_s0 + $0x358] sm:$0xff] }
  0x59   :  { %2365 = vmatprep.mubr.msk.f32.mxu0 %vm54_vm1, %v1924_v23  ;;  %2427 = vmatprep.mubr.msk.f32.mxu1 %vm54_vm1, %v1997_v24  ;;  %v2028_v22 = vld [vmem:[%s3655_s0 + $0x478] sm:$0xff] }
  0x5c   :  { %2366 = vmatmul.mubr.msk.f32.gmra.mrb[40].mxu0 %vm54_vm1, %v1925_v25  ;;  %2428 = vmatmul.mubr.msk.f32.gmra.mrb[40].mxu1 %vm54_vm1, %v1998_v26 }
  0x5d   :  { %2368 = vmatprep.mubr.msk.f32.mxu0 %vm54_vm1, %v1926_v27  ;;  %2430 = vmatprep.mubr.msk.f32.mxu1 %vm54_vm1, %v1999_v28 }
  0x60   :  { %2369 = vmatmul.mubr.msk.f32.gmra.mrb[42].mxu0 %vm54_vm1, %v1927_v29  ;;  %2431 = vmatmul.mubr.msk.f32.gmra.mrb[42].mxu1 %vm54_vm1, %v2000_v30 }
  0x61   :  { %2371 = vmatprep.mubr.msk.f32.mxu0 %vm54_vm1, %v1928_v31  ;;  %2433 = vmatprep.mubr.msk.f32.mxu1 %vm54_vm1, %v2001_v32 }
  0x64   :  { %2372 = vmatmul.mubr.msk.f32.gmra.mrb[44].mxu0 %vm54_vm1, %v1929_v33  ;;  %2434 = vmatmul.mubr.msk.f32.gmra.mrb[44].mxu1 %vm54_vm1, %v2002_v34 }
  0x65   :  { %2374 = vmatprep.mubr.msk.f32.mxu0 %vm54_vm1, %v1930_v35  ;;  %2436 = vmatprep.mubr.msk.f32.mxu1 %vm54_vm1, %v2003_v36 }
  0x68   :  { %2375 = vmatmul.mubr.msk.f32.gmra.mrb[46].mxu0 %vm54_vm1, %v1931_v37  ;;  %2437 = vmatmul.mubr.msk.f32.gmra.mrb[46].mxu1 %vm54_vm1, %v2004_v38 }
  0x69   :  { %2377 = vmatprep.mubr.msk.f32.mxu0 %vm54_vm1, %v1932_v39  ;;  %2439 = vmatprep.mubr.msk.f32.mxu1 %vm54_vm1, %v2005_v40 }
  0x6c   :  { %2378 = vmatmul.mubr.msk.f32.gmra.mrb[48].mxu0 %vm54_vm1, %v1933_v41  ;;  %2440 = vmatmul.mubr.msk.f32.gmra.mrb[48].mxu1 %vm54_vm1, %v2006_v42 }
  0x6d   :  { %2380 = vmatprep.mubr.msk.f32.mxu0 %vm54_vm1, %v1934_v43  ;;  %2442 = vmatprep.mubr.msk.f32.mxu1 %vm54_vm1, %v2007_v44 }
  0x70   :  { %2381 = vmatmul.mubr.msk.f32.gmra.mrb[50].mxu0 %vm54_vm1, %v1935_v45  ;;  %2443 = vmatmul.mubr.msk.f32.gmra.mrb[50].mxu1 %vm54_vm1, %v2008_v46 }
  0x71   :  { %2383 = vmatprep.mubr.msk.f32.mxu0 %vm54_vm1, %v1936_v47  ;;  %2445 = vmatprep.mubr.msk.f32.mxu1 %vm54_vm1, %v2009_v48 }
  0x74   :  { %2384 = vmatmul.mubr.msk.f32.gmra.mrb[52].mxu0 %vm54_vm1, %v1937_v49  ;;  %2446 = vmatmul.mubr.msk.f32.gmra.mrb[52].mxu1 %vm54_vm1, %v2010_v50 }
  0x75   :  { %2386 = vmatprep.mubr.msk.f32.mxu0 %vm54_vm1, %v1938_v51  ;;  %2448 = vmatprep.mubr.msk.f32.mxu1 %vm54_vm1, %v2011_v52 }
  0x78   :  { %2387 = vmatmul.mubr.msk.f32.gmra.mrb[54].mxu0 %vm54_vm1, %v1939_v53  ;;  %2449 = vmatmul.mubr.msk.f32.gmra.mrb[54].mxu1 %vm54_vm1, %v2012_v54 }
  0x79   :  { %2389 = vmatprep.mubr.msk.f32.mxu0 %vm54_vm1, %v1940_v55  ;;  %2451 = vmatprep.mubr.msk.f32.mxu1 %vm54_vm1, %v2013_v56 }
  0x7c   :  { %2390 = vmatmul.mubr.msk.f32.gmra.mrb[56].mxu0 %vm54_vm1, %v1941_v57  ;;  %2452 = vmatmul.mubr.msk.f32.gmra.mrb[56].mxu1 %vm54_vm1, %v2014_v58 }
  0x7d   :  { %2392 = vmatprep.mubr.msk.f32.mxu0 %vm54_vm1, %v1942_v59  ;;  %2454 = vmatprep.mubr.msk.f32.mxu1 %vm54_vm1, %v2015_v60 }
  0x80   :  { %2393 = vmatmul.mubr.msk.f32.gmra.mrb[58].mxu0 %vm54_vm1, %v1943_v61  ;;  %2455 = vmatmul.mubr.msk.f32.gmra.mrb[58].mxu1 %vm54_vm1, %v2016_v62 }
  0x81   :  { %2395 = vmatprep.mubr.msk.f32.mxu0 %vm54_vm1, %v1944_v63  ;;  %2457 = vmatprep.mubr.msk.f32.mxu1 %vm54_vm1, %v2017_v0 }
  0x84   :  { %2396 = vmatmul.mubr.msk.f32.gmra.mrb[60].mxu0 %vm54_vm1, %v1945_v1  ;;  %2458 = vmatmul.mubr.msk.f32.gmra.mrb[60].mxu1 %vm54_vm1, %v2018_v2 }
  0x85   :  { %2398 = vmatprep.mubr.msk.f32.mxu0 %vm54_vm1, %v1946_v3  ;;  %2460 = vmatprep.mubr.msk.f32.mxu1 %vm54_vm1, %v2019_v4 }
  0x88   :  { %2399 = vmatmul.mubr.msk.f32.gmra.mrb[62].mxu0 %vm54_vm1, %v1947_v5  ;;  %2461 = vmatmul.mubr.msk.f32.gmra.mrb[62].mxu1 %vm54_vm1, %v2020_v6 }
  0x89   :  { %2401 = vmatprep.mubr.msk.f32.mxu0 %vm54_vm1, %v1948_v7  ;;  %2463 = vmatprep.mubr.msk.f32.mxu1 %vm54_vm1, %v2021_v8 }
  0x8c   :  { %2402 = vmatmul.mubr.msk.f32.gmra.mrb[64].mxu0 %vm54_vm1, %v1949_v9  ;;  %2464 = vmatmul.mubr.msk.f32.gmra.mrb[64].mxu1 %vm54_vm1, %v2022_v10 }
  0x8d   :  { %2404 = vmatprep.mubr.msk.f32.mxu0 %vm54_vm1, %v1950_v11  ;;  %2466 = vmatprep.mubr.msk.f32.mxu1 %vm54_vm1, %v2023_v12 }
  0x90   :  { %2405 = vmatmul.mubr.msk.f32.gmra.mrb[66].mxu0 %vm54_vm1, %v1951_v13  ;;  %2467 = vmatmul.mubr.msk.f32.gmra.mrb[66].mxu1 %vm54_vm1, %v2024_v14 }
  0x91   :  { %2407 = vmatprep.mubr.msk.f32.mxu0 %vm54_vm1, %v1952_v15  ;;  %2469 = vmatprep.mubr.msk.f32.mxu1 %vm54_vm1, %v2025_v16 }
  0x94   :  { %2408 = vmatmul.mubr.msk.f32.gmra.mrb[68].mxu0 %vm54_vm1, %v1953_v17  ;;  %2470 = vmatmul.mubr.msk.f32.gmra.mrb[68].mxu1 %vm54_vm1, %v2026_v18  ;;  %v3370_v18 = vld [vmem:[%s3656_s2] ss:$0 sm:$0xff] }
  0x95   :  { %2410 = vmatprep.mubr.msk.f32.mxu0 %vm54_vm1, %v1954_v19  ;;  %2472 = vmatprep.mubr.msk.f32.mxu1 %vm54_vm1, %v2027_v20 }
  0x98   :  { %2411 = vmatmul.mubr.msk.f32.gmra.mrb[70].mxu0 %vm54_vm1, %v1955_v21  ;;  %2473 = vmatmul.mubr.msk.f32.gmra.mrb[70].mxu1 %vm54_vm1, %v2028_v22 }
  0xdf   :  { %v3145_v23 = vpop.f32.mrb[0].mxu0  ;;  %v3147_v24 = vpop.f32.mrb[0].mxu1 }
  0xe0   :  { %v3151_v26 = vpop.f32.mrb[1].mxu0  ;;  %v3153_v27 = vpop.f32.mrb[1].mxu1 }
  0xe3   :  { %v3157_v29 = vpop.f32.mrb[2].mxu0  ;;  %v3159_v30 = vpop.f32.mrb[2].mxu1 }
  0xe4   :  { %v3163_v32 = vpop.f32.mrb[3].mxu0  ;;  %v3165_v33 = vpop.f32.mrb[3].mxu1 }
  0xe7   :  { %v3169_v35 = vpop.f32.mrb[4].mxu0  ;;  %v3171_v36 = vpop.f32.mrb[4].mxu1 }
  0xe8   :  { %v3175_v38 = vpop.f32.mrb[5].mxu0  ;;  %v3177_v39 = vpop.f32.mrb[5].mxu1 }
  0xeb   :  { %v3181_v41 = vpop.f32.mrb[6].mxu0  ;;  %v3183_v42 = vpop.f32.mrb[6].mxu1 }
  0xec   :  { %v3187_v44 = vpop.f32.mrb[7].mxu0  ;;  %v3189_v45 = vpop.f32.mrb[7].mxu1 }
  0xef   :  { %v3193_v47 = vpop.f32.mrb[8].mxu0  ;;  %v3195_v48 = vpop.f32.mrb[8].mxu1 }
  0xf0   :  { %v3199_v50 = vpop.f32.mrb[9].mxu0  ;;  %v3201_v51 = vpop.f32.mrb[9].mxu1 }
  0xf3   :  { %v3205_v53 = vpop.f32.mrb[10].mxu0  ;;  %v3207_v54 = vpop.f32.mrb[10].mxu1 }
  0xf4   :  { %v3211_v56 = vpop.f32.mrb[11].mxu0  ;;  %v3213_v57 = vpop.f32.mrb[11].mxu1 }
  0xf7   :  { %v3217_v59 = vpop.f32.mrb[12].mxu0  ;;  %v3219_v60 = vpop.f32.mrb[12].mxu1 }
  0xf8   :  { %v3223_v62 = vpop.f32.mrb[13].mxu0  ;;  %v3225_v63 = vpop.f32.mrb[13].mxu1 }
  0xfb   :  { %v3229_v1 = vpop.f32.mrb[14].mxu0  ;;  %v3231_v2 = vpop.f32.mrb[14].mxu1 }
  0xfc   :  { %v3235_v4 = vpop.f32.mrb[15].mxu0  ;;  %v3237_v5 = vpop.f32.mrb[15].mxu1 }
  0xff   :  { %v3241_v7 = vpop.f32.mrb[16].mxu0  ;;  %v3243_v8 = vpop.f32.mrb[16].mxu1 }
 0x100   :  { %v3247_v10 = vpop.f32.mrb[17].mxu0  ;;  %v3249_v11 = vpop.f32.mrb[17].mxu1 }
 0x103   :  { %v3253_v13 = vpop.f32.mrb[18].mxu0  ;;  %v3255_v14 = vpop.f32.mrb[18].mxu1 }
 0x104   :  { %v3259_v16 = vpop.f32.mrb[19].mxu0  ;;  %v3261_v17 = vpop.f32.mrb[19].mxu1 }
 0x107   :  { %v3265_v19 = vpop.f32.mrb[20].mxu0  ;;  %v3267_v20 = vpop.f32.mrb[20].mxu1 }
 0x108   :  { %v3271_v22 = vpop.f32.mrb[21].mxu0  ;;  %v3273_v12 = vpop.f32.mrb[21].mxu1 }
 0x10b   :  { %v3277_v9 = vpop.f32.mrb[22].mxu0  ;;  %v3279_v6 = vpop.f32.mrb[22].mxu1 }
 0x10c   :  { %v3283_v3 = vpop.f32.mrb[23].mxu0  ;;  %v3285_v0 = vpop.f32.mrb[23].mxu1 }
 0x10f   :  { %v3289_v61 = vpop.f32.mrb[24].mxu0  ;;  %v3291_v58 = vpop.f32.mrb[24].mxu1 }
 0x110   :  { %3683 = vst [vmem:[#allocation2_spill] sm:$0xff] %v3291_v58  ;;  %v3295_v55 = vpop.f32.mrb[25].mxu0  ;;  %v3297_v52 = vpop.f32.mrb[25].mxu1 }
 0x111   :  { %3684 = vst [vmem:[#allocation3_spill] sm:$0xff] %v3295_v55  ;;  %3685 = vst [vmem:[#allocation4_spill] sm:$0xff] %v3297_v52  ;;  %v3707_v52 = vmax.f32 %v3151_v26, %v3153_v27  ;;  %v3709_v27 = vmax.f32 %v3163_v32, %v3165_v33 }
 0x113   :  { %v3301_v49 = vpop.f32.mrb[26].mxu0  ;;  %v3303_v46 = vpop.f32.mrb[26].mxu1 }
 0x114   :  { %3686 = vst [vmem:[#allocation5_spill] sm:$0xff] %v3301_v49  ;;  %3687 = vst [vmem:[#allocation6_spill] sm:$0xff] %v3303_v46  ;;  %v3307_v43 = vpop.f32.mrb[27].mxu0  ;;  %v3309_v40 = vpop.f32.mrb[27].mxu1  ;;  %v3706_v49 = vmax.f32 %v3145_v23, %v3147_v24  ;;  %v3708_v23 = vmax.f32 %v3157_v29, %v3159_v30  ;;  %v3710_v29 = vmax.f32 %v3169_v35, %v3171_v36 }
 0x115   :  { %3688 = vst [vmem:[#allocation7_spill] sm:$0xff] %v3307_v43  ;;  %3689 = vst [vmem:[#allocation8_spill] sm:$0xff] %v3309_v40 }
 0x117   :  { %v3313_v37 = vpop.f32.mrb[28].mxu0  ;;  %v3315_v34 = vpop.f32.mrb[28].mxu1 }
 0x118   :  { %3690 = vst [vmem:[#allocation9_spill] sm:$0xff] %v3313_v37  ;;  %3691 = vst [vmem:[#allocation10_spill] sm:$0xff] %v3315_v34  ;;  %v3319_v31 = vpop.f32.mrb[29].mxu0  ;;  %v3321_v28 = vpop.f32.mrb[29].mxu1 }
 0x119   :  { %3692 = vst [vmem:[#allocation11_spill] sm:$0xff] %v3319_v31  ;;  %3693 = vst [vmem:[#allocation12_spill] sm:$0xff] %v3321_v28 }
 0x11b   :  { %v3325_v25 = vpop.f32.mrb[30].mxu0  ;;  %v3327_v46 = vpop.f32.mrb[30].mxu1 }
 0x11c   :  { %3694 = vst [vmem:[#allocation13_spill] sm:$0xff] %v3325_v25  ;;  %3695 = vst [vmem:[#allocation14_spill] sm:$0xff] %v3327_v46  ;;  %v3331_v40 = vpop.f32.mrb[31].mxu0  ;;  %v3333_v43 = vpop.f32.mrb[31].mxu1 }
 0x11d   :  { %3696 = vst [vmem:[#allocation15_spill] sm:$0xff] %v3331_v40  ;;  %3697 = vst [vmem:[#allocation16_spill] sm:$0xff] %v3333_v43 }
 0x11f   :  { %v3337_v34 = vpop.f32.mrb[32].mxu0  ;;  %v3339_v37 = vpop.f32.mrb[32].mxu1 }
 0x120   :  { %3698 = vst [vmem:[#allocation17_spill] sm:$0xff] %v3337_v34  ;;  %3699 = vst [vmem:[#allocation18_spill] sm:$0xff] %v3339_v37  ;;  %v3343_v28 = vpop.f32.mrb[33].mxu0  ;;  %v3345_v31 = vpop.f32.mrb[33].mxu1 }
 0x121   :  { %3700 = vst [vmem:[#allocation19_spill] sm:$0xff] %v3343_v28  ;;  %3701 = vst [vmem:[#allocation20_spill] sm:$0xff] %v3345_v31 }
 0x123   :  { %v3349_v46 = vpop.f32.mrb[34].mxu0  ;;  %v3351_v25 = vpop.f32.mrb[34].mxu1 }
 0x124   :  { %3702 = vst [vmem:[#allocation21_spill] sm:$0xff] %v3349_v46  ;;  %3703 = vst [vmem:[#allocation22_spill] sm:$0xff] %v3351_v25  ;;  %v3355_v43 = vpop.f32.mrb[35].mxu0  ;;  %v3357_v40 = vpop.f32.mrb[35].mxu1 }
 0x125   :  { %3704 = vst [vmem:[#allocation23_spill] sm:$0xff] %v3355_v43  ;;  %3705 = vst [vmem:[#allocation24_spill] sm:$0xff] %v3357_v40 }
 0x127   :  { %v2361_v37 = vpop.f32.mrb[36].mxu0  ;;  %v2423_v34 = vpop.f32.mrb[36].mxu1 }
 0x128   :  { %v1229_v15 = vmax.f32 %v3706_v49, %v2361_v37  ;;  %v1049_v31 = vpop.f32.mrb[37].mxu0  ;;  %v1475_v28 = vpop.f32.mrb[37].mxu1 }
 0x129   :  { %v1228_v55 = vmax.f32 %v3707_v52, %v1049_v31 }
 0x12a   :  { %v1655_v25 = vmax.f32 %v1229_v15, %v2423_v34 }
 0x12b   :  { %v1654_v46 = vmax.f32 %v1228_v55, %v1475_v28  ;;  %v2364_v21 = vpop.f32.mrb[38].mxu0  ;;  %v2426_v40 = vpop.f32.mrb[38].mxu1 }
 0x12c   :  { %v1698_v43 = vadd.f32 %v3370_v18, %v1655_v25  ;;  %v1231_v24 = vmax.f32 %v3708_v23, %v2364_v21  ;;  %v1059_v37 = vpop.f32.mrb[39].mxu0  ;;  %v1485_v49 = vpop.f32.mrb[39].mxu1 }
 0x12d   :  { %v1697_v26 = vadd.f32 %v3370_v18, %v1654_v46  ;;  %v1230_v31 = vmax.f32 %v3709_v27, %v1059_v37 }
 0x12e   :  { %v1734_v52 = vmax.f32 %v1698_v43, 0.0  ;;  %v1657_v34 = vmax.f32 %v1231_v24, %v2426_v40  ;;  %v3711_v40 = vmax.f32 %v3175_v38, %v3177_v39 }
 0x12f   :  { %v1733_v28 = vmax.f32 %v1697_v26, 0.0  ;;  %v1656_v55 = vmax.f32 %v1230_v31, %v1485_v49  ;;  %v2367_v15 = vpop.f32.mrb[40].mxu0  ;;  %v2429_v58 = vpop.f32.mrb[40].mxu1  ;;  %v3712_v26 = vmax.f32 %v3181_v41, %v3183_v42 }
 0x130   :  { %1771 = vst.msk [vmem:[%s3657_s3 + $0x8] sm:$0xff] %vm1769_vm4, %v1734_v52  ;;  %v1700_v25 = vadd.f32 %v3370_v18, %v1657_v34  ;;  %v1233_v30 = vmax.f32 %v3710_v29, %v2367_v15  ;;  %v1069_v46 = vpop.f32.mrb[41].mxu0  ;;  %v1495_v32 = vpop.f32.mrb[41].mxu1  ;;  %v3714_v29 = vmax.f32 %v3193_v47, %v3195_v48 }
 0x131   :  { %1770 = vst.msk [vmem:[%s3657_s3] sm:$0xff] %vm1769_vm4, %v1733_v28  ;;  %v1699_v33 = vadd.f32 %v3370_v18, %v1656_v55  ;;  %v1232_v43 = vmax.f32 %v3711_v40, %v1069_v46 }
 0x132   :  { %v1736_v21 = vmax.f32 %v1700_v25, 0.0  ;;  %v1659_v23 = vmax.f32 %v1233_v30, %v2429_v58  ;;  %v3713_v58 = vmax.f32 %v3187_v44, %v3189_v45 }
 0x133   :  { %v1735_v24 = vmax.f32 %v1699_v33, 0.0  ;;  %v1658_v37 = vmax.f32 %v1232_v43, %v1495_v32  ;;  %v2370_v49 = vpop.f32.mrb[42].mxu0  ;;  %v2432_v35 = vpop.f32.mrb[42].mxu1  ;;  %v3715_v32 = vmax.f32 %v3199_v50, %v3201_v51 }
 0x134   :  { %1773 = vst.msk [vmem:[%s3657_s3 + $0x18] sm:$0xff] %vm1769_vm4, %v1736_v21  ;;  %v1702_v36 = vadd.f32 %v3370_v18, %v1659_v23  ;;  %v1235_v27 = vmax.f32 %v3712_v26, %v2370_v49  ;;  %v1079_v31 = vpop.f32.mrb[43].mxu0  ;;  %v1505_v38 = vpop.f32.mrb[43].mxu1 }
 0x135   :  { %1772 = vst.msk [vmem:[%s3657_s3 + $0x10] sm:$0xff] %vm1769_vm4, %v1735_v24  ;;  %v1701_v39 = vadd.f32 %v3370_v18, %v1658_v37  ;;  %v1234_v52 = vmax.f32 %v3713_v58, %v1079_v31  ;;  %v3716_v37 = vmax.f32 %v3205_v53, %v3207_v54 }
 0x136   :  { %v1738_v34 = vmax.f32 %v1702_v36, 0.0  ;;  %v1661_v28 = vmax.f32 %v1235_v27, %v2432_v35  ;;  %v3717_v36 = vmax.f32 %v3211_v56, %v3213_v57 }
 0x137   :  { %v1737_v55 = vmax.f32 %v1701_v39, 0.0  ;;  %v1660_v15 = vmax.f32 %v1234_v52, %v1505_v38  ;;  %v2373_v25 = vpop.f32.mrb[44].mxu0  ;;  %v2435_v41 = vpop.f32.mrb[44].mxu1  ;;  %v3718_v52 = vmax.f32 %v3217_v59, %v3219_v60 }
 0x138   :  { %1775 = vst.msk [vmem:[%s3657_s3 + $0x28] sm:$0xff] %vm1769_vm4, %v1738_v34  ;;  %v1704_v42 = vadd.f32 %v3370_v18, %v1661_v28  ;;  %v1237_v30 = vmax.f32 %v3714_v29, %v2373_v25  ;;  %v1089_v46 = vpop.f32.mrb[45].mxu0  ;;  %v1515_v44 = vpop.f32.mrb[45].mxu1 }
 0x139   :  { %1774 = vst.msk [vmem:[%s3657_s3 + $0x20] sm:$0xff] %vm1769_vm4, %v1737_v55  ;;  %v1703_v45 = vadd.f32 %v3370_v18, %v1660_v15  ;;  %v1236_v33 = vmax.f32 %v3715_v32, %v1089_v46  ;;  %v3719_v55 = vmax.f32 %v3223_v62, %v3225_v63  ;;  %v3720_v46 = vmax.f32 %v3229_v1, %v3231_v2 }
 0x13a   :  { %v1740_v40 = vmax.f32 %v1704_v42, 0.0  ;;  %v1663_v43 = vmax.f32 %v1237_v30, %v2435_v41  ;;  %v3721_v32 = vmax.f32 %v3235_v4, %v3237_v5 }
 0x13b   :  { %v1739_v21 = vmax.f32 %v1703_v45, 0.0  ;;  %v1662_v23 = vmax.f32 %v1236_v33, %v1515_v44  ;;  %v2376_v24 = vpop.f32.mrb[46].mxu0  ;;  %v2438_v47 = vpop.f32.mrb[46].mxu1 }
 0x13c   :  { %1777 = vst.msk [vmem:[%s3657_s3 + $0x38] sm:$0xff] %vm1769_vm4, %v1740_v40  ;;  %v1706_v48 = vadd.f32 %v3370_v18, %v1663_v43  ;;  %v1239_v49 = vmax.f32 %v3716_v37, %v2376_v24  ;;  %v1099_v35 = vpop.f32.mrb[47].mxu0  ;;  %v1525_v50 = vpop.f32.mrb[47].mxu1 }
 0x13d   :  { %1776 = vst.msk [vmem:[%s3657_s3 + $0x30] sm:$0xff] %vm1769_vm4, %v1739_v21  ;;  %v1705_v51 = vadd.f32 %v3370_v18, %v1662_v23  ;;  %v1238_v26 = vmax.f32 %v3717_v36, %v1099_v35 }
 0x13e   :  { %v1742_v27 = vmax.f32 %v1706_v48, 0.0  ;;  %v1665_v31 = vmax.f32 %v1239_v49, %v2438_v47  ;;  %v3722_v47 = vmax.f32 %v3241_v7, %v3243_v8  ;;  %v3723_v49 = vmax.f32 %v3247_v10, %v3249_v11 }
 0x13f   :  { %v1741_v38 = vmax.f32 %v1705_v51, 0.0  ;;  %v1664_v39 = vmax.f32 %v1238_v26, %v1525_v50  ;;  %v2379_v58 = vpop.f32.mrb[48].mxu0  ;;  %v2441_v53 = vpop.f32.mrb[48].mxu1 }
 0x140   :  { %1779 = vst.msk [vmem:[%s3657_s3 + $0x48] sm:$0xff] %vm1769_vm4, %v1742_v27  ;;  %v1708_v54 = vadd.f32 %v3370_v18, %v1665_v31  ;;  %v1241_v34 = vmax.f32 %v3718_v52, %v2379_v58  ;;  %v1109_v28 = vpop.f32.mrb[49].mxu0  ;;  %v1535_v56 = vpop.f32.mrb[49].mxu1  ;;  %v3724_v31 = vmax.f32 %v3253_v13, %v3255_v14  ;;  %v3725_v58 = vmax.f32 %v3259_v16, %v3261_v17 }
 0x141   :  { %1778 = vst.msk [vmem:[%s3657_s3 + $0x40] sm:$0xff] %vm1769_vm4, %v1741_v38  ;;  %v1707_v57 = vadd.f32 %v3370_v18, %v1664_v39  ;;  %v1240_v15 = vmax.f32 %v3719_v55, %v1109_v28 }
 0x142   :  { %v1744_v25 = vmax.f32 %v1708_v54, 0.0  ;;  %v1667_v41 = vmax.f32 %v1241_v34, %v2441_v53 }
 0x143   :  { %v1743_v42 = vmax.f32 %v1707_v57, 0.0  ;;  %v1666_v29 = vmax.f32 %v1240_v15, %v1535_v56  ;;  %v2382_v30 = vpop.f32.mrb[50].mxu0  ;;  %v2444_v59 = vpop.f32.mrb[50].mxu1  ;;  %v3726_v57 = vmax.f32 %v3265_v19, %v3267_v20 }
 0x144   :  { %1781 = vst.msk [vmem:[%s3657_s3 + $0x58] sm:$0xff] %vm1769_vm4, %v1744_v25  ;;  %v1710_v60 = vadd.f32 %v3370_v18, %v1667_v41  ;;  %v1243_v44 = vmax.f32 %v3720_v46, %v2382_v30  ;;  %v1119_v45 = vpop.f32.mrb[51].mxu0  ;;  %v1545_v62 = vpop.f32.mrb[51].mxu1  ;;  %v3727_v25 = vmax.f32 %v3271_v22, %v3273_v12  ;;  %v3728_v46 = vmax.f32 %v3277_v9, %v3279_v6 }
 0x145   :  { %1780 = vst.msk [vmem:[%s3657_s3 + $0x50] sm:$0xff] %vm1769_vm4, %v1743_v42  ;;  %v1709_v63 = vadd.f32 %v3370_v18, %v1666_v29  ;;  %v1242_v33 = vmax.f32 %v3721_v32, %v1119_v45 }
 0x146   :  { %v1746_v40 = vmax.f32 %v1710_v60, 0.0  ;;  %v1669_v43 = vmax.f32 %v1243_v44, %v2444_v59 }
 0x147   :  { %v1745_v21 = vmax.f32 %v1709_v63, 0.0  ;;  %v1668_v23 = vmax.f32 %v1242_v33, %v1545_v62  ;;  %v2385_v24 = vpop.f32.mrb[52].mxu0  ;;  %v2447_v1 = vpop.f32.mrb[52].mxu1  ;;  %v3729_v62 = vmax.f32 %v3283_v3, %v3285_v0 }
 0x148   :  { %1783 = vst.msk [vmem:[%s3657_s3 + $0x68] sm:$0xff] %vm1769_vm4, %v1746_v40  ;;  %v1712_v2 = vadd.f32 %v3370_v18, %v1669_v43  ;;  %v1245_v48 = vmax.f32 %v3722_v47, %v2385_v24  ;;  %v1129_v37 = vpop.f32.mrb[53].mxu0  ;;  %v1555_v4 = vpop.f32.mrb[53].mxu1  ;;  %v3732_v47 = vld [vmem:[#allocation3_spill] sm:$0xff] }
 0x149   :  { %1782 = vst.msk [vmem:[%s3657_s3 + $0x60] sm:$0xff] %vm1769_vm4, %v1745_v21  ;;  %v1711_v5 = vadd.f32 %v3370_v18, %v1668_v23  ;;  %v1244_v35 = vmax.f32 %v3723_v49, %v1129_v37  ;;  %v3730_v23 = vld [vmem:[#allocation2_spill] sm:$0xff] }
 0x14a   :  { %v1748_v50 = vmax.f32 %v1712_v2, 0.0  ;;  %v1671_v51 = vmax.f32 %v1245_v48, %v2447_v1  ;;  %v3731_v24 = vmax.f32 %v3289_v61, %v3730_v23  ;;  %v3733_v48 = vld [vmem:[#allocation4_spill] sm:$0xff] }
 0x14b   :  { %v1747_v36 = vmax.f32 %v1711_v5, 0.0  ;;  %v1670_v26 = vmax.f32 %v1244_v35, %v1555_v4  ;;  %v2388_v27 = vpop.f32.mrb[54].mxu0  ;;  %v2450_v7 = vpop.f32.mrb[54].mxu1  ;;  %v3734_v37 = vmax.f32 %v3732_v47, %v3733_v48 }
 0x14c   :  { %1785 = vst.msk [vmem:[%s3657_s3 + $0x78] sm:$0xff] %vm1769_vm4, %v1748_v50  ;;  %v1714_v8 = vadd.f32 %v3370_v18, %v1671_v51  ;;  %v1247_v38 = vmax.f32 %v3724_v31, %v2388_v27  ;;  %v1139_v39 = vpop.f32.mrb[55].mxu0  ;;  %v1565_v10 = vpop.f32.mrb[55].mxu1  ;;  %v3736_v27 = vld [vmem:[#allocation6_spill] sm:$0xff] }
 0x14d   :  { %1784 = vst.msk [vmem:[%s3657_s3 + $0x70] sm:$0xff] %vm1769_vm4, %v1747_v36  ;;  %v1713_v11 = vadd.f32 %v3370_v18, %v1670_v26  ;;  %v1246_v53 = vmax.f32 %v3725_v58, %v1139_v39  ;;  %v3735_v26 = vld [vmem:[#allocation5_spill] sm:$0xff] }
 0x14e   :  { %v1750_v54 = vmax.f32 %v1714_v8, 0.0  ;;  %v1673_v52 = vmax.f32 %v1247_v38, %v2450_v7  ;;  %v3737_v7 = vmax.f32 %v3735_v26, %v3736_v27 }
 0x14f   :  { %v1749_v34 = vmax.f32 %v1713_v11, 0.0  ;;  %v1672_v28 = vmax.f32 %v1246_v53, %v1565_v10  ;;  %v2391_v56 = vpop.f32.mrb[56].mxu0  ;;  %v2453_v13 = vpop.f32.mrb[56].mxu1  ;;  %v3738_v10 = vld [vmem:[#allocation7_spill] sm:$0xff]  ;;  %v3739_v11 = vld [vmem:[#allocation8_spill] sm:$0xff] }
 0x150   :  { %1787 = vst.msk [vmem:[%s3657_s3 + $0x88] sm:$0xff] %vm1769_vm4, %v1750_v54  ;;  %v1716_v14 = vadd.f32 %v3370_v18, %v1673_v52  ;;  %v1249_v55 = vmax.f32 %v3726_v57, %v2391_v56  ;;  %v1149_v15 = vpop.f32.mrb[57].mxu0  ;;  %v1575_v16 = vpop.f32.mrb[57].mxu1  ;;  %v3740_v58 = vmax.f32 %v3738_v10, %v3739_v11  ;;  %v3741_v57 = vld [vmem:[#allocation9_spill] sm:$0xff] }
 0x151   :  { %1786 = vst.msk [vmem:[%s3657_s3 + $0x80] sm:$0xff] %vm1769_vm4, %v1749_v34  ;;  %v1715_v17 = vadd.f32 %v3370_v18, %v1672_v28  ;;  %v1248_v41 = vmax.f32 %v3727_v25, %v1149_v15 }
 0x152   :  { %v1752_v42 = vmax.f32 %v1716_v14, 0.0  ;;  %v1675_v29 = vmax.f32 %v1249_v55, %v2453_v13  ;;  %v3742_v55 = vld [vmem:[#allocation10_spill] sm:$0xff] }
 0x153   :  { %v1751_v30 = vmax.f32 %v1715_v17, 0.0  ;;  %v1674_v59 = vmax.f32 %v1248_v41, %v1575_v16  ;;  %v2394_v60 = vpop.f32.mrb[58].mxu0  ;;  %v2456_v19 = vpop.f32.mrb[58].mxu1  ;;  %v3743_v15 = vmax.f32 %v3741_v57, %v3742_v55 }
 0x154   :  { %1789 = vst.msk [vmem:[%s3657_s3 + $0x98] sm:$0xff] %vm1769_vm4, %v1752_v42  ;;  %v1718_v20 = vadd.f32 %v3370_v18, %v1675_v29  ;;  %v1251_v44 = vmax.f32 %v3728_v46, %v2394_v60  ;;  %v1159_v45 = vpop.f32.mrb[59].mxu0  ;;  %v1585_v12 = vpop.f32.mrb[59].mxu1  ;;  %v3744_v42 = vld [vmem:[#allocation11_spill] sm:$0xff]  ;;  %v3745_v29 = vld [vmem:[#allocation12_spill] sm:$0xff] }
 0x155   :  { %1788 = vst.msk [vmem:[%s3657_s3 + $0x90] sm:$0xff] %vm1769_vm4, %v1751_v30  ;;  %v1717_v22 = vadd.f32 %v3370_v18, %v1674_v59  ;;  %v1250_v63 = vmax.f32 %v3729_v62, %v1159_v45  ;;  %v3746_v30 = vmax.f32 %v3744_v42, %v3745_v29  ;;  %v3748_v62 = vld [vmem:[#allocation14_spill] sm:$0xff] }
 0x156   :  { %v1754_v32 = vmax.f32 %v1718_v20, 0.0  ;;  %v1677_v33 = vmax.f32 %v1251_v44, %v2456_v19 }
 0x157   :  { %v1753_v40 = vmax.f32 %v1717_v22, 0.0  ;;  %v1676_v43 = vmax.f32 %v1250_v63, %v1585_v12  ;;  %v2397_v21 = vpop.f32.mrb[60].mxu0  ;;  %v2459_v6 = vpop.f32.mrb[60].mxu1  ;;  %v3747_v22 = vld [vmem:[#allocation13_spill] sm:$0xff] }
 0x158   :  { %1791 = vst.msk [vmem:[%s3657_s3 + $0xa8] sm:$0xff] %vm1769_vm4, %v1754_v32  ;;  %v1720_v9 = vadd.f32 %v3370_v18, %v1677_v33  ;;  %v1253_v1 = vmax.f32 %v3731_v24, %v2397_v21  ;;  %v1169_v2 = vpop.f32.mrb[61].mxu0  ;;  %v1595_v0 = vpop.f32.mrb[61].mxu1  ;;  %v3749_v63 = vmax.f32 %v3747_v22, %v3748_v62  ;;  %v3750_v21 = vld [vmem:[#allocation15_spill] sm:$0xff] }
 0x159   :  { %1790 = vst.msk [vmem:[%s3657_s3 + $0xa0] sm:$0xff] %vm1769_vm4, %v1753_v40  ;;  %v1719_v3 = vadd.f32 %v3370_v18, %v1676_v43  ;;  %v1252_v4 = vmax.f32 %v3734_v37, %v1169_v2  ;;  %v3753_v37 = vld [vmem:[#allocation17_spill] sm:$0xff] }
 0x15a   :  { %v1756_v5 = vmax.f32 %v1720_v9, 0.0  ;;  %v1679_v49 = vmax.f32 %v1253_v1, %v2459_v6  ;;  %v3751_v6 = vld [vmem:[#allocation16_spill] sm:$0xff] }
 0x15b   :  { %v1755_v35 = vmax.f32 %v1719_v3, 0.0  ;;  %v1678_v50 = vmax.f32 %v1252_v4, %v1595_v0  ;;  %v2400_v51 = vpop.f32.mrb[62].mxu0  ;;  %v2462_v61 = vpop.f32.mrb[62].mxu1  ;;  %v3752_v9 = vmax.f32 %v3750_v21, %v3751_v6  ;;  %v3754_v4 = vld [vmem:[#allocation18_spill] sm:$0xff] }
 0x15c   :  { %1793 = vst.msk [vmem:[%s3657_s3 + $0xb8] sm:$0xff] %vm1769_vm4, %v1756_v5  ;;  %v1722_v36 = vadd.f32 %v3370_v18, %v1679_v49  ;;  %v1255_v8 = vmax.f32 %v3737_v7, %v2400_v51  ;;  %v1179_v31 = vpop.f32.mrb[63].mxu0  ;;  %v1605_v38 = vpop.f32.mrb[63].mxu1  ;;  %v3755_v5 = vmax.f32 %v3753_v37, %v3754_v4 }
 0x15d   :  { %1792 = vst.msk [vmem:[%s3657_s3 + $0xb0] sm:$0xff] %vm1769_vm4, %v1755_v35  ;;  %v1721_v39 = vadd.f32 %v3370_v18, %v1678_v50  ;;  %v1254_v53 = vmax.f32 %v3740_v58, %v1179_v31  ;;  %v3759_v58 = vld [vmem:[#allocation21_spill] sm:$0xff] }
 0x15e   :  { %v1758_v54 = vmax.f32 %v1722_v36, 0.0  ;;  %v1681_v52 = vmax.f32 %v1255_v8, %v2462_v61  ;;  %v3756_v61 = vld [vmem:[#allocation19_spill] sm:$0xff]  ;;  %v3757_v36 = vld [vmem:[#allocation20_spill] sm:$0xff] }
 0x15f   :  { %v1757_v34 = vmax.f32 %v1721_v39, 0.0  ;;  %v1680_v28 = vmax.f32 %v1254_v53, %v1605_v38  ;;  %v2403_v56 = vpop.f32.mrb[64].mxu0  ;;  %v2465_v13 = vpop.f32.mrb[64].mxu1  ;;  %v3758_v26 = vmax.f32 %v3756_v61, %v3757_v36  ;;  %v3760_v53 = vld [vmem:[#allocation22_spill] sm:$0xff] }
 0x160   :  { %1795 = vst.msk [vmem:[%s3657_s3 + $0xc8] sm:$0xff] %vm1769_vm4, %v1758_v54  ;;  %v1724_v14 = vadd.f32 %v3370_v18, %v1681_v52  ;;  %v1257_v16 = vmax.f32 %v3743_v15, %v2403_v56  ;;  %v1189_v17 = vpop.f32.mrb[65].mxu0  ;;  %v1615_v25 = vpop.f32.mrb[65].mxu1  ;;  %v3761_v54 = vmax.f32 %v3759_v58, %v3760_v53 }
 0x161   :  { %1794 = vst.msk [vmem:[%s3657_s3 + $0xc0] sm:$0xff] %vm1769_vm4, %v1757_v34  ;;  %v1723_v41 = vadd.f32 %v3370_v18, %v1680_v28  ;;  %v1256_v59 = vmax.f32 %v3746_v30, %v1189_v17 }
 0x162   :  { %v1760_v60 = vmax.f32 %v1724_v14, 0.0  ;;  %v1683_v19 = vmax.f32 %v1257_v16, %v2465_v13  ;;  %v3762_v13 = vld [vmem:[#allocation23_spill] sm:$0xff]  ;;  %v3763_v14 = vld [vmem:[#allocation24_spill] sm:$0xff] }
 0x163   :  { %v1759_v20 = vmax.f32 %v1723_v41, 0.0  ;;  %v1682_v46 = vmax.f32 %v1256_v59, %v1615_v25  ;;  %v2406_v44 = vpop.f32.mrb[66].mxu0  ;;  %v2468_v45 = vpop.f32.mrb[66].mxu1  ;;  %v3764_v57 = vmax.f32 %v3762_v13, %v3763_v14 }
 0x164   :  { %1797 = vst.msk [vmem:[%s3657_s3 + $0xd8] sm:$0xff] %vm1769_vm4, %v1760_v60  ;;  %v1726_v12 = vadd.f32 %v3370_v18, %v1683_v19  ;;  %v1259_v32 = vmax.f32 %v3749_v63, %v2406_v44  ;;  %v1199_v33 = vpop.f32.mrb[67].mxu0  ;;  %v1625_v40 = vpop.f32.mrb[67].mxu1 }
 0x165   :  { %1796 = vst.msk [vmem:[%s3657_s3 + $0xd0] sm:$0xff] %vm1769_vm4, %v1759_v20  ;;  %v1725_v43 = vadd.f32 %v3370_v18, %v1682_v46  ;;  %v1258_v23 = vmax.f32 %v3752_v9, %v1199_v33 }
 0x166   :  { %v1762_v24 = vmax.f32 %v1726_v12, 0.0  ;;  %v1685_v1 = vmax.f32 %v1259_v32, %v2468_v45 }
 0x167   :  { %v1761_v2 = vmax.f32 %v1725_v43, 0.0  ;;  %v1684_v0 = vmax.f32 %v1258_v23, %v1625_v40  ;;  %v2409_v3 = vpop.f32.mrb[68].mxu0  ;;  %v2471_v47 = vpop.f32.mrb[68].mxu1 }
 0x168   :  { %1799 = vst.msk [vmem:[%s3657_s3 + $0xe8] sm:$0xff] %vm1769_vm4, %v1762_v24  ;;  %v1728_v48 = vadd.f32 %v3370_v18, %v1685_v1  ;;  %v1261_v49 = vmax.f32 %v3755_v5, %v2409_v3  ;;  %v1209_v35 = vpop.f32.mrb[69].mxu0  ;;  %v1635_v50 = vpop.f32.mrb[69].mxu1 }
 0x169   :  { %1798 = vst.msk [vmem:[%s3657_s3 + $0xe0] sm:$0xff] %vm1769_vm4, %v1761_v2  ;;  %v1727_v51 = vadd.f32 %v3370_v18, %v1684_v0  ;;  %v1260_v27 = vmax.f32 %v3758_v26, %v1209_v35 }
 0x16a   :  { %v1764_v7 = vmax.f32 %v1728_v48, 0.0  ;;  %v1687_v8 = vmax.f32 %v1261_v49, %v2471_v47 }
 0x16b   :  { %v1763_v31 = vmax.f32 %v1727_v51, 0.0  ;;  %v1686_v38 = vmax.f32 %v1260_v27, %v1635_v50  ;;  %v2412_v39 = vpop.f32.mrb[70].mxu0  ;;  %v2474_v10 = vpop.f32.mrb[70].mxu1 }
 0x16c   :  { %1801 = vst.msk [vmem:[%s3657_s3 + $0xf8] sm:$0xff] %vm1769_vm4, %v1764_v7  ;;  %v1730_v11 = vadd.f32 %v3370_v18, %v1687_v8  ;;  %v1263_v52 = vmax.f32 %v3761_v54, %v2412_v39  ;;  %v1219_v34 = vpop.f32.mrb[71].mxu0  ;;  %v1645_v28 = vpop.f32.mrb[71].mxu1 }
 0x16d   :  { %1800 = vst.msk [vmem:[%s3657_s3 + $0xf0] sm:$0xff] %vm1769_vm4, %v1763_v31  ;;  %v1729_v56 = vadd.f32 %v3370_v18, %v1686_v38  ;;  %v1262_v55 = vmax.f32 %v3764_v57, %v1219_v34 }
 0x16e   :  { %v1766_v15 = vmax.f32 %v1730_v11, 0.0  ;;  %v1689_v16 = vmax.f32 %v1263_v52, %v2474_v10 }
 0x16f   :  { %v1765_v17 = vmax.f32 %v1729_v56, 0.0  ;;  %v1688_v25 = vmax.f32 %v1262_v55, %v1645_v28 }
 0x170   :  { %1803 = vst.msk [vmem:[%s3657_s3 + $0x108] sm:$0xff] %vm1769_vm4, %v1766_v15  ;;  %v1732_v41 = vadd.f32 %v3370_v18, %v1689_v16 }
 0x171   :  { %1802 = vst.msk [vmem:[%s3657_s3 + $0x100] sm:$0xff] %vm1769_vm4, %v1765_v17  ;;  %v1731_v42 = vadd.f32 %v3370_v18, %v1688_v25 }
 0x172   :  { %v1768_v29 = vmax.f32 %v1732_v41, 0.0 }
 0x173   :  { %v1767_v30 = vmax.f32 %v1731_v42, 0.0 }
 0x174   :  { %1805 = vst.msk [vmem:[%s3657_s3 + $0x118] sm:$0xff] %vm1769_vm4, %v1768_v29 }
 0x175   :  { %1804 = vst.msk [vmem:[%s3657_s3 + $0x110] sm:$0xff] %vm1769_vm4, %v1767_v30 }

// kernel: net_forward.4
= control target key start
LH: loop header
LB: loop body
LE: loop exit
PB: predicated region body
PF: predicated region fallthrough
CT: control target
= control target key end

     0   :  { %v1468_v0 = vmov 0.0|0.0   ;;  %vm93_vm0 = vcmask 949248   ;;  %vm106_vm1 = vcmask 1043456   ;;  %vm904_vm2 = vcmask 408576   ;;  %s2166_s1 = inlined_call_operand.vmem [shape: f32[500,50], index: 1, kind: input, shape index: {}]   ;;  %s2167_s0 = inlined_call_operand.vmem [shape: f32[4,32,500], index: 0, kind: input, shape index: {}]   ;;  %s2168_s2 = inlined_call_operand.vmem [shape: f32[1,50], index: 2, kind: input, shape index: {}]   ;;  %s2169_s3 = inlined_call_operand.vmem [shape: f32[32,50], index: 3, kind: output, shape index: {}]  }
   0x1   :  { %1190 = vmatprep.subr.bf16.mxu1 %v1468_v0  ;;  %v30_v1 = vld [vmem:[%s2166_s1 + $0x80] sm:$0xff]  ;;  %v31_v2 = vld [vmem:[%s2166_s1 + $0x88] sm:$0xff]  ;;  %v32_v10 = vld [vmem:[%s2166_s1 + $0x90] sm:$0xff] }
   0x2   :  { %v46_v3 = vld [vmem:[%s2166_s1 + $0x100] sm:$0xff]  ;;  %v1500_v4 = vpack.c.bf16 %v31_v2, %v30_v1  ;;  %v47_v5 = vld [vmem:[%s2166_s1 + $0x108] sm:$0xff]  ;;  %v33_v11 = vld [vmem:[%s2166_s1 + $0x98] sm:$0xff] }
   0x3   :  { %v14_v6 = vld [vmem:[%s2166_s1] sm:$0xff]  ;;  %v15_v7 = vld [vmem:[%s2166_s1 + $0x8] sm:$0xff]  ;;  %v1511_v8 = vpack.c.bf16 %v47_v5, %v46_v3  ;;  %v48_v12 = vld [vmem:[%s2166_s1 + $0x110] sm:$0xff]  ;;  %v1525_v13 = vpack.c.bf16 %v33_v11, %v32_v10 }
   0x4   :  { %v1513_v9 = vpack.c.bf16 %v15_v7, %v14_v6  ;;  %1159 = vmatprep.subr.bf16.mxu0 %v1500_v4  ;;  %v49_v14 = vld [vmem:[%s2166_s1 + $0x118] sm:$0xff]  ;;  %v16_v15 = vld [vmem:[%s2166_s1 + $0x10] sm:$0xff]  ;;  %v34_v19 = vld [vmem:[%s2166_s1 + $0xa0] sm:$0xff] }
   0x5   :  { %v17_v16 = vld [vmem:[%s2166_s1 + $0x18] sm:$0xff]  ;;  %1192 = vmatpush1.bf16.msra.mxu1 %v1511_v8  ;;  %v1538_v17 = vpack.c.bf16 %v49_v14, %v48_v12  ;;  %v35_v20 = vld [vmem:[%s2166_s1 + $0xa8] sm:$0xff]  ;;  %v50_v21 = vld [vmem:[%s2166_s1 + $0x120] sm:$0xff] }
   0x6   :  { %1161 = vmatpush3.bf16.msra.mxu0 %v1513_v9  ;;  %v1540_v18 = vpack.c.bf16 %v17_v16, %v16_v15  ;;  %1193 = vmatprep.subr.bf16.mxu1 %v1468_v0  ;;  %v1553_v22 = vpack.c.bf16 %v35_v20, %v34_v19  ;;  %v51_v23 = vld [vmem:[%s2166_s1 + $0x128] sm:$0xff]  ;;  %v18_v24 = vld [vmem:[%s2166_s1 + $0x20] sm:$0xff]  ;;  %v36_v26 = vld [vmem:[%s2166_s1 + $0xb0] sm:$0xff] }
   0x7   :  { %1163 = vmatprep.subr.bf16.mxu0 %v1525_v13  ;;  %v19_v25 = vld [vmem:[%s2166_s1 + $0x28] sm:$0xff]  ;;  %v37_v27 = vld [vmem:[%s2166_s1 + $0xb8] sm:$0xff]  ;;  %v1572_v28 = vpack.c.bf16 %v51_v23, %v50_v21  ;;  %v52_v30 = vld [vmem:[%s2166_s1 + $0x130] sm:$0xff] }
   0x8   :  { %v1574_v29 = vpack.c.bf16 %v19_v25, %v18_v24  ;;  %v1581_v31 = vpack.c.bf16 %v37_v27, %v36_v26  ;;  %v53_v32 = vld [vmem:[%s2166_s1 + $0x138] sm:$0xff]  ;;  %v20_v33 = vld [vmem:[%s2166_s1 + $0x30] sm:$0xff]  ;;  %v38_v35 = vld [vmem:[%s2166_s1 + $0xc0] sm:$0xff] }
   0x9   :  { %1195 = vmatpush1.bf16.msra.mxu1 %v1538_v17  ;;  %v21_v34 = vld [vmem:[%s2166_s1 + $0x38] sm:$0xff]  ;;  %v39_v36 = vld [vmem:[%s2166_s1 + $0xc8] sm:$0xff]  ;;  %v1600_v37 = vpack.c.bf16 %v53_v32, %v52_v30  ;;  %v54_v39 = vld [vmem:[%s2166_s1 + $0x140] sm:$0xff] }
   0xa   :  { %1165 = vmatpush3.bf16.msra.mxu0 %v1540_v18  ;;  %1196 = vmatprep.subr.bf16.mxu1 %v1468_v0  ;;  %v1602_v38 = vpack.c.bf16 %v21_v34, %v20_v33  ;;  %v1609_v40 = vpack.c.bf16 %v39_v36, %v38_v35  ;;  %v55_v41 = vld [vmem:[%s2166_s1 + $0x148] sm:$0xff]  ;;  %v22_v42 = vld [vmem:[%s2166_s1 + $0x40] sm:$0xff]  ;;  %v40_v44 = vld [vmem:[%s2166_s1 + $0xd0] sm:$0xff] }
   0xb   :  { %1167 = vmatprep.subr.bf16.mxu0 %v1553_v22  ;;  %v23_v43 = vld [vmem:[%s2166_s1 + $0x48] sm:$0xff]  ;;  %v41_v45 = vld [vmem:[%s2166_s1 + $0xd8] sm:$0xff]  ;;  %v1628_v46 = vpack.c.bf16 %v55_v41, %v54_v39  ;;  %v56_v48 = vld [vmem:[%s2166_s1 + $0x150] sm:$0xff] }
   0xc   :  { %v1630_v47 = vpack.c.bf16 %v23_v43, %v22_v42  ;;  %v78_v49 = vld [vmem:[%s2167_s0 + $0x8] sm:$0xff]  ;;  %v1640_v50 = vpack.c.bf16 %v41_v45, %v40_v44  ;;  %v57_v51 = vld [vmem:[%s2166_s1 + $0x158] sm:$0xff]  ;;  %v24_v52 = vld [vmem:[%s2166_s1 + $0x50] sm:$0xff] }
   0xd   :  { %1198 = vmatpush1.bf16.msra.mxu1 %v1572_v28  ;;  %v25_v53 = vld [vmem:[%s2166_s1 + $0x58] sm:$0xff]  ;;  %v42_v54 = vld [vmem:[%s2166_s1 + $0xe0] sm:$0xff]  ;;  %v43_v55 = vld [vmem:[%s2166_s1 + $0xe8] sm:$0xff]  ;;  %174 = vmatprep.mubr.f32.mxu0 %v78_v49  ;;  %v1659_v56 = vpack.c.bf16 %v57_v51, %v56_v48 }
   0xe   :  { %1169 = vmatpush3.bf16.msra.mxu0 %v1574_v29  ;;  %1199 = vmatprep.subr.bf16.mxu1 %v1468_v0  ;;  %v1661_v57 = vpack.c.bf16 %v25_v53, %v24_v52  ;;  %v58_v58 = vld [vmem:[%s2166_s1 + $0x160] sm:$0xff]  ;;  %v1668_v59 = vpack.c.bf16 %v43_v55, %v42_v54  ;;  %v59_v60 = vld [vmem:[%s2166_s1 + $0x168] sm:$0xff]  ;;  %v44_v63 = vld [vmem:[%s2166_s1 + $0xf0] sm:$0xff] }
   0xf   :  { %1171 = vmatprep.subr.bf16.mxu0 %v1581_v31  ;;  %v26_v61 = vld [vmem:[%s2166_s1 + $0x60] sm:$0xff]  ;;  %v27_v62 = vld [vmem:[%s2166_s1 + $0x68] sm:$0xff]  ;;  %v45_v1 = vld [vmem:[%s2166_s1 + $0xf8] sm:$0xff]  ;;  %v1690_v3 = vpack.c.bf16 %v59_v60, %v58_v58  ;;  %v1469_v60 = vmov 0.0  }
  0x10   :  { %v80_v2 = vld [vmem:[%s2167_s0 + $0x18] sm:$0xff]  ;;  %v1692_v5 = vpack.c.bf16 %v27_v62, %v26_v61  ;;  %v60_v6 = vld [vmem:[%s2166_s1 + $0x170] sm:$0xff]  ;;  %v1699_v7 = vpack.c.bf16 %v45_v1, %v44_v63  ;;  %v62_v16 = vld [vmem:[%s2166_s1 + $0x180] sm:$0xff] }
  0x11   :  { %1201 = vmatpush1.bf16.msra.mxu1 %v1600_v37  ;;  %v61_v10 = vld [vmem:[%s2166_s1 + $0x178] sm:$0xff]  ;;  %v28_v11 = vld [vmem:[%s2166_s1 + $0x70] sm:$0xff]  ;;  %914 = vmatprep.mubr.msk.f32.mxu1 %vm93_vm0, %v80_v2  ;;  %v63_v19 = vld [vmem:[%s2166_s1 + $0x188] sm:$0xff] }
  0x12   :  { %1173 = vmatpush3.bf16.msra.mxu0 %v1602_v38  ;;  %1202 = vmatprep.subr.bf16.mxu1 %v1468_v0  ;;  %v29_v12 = vld [vmem:[%s2166_s1 + $0x78] sm:$0xff]  ;;  %v1713_v14 = vpack.c.bf16 %v61_v10, %v60_v6  ;;  %v77_v20 = vld [vmem:[%s2167_s0] sm:$0xff]  ;;  %v1730_v21 = vpack.c.bf16 %v63_v19, %v62_v16  ;;  %v64_v23 = vld [vmem:[%s2166_s1 + $0x190] sm:$0xff] }
  0x13   :  { %1175 = vmatprep.subr.bf16.mxu0 %v1609_v40  ;;  %v1715_v15 = vpack.c.bf16 %v29_v12, %v28_v11  ;;  %v65_v24 = vld [vmem:[%s2166_s1 + $0x198] sm:$0xff]  ;;  %v82_v25 = vld [vmem:[%s2167_s0 + $0x28] sm:$0xff]  ;;  %v81_v27 = vld [vmem:[%s2167_s0 + $0x20] sm:$0xff] }
  0x14   :  { %v1745_v26 = vpack.c.bf16 %v65_v24, %v64_v23  ;;  %v66_v30 = vld [vmem:[%s2166_s1 + $0x1a0] sm:$0xff]  ;;  %v67_v32 = vld [vmem:[%s2166_s1 + $0x1a8] sm:$0xff]  ;;  %v68_v36 = vld [vmem:[%s2166_s1 + $0x1b0] sm:$0xff] }
  0x15   :  { %1204 = vmatpush1.bf16.msra.mxu1 %v1628_v46  ;;  %v86_v33 = vld [vmem:[%s2167_s0 + $0x48] sm:$0xff]  ;;  %v1763_v34 = vpack.c.bf16 %v67_v32, %v66_v30  ;;  %v85_v35 = vld [vmem:[%s2167_s0 + $0x40] sm:$0xff]  ;;  %v69_v39 = vld [vmem:[%s2166_s1 + $0x1b8] sm:$0xff] }
  0x16   :  { %1177 = vmatpush3.bf16.msra.mxu0 %v1630_v47  ;;  %1205 = vmatprep.subr.bf16.mxu1 %v1468_v0  ;;  %v90_v41 = vld [vmem:[%s2167_s0 + $0x68] sm:$0xff]  ;;  %v1781_v42 = vpack.c.bf16 %v69_v39, %v68_v36  ;;  %v89_v43 = vld [vmem:[%s2167_s0 + $0x60] sm:$0xff]  ;;  %v72_v51 = vld [vmem:[%s2166_s1 + $0x1d0] sm:$0xff] }
  0x17   :  { %1179 = vmatprep.subr.bf16.mxu0 %v1640_v50  ;;  %v70_v44 = vld [vmem:[%s2166_s1 + $0x1c0] sm:$0xff]  ;;  %v71_v45 = vld [vmem:[%s2166_s1 + $0x1c8] sm:$0xff]  ;;  %v73_v52 = vld [vmem:[%s2166_s1 + $0x1d8] sm:$0xff] }
  0x18   :  { %v919_v48 = vld [vmem:[%s2167_s0 + $0x88] sm:$0xff]  ;;  %v1799_v49 = vpack.c.bf16 %v71_v45, %v70_v44  ;;  %v1811_v53 = vpack.c.bf16 %v73_v52, %v72_v51  ;;  %v74_v54 = vld [vmem:[%s2166_s1 + $0x1e0] sm:$0xff]  ;;  %v1833_v61 = vld [vmem:[%s2166_s1 + $0x1f0] sm:$0xf] }
  0x19   :  { %1207 = vmatpush1.bf16.msra.mxu1 %v1659_v56  ;;  %v75_v55 = vld [vmem:[%s2166_s1 + $0x1e8] sm:$0xff]  ;;  %v79_v62 = vld [vmem:[%s2167_s0 + $0x10] sm:$0xff]  ;;  %v84_v63 = vld [vmem:[%s2167_s0 + $0x38] sm:$0xff] }
  0x1a   :  { %1181 = vmatpush3.bf16.msra.mxu0 %v1661_v57  ;;  %1208 = vmatprep.subr.bf16.mxu1 %v1468_v0  ;;  %v1823_v58 = vpack.c.bf16 %v75_v55, %v74_v54  ;;  %v918_v1 = vld [vmem:[%s2167_s0 + $0x80] sm:$0xff]  ;;  %v83_v2 = vld [vmem:[%s2167_s0 + $0x30] sm:$0xff]  ;;  %v88_v6 = vld [vmem:[%s2167_s0 + $0x58] sm:$0xff] }
  0x1b   :  { %1183 = vmatprep.subr.bf16.mxu0 %v1668_v59  ;;  %v923_v10 = vld [vmem:[%s2167_s0 + $0xa8] sm:$0xff]  ;;  %v87_v11 = vld [vmem:[%s2167_s0 + $0x50] sm:$0xff]  ;;  %v92_v12 = vld [vmem:[%s2167_s0 + $0x78] sm:$0xff] }
  0x1c   :  { %v922_v16 = vld [vmem:[%s2167_s0 + $0xa0] sm:$0xff]  ;;  %v927_v19 = vld [vmem:[%s2167_s0 + $0xc8] sm:$0xff]  ;;  %v921_v23 = vld [vmem:[%s2167_s0 + $0x98] sm:$0xff] }
  0x1d   :  { %1210 = vmatpush1.bf16.msra.mxu1 %v1690_v3  ;;  %v926_v24 = vld [vmem:[%s2167_s0 + $0xc0] sm:$0xff]  ;;  %v940_v30 = vld [vmem:[%s2167_s0 + $0x108] sm:$0xff]  ;;  %v942_v44 = vld [vmem:[%s2167_s0 + $0x118] sm:$0xff] }
  0x1e   :  { %1185 = vmatpush3.bf16.msra.mxu0 %v1692_v5  ;;  %1211 = vmatprep.subr.bf16.mxu1 %v1468_v0  ;;  %v939_v32 = vld [vmem:[%s2167_s0 + $0x100] sm:$0xff]  ;;  %v948_v36 = vld [vmem:[%s2167_s0 + $0x148] sm:$0xff]  ;;  %v920_v45 = vld [vmem:[%s2167_s0 + $0x90] sm:$0xff] }
  0x1f   :  { %1187 = vmatprep.subr.bf16.mxu0 %v1699_v7  ;;  %v947_v39 = vld [vmem:[%s2167_s0 + $0x140] sm:$0xff]  ;;  %v924_v51 = vld [vmem:[%s2167_s0 + $0xb0] sm:$0xff]  ;;  %v929_v52 = vld [vmem:[%s2167_s0 + $0xd8] sm:$0xff] }
  0x20   :  { %v928_v54 = vld [vmem:[%s2167_s0 + $0xd0] sm:$0xff]  ;;  %v933_v55 = vld [vmem:[%s2167_s0 + $0xf8] sm:$0xff] }
  0x21   :  { %1213 = vmatpush1.bf16.msra.mxu1 %v1713_v14 }
  0x22   :  { %1189 = vmatpush3.bf16.msra.mxu0 %v1715_v15  ;;  %1214 = vmatprep.subr.bf16.mxu1 %v1468_v0 }
  0x23   :  { %1236 = vmatprep.subr.bf16.mxu0 %v1500_v4 }
  0x25   :  { %175 = vmatmul.mubr.f32.vlgmr.msra.gmra.mrb[0].mxu0 %v77_v20  ;;  %1216 = vmatpush1.bf16.msra.mxu1 %v1730_v21  ;;  %v91_v20 = vld [vmem:[%s2167_s0 + $0x70] sm:$0xff] }
  0x26   :  { %1238 = vmatpush3.bf16.msra.mxu0 %v1513_v9  ;;  %1217 = vmatprep.subr.bf16.mxu1 %v1468_v0 }
  0x27   :  { %1240 = vmatprep.subr.bf16.mxu0 %v1525_v13  ;;  %179 = vmatprep.mubr.f32.mxu0 %v82_v25  ;;  %v931_v25 = vld [vmem:[%s2167_s0 + $0xe8] sm:$0xff] }
  0x29   :  { %180 = vmatmul.mubr.f32.gmra.mrb[2].mxu0 %v81_v27  ;;  %1219 = vmatpush1.bf16.msra.mxu1 %v1745_v26  ;;  %v930_v27 = vld [vmem:[%s2167_s0 + $0xe0] sm:$0xff] }
  0x2a   :  { %1242 = vmatpush3.bf16.msra.mxu0 %v1540_v18  ;;  %1220 = vmatprep.subr.bf16.mxu1 %v1468_v0 }
  0x2b   :  { %1244 = vmatprep.subr.bf16.mxu0 %v1553_v22  ;;  %184 = vmatprep.mubr.f32.mxu0 %v86_v33  ;;  %v944_v33 = vld [vmem:[%s2167_s0 + $0x128] sm:$0xff] }
  0x2d   :  { %185 = vmatmul.mubr.f32.gmra.mrb[4].mxu0 %v85_v35  ;;  %1222 = vmatpush1.bf16.msra.mxu1 %v1763_v34  ;;  %v943_v35 = vld [vmem:[%s2167_s0 + $0x120] sm:$0xff] }
  0x2e   :  { %1246 = vmatpush3.bf16.msra.mxu0 %v1574_v29  ;;  %1223 = vmatprep.subr.bf16.mxu1 %v1468_v0 }
  0x2f   :  { %1248 = vmatprep.subr.bf16.mxu0 %v1581_v31  ;;  %189 = vmatprep.mubr.f32.mxu0 %v90_v41  ;;  %v952_v41 = vld [vmem:[%s2167_s0 + $0x168] sm:$0xff] }
  0x31   :  { %190 = vmatmul.mubr.f32.gmra.mrb[6].mxu0 %v89_v43  ;;  %1225 = vmatpush1.bf16.msra.mxu1 %v1781_v42  ;;  %v951_v43 = vld [vmem:[%s2167_s0 + $0x160] sm:$0xff] }
  0x32   :  { %1250 = vmatpush3.bf16.msra.mxu0 %v1602_v38  ;;  %1226 = vmatprep.subr.bf16.mxu1 %v1468_v0 }
  0x33   :  { %1252 = vmatprep.subr.bf16.mxu0 %v1609_v40  ;;  %373 = vmatprep.mubr.f32.mxu0 %v919_v48  ;;  %v925_v48 = vld [vmem:[%s2167_s0 + $0xb8] sm:$0xff] }
  0x35   :  { %1228 = vmatpush1.bf16.msra.mxu1 %v1799_v49 }
  0x36   :  { %1254 = vmatpush3.bf16.msra.mxu0 %v1630_v47  ;;  %1229 = vmatprep.subr.bf16.mxu1 %v1468_v0 }
  0x37   :  { %1256 = vmatprep.subr.bf16.mxu0 %v1640_v50 }
  0x39   :  { %1231 = vmatpush1.bf16.msra.mxu1 %v1811_v53 }
  0x3a   :  { %1258 = vmatpush3.bf16.msra.mxu0 %v1661_v57  ;;  %1232 = vmatprep.subr.bf16.mxu1 %v1468_v0 }
  0x3b   :  { %1260 = vmatprep.subr.bf16.mxu0 %v1668_v59 }
  0x3d   :  { %1234 = vmatpush1.bf16.msra.mxu1 %v1823_v58 }
  0x3e   :  { %1262 = vmatpush3.bf16.msra.mxu0 %v1692_v5  ;;  %255 = vmatprep.subr.mxu1 %v1469_v60 }
  0x3f   :  { %1264 = vmatprep.subr.bf16.mxu0 %v1699_v7 }
  0x41   :  { %913 = vmatpush1.msk.msra.mxu1 %vm106_vm1, %v1833_v61 }
  0x42   :  { %1266 = vmatpush3.bf16.msra.mxu0 %v1715_v15  ;;  %260 = vmatmul.mubr.f32.vlgmr.msra.gmra.mrb[0].mxu1 %v79_v62  ;;  %v963_v62 = vld [vmem:[%s2167_s0 + $0x198] sm:$0xff] }
  0x43   :  { %1267 = vmatprep.subr.bf16.mxu1 %v1468_v0  ;;  %915 = vmatprep.mubr.msk.f32.mxu1 %vm93_vm0, %v84_v63 }
  0x44   :  { %1269 = vmatpush1.bf16.msra.mxu1 %v1511_v8  ;;  %1313 = vmatprep.subr.bf16.mxu0 %v1500_v4 }
  0x45   :  { %374 = vmatmul.mubr.f32.vlgmr.msra.gmra.mrb[8].mxu0 %v918_v1  ;;  %1270 = vmatprep.subr.bf16.mxu1 %v1468_v0 }
  0x46   :  { %1315 = vmatpush3.bf16.msra.mxu0 %v1513_v9  ;;  %265 = vmatmul.mubr.f32.gmra.mrb[2].mxu1 %v83_v2 }
  0x47   :  { %1317 = vmatprep.subr.bf16.mxu0 %v1525_v13  ;;  %916 = vmatprep.mubr.msk.f32.mxu1 %vm93_vm0, %v88_v6 }
  0x48   :  { %1272 = vmatpush1.bf16.msra.mxu1 %v1538_v17  ;;  %378 = vmatprep.mubr.f32.mxu0 %v923_v10 }
  0x49   :  { %1273 = vmatprep.subr.bf16.mxu1 %v1468_v0  ;;  %379 = vmatmul.mubr.f32.gmra.mrb[10].mxu0 %v922_v16 }
  0x4a   :  { %1319 = vmatpush3.bf16.msra.mxu0 %v1540_v18  ;;  %270 = vmatmul.mubr.f32.gmra.mrb[4].mxu1 %v87_v11 }
  0x4b   :  { %1321 = vmatprep.subr.bf16.mxu0 %v1553_v22  ;;  %917 = vmatprep.mubr.msk.f32.mxu1 %vm93_vm0, %v92_v12 }
  0x4c   :  { %1275 = vmatpush1.bf16.msra.mxu1 %v1572_v28  ;;  %383 = vmatprep.mubr.f32.mxu0 %v927_v19 }
  0x4d   :  { %1276 = vmatprep.subr.bf16.mxu1 %v1468_v0  ;;  %384 = vmatmul.mubr.f32.gmra.mrb[12].mxu0 %v926_v24 }
  0x4e   :  { %1323 = vmatpush3.bf16.msra.mxu0 %v1574_v29  ;;  %275 = vmatmul.mubr.f32.gmra.mrb[6].mxu1 %v91_v20 }
  0x4f   :  { %1325 = vmatprep.subr.bf16.mxu0 %v1581_v31  ;;  %935 = vmatprep.mubr.msk.f32.mxu1 %vm93_vm0, %v921_v23 }
  0x50   :  { %1278 = vmatpush1.bf16.msra.mxu1 %v1600_v37  ;;  %388 = vmatprep.mubr.f32.mxu0 %v931_v25 }
  0x51   :  { %1279 = vmatprep.subr.bf16.mxu1 %v1468_v0  ;;  %389 = vmatmul.mubr.f32.gmra.mrb[14].mxu0 %v930_v27 }
  0x52   :  { %1327 = vmatpush3.bf16.msra.mxu0 %v1602_v38  ;;  %576 = vmatprep.mubr.f32.mxu0 %v940_v30 }
  0x53   :  { %1329 = vmatprep.subr.bf16.mxu0 %v1609_v40 }
  0x54   :  { %1281 = vmatpush1.bf16.msra.mxu1 %v1628_v46 }
  0x55   :  { %1282 = vmatprep.subr.bf16.mxu1 %v1468_v0 }
  0x56   :  { %1331 = vmatpush3.bf16.msra.mxu0 %v1630_v47 }
  0x57   :  { %1333 = vmatprep.subr.bf16.mxu0 %v1640_v50 }
  0x58   :  { %1284 = vmatpush1.bf16.msra.mxu1 %v1659_v56 }
  0x59   :  { %1285 = vmatprep.subr.bf16.mxu1 %v1468_v0 }
  0x5a   :  { %1335 = vmatpush3.bf16.msra.mxu0 %v1661_v57 }
  0x5b   :  { %1337 = vmatprep.subr.bf16.mxu0 %v1668_v59 }
  0x5c   :  { %1287 = vmatpush1.bf16.msra.mxu1 %v1690_v3 }
  0x5d   :  { %1288 = vmatprep.subr.bf16.mxu1 %v1468_v0 }
  0x5e   :  { %1339 = vmatpush3.bf16.msra.mxu0 %v1692_v5 }
  0x5f   :  { %1341 = vmatprep.subr.bf16.mxu0 %v1699_v7 }
  0x60   :  { %1290 = vmatpush1.bf16.msra.mxu1 %v1713_v14 }
  0x61   :  { %1291 = vmatprep.subr.bf16.mxu1 %v1468_v0 }
  0x62   :  { %1343 = vmatpush3.bf16.msra.mxu0 %v1715_v15 }
  0x63   :  { %1344 = vmatprep.subr.bf16.mxu0 %v1468_v0 }
  0x64   :  { %1293 = vmatpush1.bf16.msra.mxu1 %v1730_v21 }
  0x65   :  { %577 = vmatmul.mubr.f32.vlgmr.msra.gmra.mrb[16].mxu0 %v939_v32  ;;  %1294 = vmatprep.subr.bf16.mxu1 %v1468_v0 }
  0x66   :  { %1346 = vmatpush1.bf16.msra.mxu0 %v1511_v8  ;;  %581 = vmatprep.mubr.f32.mxu0 %v944_v33 }
  0x67   :  { %1347 = vmatprep.subr.bf16.mxu0 %v1468_v0 }
  0x68   :  { %1296 = vmatpush1.bf16.msra.mxu1 %v1745_v26 }
  0x69   :  { %1297 = vmatprep.subr.bf16.mxu1 %v1468_v0  ;;  %582 = vmatmul.mubr.f32.gmra.mrb[18].mxu0 %v943_v35 }
  0x6a   :  { %1349 = vmatpush1.bf16.msra.mxu0 %v1538_v17  ;;  %586 = vmatprep.mubr.f32.mxu0 %v948_v36 }
  0x6b   :  { %1350 = vmatprep.subr.bf16.mxu0 %v1468_v0 }
  0x6c   :  { %1299 = vmatpush1.bf16.msra.mxu1 %v1763_v34 }
  0x6d   :  { %1300 = vmatprep.subr.bf16.mxu1 %v1468_v0  ;;  %587 = vmatmul.mubr.f32.gmra.mrb[20].mxu0 %v947_v39 }
  0x6e   :  { %1352 = vmatpush1.bf16.msra.mxu0 %v1572_v28  ;;  %591 = vmatprep.mubr.f32.mxu0 %v952_v41 }
  0x6f   :  { %1353 = vmatprep.subr.bf16.mxu0 %v1468_v0 }
  0x70   :  { %1302 = vmatpush1.bf16.msra.mxu1 %v1781_v42 }
  0x71   :  { %1303 = vmatprep.subr.bf16.mxu1 %v1468_v0  ;;  %592 = vmatmul.mubr.f32.gmra.mrb[22].mxu0 %v951_v43 }
  0x72   :  { %1355 = vmatpush1.bf16.msra.mxu0 %v1600_v37  ;;  %956 = vmatprep.mubr.msk.f32.mxu0 %vm93_vm0, %v942_v44 }
  0x73   :  { %1356 = vmatprep.subr.bf16.mxu0 %v1468_v0 }
  0x74   :  { %1305 = vmatpush1.bf16.msra.mxu1 %v1799_v49 }
  0x75   :  { %1306 = vmatprep.subr.bf16.mxu1 %v1468_v0 }
  0x76   :  { %1358 = vmatpush1.bf16.msra.mxu0 %v1628_v46 }
  0x77   :  { %1359 = vmatprep.subr.bf16.mxu0 %v1468_v0 }
  0x78   :  { %1308 = vmatpush1.bf16.msra.mxu1 %v1811_v53 }
  0x79   :  { %1309 = vmatprep.subr.bf16.mxu1 %v1468_v0 }
  0x7a   :  { %1361 = vmatpush1.bf16.msra.mxu0 %v1659_v56 }
  0x7b   :  { %1362 = vmatprep.subr.bf16.mxu0 %v1468_v0 }
  0x7c   :  { %1311 = vmatpush1.bf16.msra.mxu1 %v1823_v58 }
  0x7d   :  { %454 = vmatprep.subr.mxu1 %v1469_v60 }
  0x7e   :  { %1364 = vmatpush1.bf16.msra.mxu0 %v1690_v3 }
  0x7f   :  { %1365 = vmatprep.subr.bf16.mxu0 %v1468_v0 }
  0x80   :  { %934 = vmatpush1.msk.msra.mxu1 %vm106_vm1, %v1833_v61 }
  0x81   :  { %459 = vmatmul.mubr.f32.vlgmr.msra.gmra.mrb[8].mxu1 %v920_v45  ;;  %1421 = vmatprep.subr.bf16.mxu1 %v1468_v0 }
  0x82   :  { %1367 = vmatpush1.bf16.msra.mxu0 %v1713_v14  ;;  %936 = vmatprep.mubr.msk.f32.mxu1 %vm93_vm0, %v925_v48 }
  0x83   :  { %1368 = vmatprep.subr.bf16.mxu0 %v1468_v0  ;;  %1423 = vmatpush1.bf16.msra.mxu1 %v1511_v8  ;;  %v932_v8 = vld [vmem:[%s2167_s0 + $0xf0] sm:$0xff] }
  0x84   :  { %1424 = vmatprep.subr.bf16.mxu1 %v1468_v0 }
  0x85   :  { %464 = vmatmul.mubr.f32.gmra.mrb[10].mxu1 %v924_v51 }
  0x86   :  { %1370 = vmatpush1.bf16.msra.mxu0 %v1730_v21  ;;  %937 = vmatprep.mubr.msk.f32.mxu1 %vm93_vm0, %v929_v52 }
  0x87   :  { %1371 = vmatprep.subr.bf16.mxu0 %v1468_v0  ;;  %1426 = vmatpush1.bf16.msra.mxu1 %v1538_v17  ;;  %v941_v17 = vld [vmem:[%s2167_s0 + $0x110] sm:$0xff] }
  0x88   :  { %1427 = vmatprep.subr.bf16.mxu1 %v1468_v0 }
  0x89   :  { %469 = vmatmul.mubr.f32.gmra.mrb[12].mxu1 %v928_v54 }
  0x8a   :  { %1373 = vmatpush1.bf16.msra.mxu0 %v1745_v26  ;;  %938 = vmatprep.mubr.msk.f32.mxu1 %vm93_vm0, %v933_v55 }
  0x8b   :  { %1374 = vmatprep.subr.bf16.mxu0 %v1468_v0  ;;  %1429 = vmatpush1.bf16.msra.mxu1 %v1572_v28  ;;  %v946_v28 = vld [vmem:[%s2167_s0 + $0x138] sm:$0xff] }
  0x8c   :  { %1430 = vmatprep.subr.bf16.mxu1 %v1468_v0 }
  0x8d   :  { %474 = vmatmul.mubr.f32.gmra.mrb[14].mxu1 %v932_v8 }
  0x8e   :  { %1376 = vmatpush1.bf16.msra.mxu0 %v1763_v34  ;;  %977 = vmatprep.mubr.msk.f32.mxu1 %vm93_vm0, %v963_v62 }
  0x8f   :  { %1377 = vmatprep.subr.bf16.mxu0 %v1468_v0  ;;  %1432 = vmatpush1.bf16.msra.mxu1 %v1600_v37  ;;  %v945_v37 = vld [vmem:[%s2167_s0 + $0x130] sm:$0xff] }
  0x90   :  { %1433 = vmatprep.subr.bf16.mxu1 %v1468_v0 }
  0x92   :  { %1379 = vmatpush1.bf16.msra.mxu0 %v1781_v42 }
  0x93   :  { %1380 = vmatprep.subr.bf16.mxu0 %v1468_v0  ;;  %1435 = vmatpush1.bf16.msra.mxu1 %v1628_v46  ;;  %v950_v46 = vld [vmem:[%s2167_s0 + $0x158] sm:$0xff] }
  0x94   :  { %1436 = vmatprep.subr.bf16.mxu1 %v1468_v0 }
  0x96   :  { %1382 = vmatpush1.bf16.msra.mxu0 %v1799_v49 }
  0x97   :  { %1383 = vmatprep.subr.bf16.mxu0 %v1468_v0  ;;  %1438 = vmatpush1.bf16.msra.mxu1 %v1659_v56  ;;  %v970_v56 = vld [vmem:[%s2167_s0 + $0x1d0] sm:$0xff] }
  0x98   :  { %1439 = vmatprep.subr.bf16.mxu1 %v1468_v0 }
  0x9a   :  { %1385 = vmatpush1.bf16.msra.mxu0 %v1811_v53 }
  0x9b   :  { %1386 = vmatprep.subr.bf16.mxu0 %v1468_v0  ;;  %1441 = vmatpush1.bf16.msra.mxu1 %v1690_v3  ;;  %v973_v3 = vld [vmem:[%s2167_s0 + $0x1e8] sm:$0xff] }
  0x9c   :  { %1442 = vmatprep.subr.bf16.mxu1 %v1468_v0 }
  0x9e   :  { %1388 = vmatpush1.bf16.msra.mxu0 %v1823_v58 }
  0x9f   :  { %657 = vmatprep.subr.mxu0 %v1469_v60  ;;  %1444 = vmatpush1.bf16.msra.mxu1 %v1713_v14 }
  0xa0   :  { %1445 = vmatprep.subr.bf16.mxu1 %v1468_v0 }
  0xa2   :  { %955 = vmatpush1.msk.msra.mxu0 %vm106_vm1, %v1833_v61 }
  0xa3   :  { %662 = vmatmul.mubr.f32.vlgmr.msra.gmra.mrb[24].mxu0 %v941_v17  ;;  %1390 = vmatprep.subr.bf16.mxu0 %v1500_v4  ;;  %v949_v4 = vld [vmem:[%s2167_s0 + $0x150] sm:$0xff] }
  0xa4   :  { %1392 = vmatpush3.bf16.msra.mxu0 %v1513_v9  ;;  %957 = vmatprep.mubr.msk.f32.mxu0 %vm93_vm0, %v946_v28  ;;  %v954_v9 = vld [vmem:[%s2167_s0 + $0x178] sm:$0xff] }
  0xa5   :  { %1394 = vmatprep.subr.bf16.mxu0 %v1525_v13  ;;  %1447 = vmatpush1.bf16.msra.mxu1 %v1730_v21  ;;  %v953_v13 = vld [vmem:[%s2167_s0 + $0x170] sm:$0xff] }
  0xa6   :  { %1448 = vmatprep.subr.bf16.mxu1 %v1468_v0 }
  0xa7   :  { %667 = vmatmul.mubr.f32.gmra.mrb[26].mxu0 %v945_v37 }
  0xa8   :  { %1396 = vmatpush3.bf16.msra.mxu0 %v1540_v18  ;;  %958 = vmatprep.mubr.msk.f32.mxu0 %vm93_vm0, %v950_v46  ;;  %v961_v18 = vld [vmem:[%s2167_s0 + $0x188] sm:$0xff] }
  0xa9   :  { %1398 = vmatprep.subr.bf16.mxu0 %v1553_v22  ;;  %1450 = vmatpush1.bf16.msra.mxu1 %v1745_v26  ;;  %v962_v22 = vld [vmem:[%s2167_s0 + $0x190] sm:$0xff] }
  0xaa   :  { %1451 = vmatprep.subr.bf16.mxu1 %v1468_v0 }
  0xab   :  { %672 = vmatmul.mubr.f32.gmra.mrb[28].mxu0 %v949_v4 }
  0xac   :  { %1400 = vmatpush3.bf16.msra.mxu0 %v1574_v29  ;;  %959 = vmatprep.mubr.msk.f32.mxu0 %vm93_vm0, %v954_v9  ;;  %v960_v29 = vld [vmem:[%s2167_s0 + $0x180] sm:$0xff] }
  0xad   :  { %1402 = vmatprep.subr.bf16.mxu0 %v1581_v31  ;;  %1453 = vmatpush1.bf16.msra.mxu1 %v1763_v34  ;;  %v965_v31 = vld [vmem:[%s2167_s0 + $0x1a8] sm:$0xff] }
  0xae   :  { %1454 = vmatprep.subr.bf16.mxu1 %v1468_v0 }
  0xaf   :  { %677 = vmatmul.mubr.f32.gmra.mrb[30].mxu0 %v953_v13 }
  0xb0   :  { %1404 = vmatpush3.bf16.msra.mxu0 %v1602_v38  ;;  %779 = vmatprep.mubr.f32.mxu0 %v961_v18  ;;  %v966_v38 = vld [vmem:[%s2167_s0 + $0x1b0] sm:$0xff] }
  0xb1   :  { %1406 = vmatprep.subr.bf16.mxu0 %v1609_v40  ;;  %1456 = vmatpush1.bf16.msra.mxu1 %v1781_v42  ;;  %v964_v40 = vld [vmem:[%s2167_s0 + $0x1a0] sm:$0xff] }
  0xb2   :  { %1457 = vmatprep.subr.bf16.mxu1 %v1468_v0 }
  0xb4   :  { %1408 = vmatpush3.bf16.msra.mxu0 %v1630_v47  ;;  %v971_v47 = vld [vmem:[%s2167_s0 + $0x1d8] sm:$0xff] }
  0xb5   :  { %1410 = vmatprep.subr.bf16.mxu0 %v1640_v50  ;;  %1459 = vmatpush1.bf16.msra.mxu1 %v1799_v49  ;;  %v969_v50 = vld [vmem:[%s2167_s0 + $0x1c8] sm:$0xff] }
  0xb6   :  { %1460 = vmatprep.subr.bf16.mxu1 %v1468_v0 }
  0xb8   :  { %1412 = vmatpush3.bf16.msra.mxu0 %v1661_v57  ;;  %v968_v57 = vld [vmem:[%s2167_s0 + $0x1c0] sm:$0xff] }
  0xb9   :  { %1414 = vmatprep.subr.bf16.mxu0 %v1668_v59  ;;  %1462 = vmatpush1.bf16.msra.mxu1 %v1811_v53  ;;  %v975_v59 = vld [vmem:[%s2167_s0 + $0x1f8] sm:$0xff] }
  0xba   :  { %1463 = vmatprep.subr.bf16.mxu1 %v1468_v0  ;;  %v967_v0 = vld [vmem:[%s2167_s0 + $0x1b8] sm:$0xff] }
  0xbc   :  { %1416 = vmatpush3.bf16.msra.mxu0 %v1692_v5  ;;  %v974_v5 = vld [vmem:[%s2167_s0 + $0x1f0] sm:$0xff] }
  0xbd   :  { %1418 = vmatprep.subr.bf16.mxu0 %v1699_v7  ;;  %1465 = vmatpush1.bf16.msra.mxu1 %v1823_v58  ;;  %v972_v7 = vld [vmem:[%s2167_s0 + $0x1e0] sm:$0xff] }
  0xbe   :  { %860 = vmatprep.subr.mxu1 %v1469_v60 }
  0xc0   :  { %1420 = vmatpush3.bf16.msra.mxu0 %v1715_v15 }
  0xc1   :  { %976 = vmatpush1.msk.msra.mxu1 %vm106_vm1, %v1833_v61 }
  0xc2   :  { %865 = vmatmul.mubr.f32.vlgmr.msra.gmra.mrb[16].mxu1 %v962_v22 }
  0xc3   :  { %780 = vmatmul.mubr.f32.vlgmr.msra.gmra.mrb[32].mxu0 %v960_v29  ;;  %978 = vmatprep.mubr.msk.f32.mxu1 %vm93_vm0, %v967_v0 }
  0xc4   :  { %784 = vmatprep.mubr.f32.mxu0 %v965_v31 }
  0xc6   :  { %870 = vmatmul.mubr.f32.gmra.mrb[18].mxu1 %v966_v38 }
  0xc7   :  { %785 = vmatmul.mubr.f32.gmra.mrb[34].mxu0 %v964_v40  ;;  %979 = vmatprep.mubr.msk.f32.mxu1 %vm93_vm0, %v971_v47 }
  0xc8   :  { %789 = vmatprep.mubr.f32.mxu0 %v969_v50 }
  0xca   :  { %875 = vmatmul.mubr.f32.gmra.mrb[20].mxu1 %v970_v56 }
  0xcb   :  { %790 = vmatmul.mubr.f32.gmra.mrb[36].mxu0 %v968_v57  ;;  %980 = vmatprep.mubr.msk.f32.mxu1 %vm93_vm0, %v975_v59 }
  0xcc   :  { %794 = vmatprep.mubr.f32.mxu0 %v973_v3 }
  0xce   :  { %880 = vmatmul.mubr.f32.gmra.mrb[22].mxu1 %v974_v5 }
  0xcf   :  { %795 = vmatmul.mubr.f32.gmra.mrb[38].mxu0 %v972_v7 }
  0xf8   :  { %v1014_v14 = vpop.f32.mrb[0].mxu0 }
  0xf9   :  { %v1015_v15 = vpop.f32.mrb[1].mxu0 }
  0xfa   :  { %v1016_v21 = vadd.f32 %v1015_v15, %v1014_v14 }
  0xfc   :  { %v1017_v26 = vpop.f32.mrb[2].mxu0 }
  0xfd   :  { %v1018_v34 = vpop.f32.mrb[3].mxu0 }
  0xfe   :  { %v1019_v42 = vadd.f32 %v1018_v34, %v1017_v26 }
 0x100   :  { %v1020_v49 = vpop.f32.mrb[4].mxu0 }
 0x101   :  { %v1021_v53 = vpop.f32.mrb[5].mxu0 }
 0x102   :  { %v1022_v58 = vadd.f32 %v1021_v53, %v1020_v49 }
 0x104   :  { %v1023_v60 = vpop.f32.mrb[6].mxu0 }
 0x105   :  { %v1024_v61 = vpop.f32.mrb[7].mxu0 }
 0x106   :  { %v1025_v63 = vadd.f32 %v1024_v61, %v1023_v60 }
 0x115   :  { %v261_v1 = vpop.f32.mrb[0].mxu1 }
 0x116   :  { %v262_v2 = vadd.f32 %v1016_v21, %v261_v1  ;;  %v263_v6 = vpop.f32.mrb[1].mxu1 }
 0x118   :  { %v1058_v10 = vpop.f32.mrb[8].mxu0 }
 0x119   :  { %v1059_v11 = vpop.f32.mrb[9].mxu0  ;;  %v266_v12 = vpop.f32.mrb[2].mxu1 }
 0x11a   :  { %v1060_v16 = vadd.f32 %v1059_v11, %v1058_v10  ;;  %v267_v19 = vadd.f32 %v1019_v42, %v266_v12  ;;  %v268_v20 = vpop.f32.mrb[3].mxu1 }
 0x11c   :  { %v1061_v27 = vpop.f32.mrb[10].mxu0 }
 0x11d   :  { %v271_v23 = vpop.f32.mrb[4].mxu1  ;;  %v1062_v30 = vpop.f32.mrb[11].mxu0 }
 0x11e   :  { %v272_v24 = vadd.f32 %v1022_v58, %v271_v23  ;;  %v273_v25 = vpop.f32.mrb[5].mxu1  ;;  %v1063_v33 = vadd.f32 %v1062_v30, %v1061_v27  ;;  %v981_v30 = vld [vmem:[%s2168_s2] ss:$0 sm:$0xff] }
 0x120   :  { %v1064_v39 = vpop.f32.mrb[12].mxu0 }
 0x121   :  { %v276_v32 = vpop.f32.mrb[6].mxu1  ;;  %v1065_v41 = vpop.f32.mrb[13].mxu0 }
 0x122   :  { %v277_v35 = vadd.f32 %v1025_v63, %v276_v32  ;;  %v278_v36 = vpop.f32.mrb[7].mxu1  ;;  %v1066_v43 = vadd.f32 %v1065_v41, %v1064_v39 }
 0x124   :  { %v1067_v44 = vpop.f32.mrb[14].mxu0 }
 0x125   :  { %v1068_v45 = vpop.f32.mrb[15].mxu0 }
 0x126   :  { %v1069_v48 = vadd.f32 %v1068_v45, %v1067_v44 }
 0x138   :  { %v1102_v51 = vpop.f32.mrb[16].mxu0 }
 0x139   :  { %v1103_v52 = vpop.f32.mrb[17].mxu0 }
 0x13a   :  { %v1104_v54 = vadd.f32 %v1103_v52, %v1102_v51 }
 0x13c   :  { %v1105_v55 = vpop.f32.mrb[18].mxu0 }
 0x13d   :  { %v1106_v8 = vpop.f32.mrb[19].mxu0 }
 0x13e   :  { %v1107_v62 = vadd.f32 %v1106_v8, %v1105_v55 }
 0x140   :  { %v1108_v17 = vpop.f32.mrb[20].mxu0 }
 0x141   :  { %v1109_v28 = vpop.f32.mrb[21].mxu0 }
 0x142   :  { %v1110_v37 = vadd.f32 %v1109_v28, %v1108_v17 }
 0x144   :  { %v1111_v46 = vpop.f32.mrb[22].mxu0 }
 0x145   :  { %v1112_v4 = vpop.f32.mrb[23].mxu0 }
 0x146   :  { %v1113_v9 = vadd.f32 %v1112_v4, %v1111_v46 }
 0x154   :  { %v460_v13 = vpop.f32.mrb[8].mxu1 }
 0x155   :  { %v461_v18 = vadd.f32 %v1060_v16, %v460_v13  ;;  %v462_v22 = vpop.f32.mrb[9].mxu1 }
 0x157   :  { %v479_v29 = vmax.f32 %v262_v2, %v461_v18 }
 0x158   :  { %v465_v0 = vpop.f32.mrb[10].mxu1 }
 0x159   :  { %v466_v31 = vadd.f32 %v1063_v33, %v465_v0  ;;  %v467_v38 = vpop.f32.mrb[11].mxu1 }
 0x15b   :  { %v480_v40 = vmax.f32 %v267_v19, %v466_v31 }
 0x15c   :  { %v470_v47 = vpop.f32.mrb[12].mxu1 }
 0x15d   :  { %v471_v50 = vadd.f32 %v1066_v43, %v470_v47  ;;  %v472_v56 = vpop.f32.mrb[13].mxu1 }
 0x15f   :  { %v481_v57 = vmax.f32 %v272_v24, %v471_v50 }
 0x160   :  { %v475_v59 = vpop.f32.mrb[14].mxu1 }
 0x161   :  { %v476_v3 = vadd.f32 %v1069_v48, %v475_v59  ;;  %v477_v5 = vpop.f32.mrb[15].mxu1 }
 0x163   :  { %v482_v7 = vmax.f32 %v277_v35, %v476_v3 }
 0x176   :  { %v663_v14 = vpop.f32.mrb[24].mxu0 }
 0x177   :  { %v664_v15 = vadd.f32 %v1104_v54, %v663_v14  ;;  %v665_v21 = vpop.f32.mrb[25].mxu0 }
 0x179   :  { %v682_v26 = vmax.f32 %v479_v29, %v664_v15 }
 0x17a   :  { %v668_v34 = vpop.f32.mrb[26].mxu0 }
 0x17b   :  { %v669_v42 = vadd.f32 %v1107_v62, %v668_v34  ;;  %v670_v49 = vpop.f32.mrb[27].mxu0 }
 0x17d   :  { %v683_v53 = vmax.f32 %v480_v40, %v669_v42 }
 0x17e   :  { %v673_v58 = vpop.f32.mrb[28].mxu0 }
 0x17f   :  { %v674_v60 = vadd.f32 %v1110_v37, %v673_v58  ;;  %v675_v61 = vpop.f32.mrb[29].mxu0 }
 0x181   :  { %v684_v63 = vmax.f32 %v481_v57, %v674_v60 }
 0x182   :  { %v678_v1 = vpop.f32.mrb[30].mxu0 }
 0x183   :  { %v679_v2 = vadd.f32 %v1113_v9, %v678_v1  ;;  %v680_v6 = vpop.f32.mrb[31].mxu0 }
 0x185   :  { %v685_v10 = vmax.f32 %v482_v7, %v679_v2 }
 0x195   :  { %v866_v11 = vpop.f32.mrb[16].mxu1 }
 0x196   :  { %v1146_v12 = vpop.f32.mrb[32].mxu0  ;;  %v868_v16 = vpop.f32.mrb[17].mxu1 }
 0x197   :  { %v1147_v19 = vpop.f32.mrb[33].mxu0 }
 0x198   :  { %v1148_v20 = vadd.f32 %v1147_v19, %v1146_v12 }
 0x199   :  { %v871_v23 = vpop.f32.mrb[18].mxu1 }
 0x19a   :  { %v867_v24 = vadd.f32 %v1148_v20, %v866_v11  ;;  %v1149_v25 = vpop.f32.mrb[34].mxu0  ;;  %v873_v27 = vpop.f32.mrb[19].mxu1 }
 0x19b   :  { %v1150_v32 = vpop.f32.mrb[35].mxu0 }
 0x19c   :  { %v885_v33 = vmax.f32 %v682_v26, %v867_v24  ;;  %v1151_v35 = vadd.f32 %v1150_v32, %v1149_v25 }
 0x19d   :  { %v876_v36 = vpop.f32.mrb[20].mxu1 }
 0x19e   :  { %v896_v39 = vadd.f32 %v981_v30, %v885_v33  ;;  %v872_v41 = vadd.f32 %v1151_v35, %v871_v23  ;;  %v1152_v43 = vpop.f32.mrb[36].mxu0  ;;  %v878_v44 = vpop.f32.mrb[21].mxu1 }
 0x19f   :  { %v1153_v45 = vpop.f32.mrb[37].mxu0 }
 0x1a0   :  { %v900_v48 = vmax.f32 %v896_v39, 0.0  ;;  %v886_v51 = vmax.f32 %v683_v53, %v872_v41  ;;  %v1154_v52 = vadd.f32 %v1153_v45, %v1152_v43 }
 0x1a1   :  { %v881_v54 = vpop.f32.mrb[22].mxu1 }
 0x1a2   :  { %905 = vst.msk [vmem:[%s2169_s3] sm:$0xff] %vm904_vm2, %v900_v48  ;;  %v897_v55 = vadd.f32 %v981_v30, %v886_v51  ;;  %v877_v8 = vadd.f32 %v1154_v52, %v876_v36  ;;  %v1155_v62 = vpop.f32.mrb[38].mxu0  ;;  %v883_v17 = vpop.f32.mrb[23].mxu1 }
 0x1a3   :  { %v1156_v28 = vpop.f32.mrb[39].mxu0 }
 0x1a4   :  { %v901_v37 = vmax.f32 %v897_v55, 0.0  ;;  %v887_v46 = vmax.f32 %v684_v63, %v877_v8  ;;  %v1157_v4 = vadd.f32 %v1156_v28, %v1155_v62 }
 0x1a6   :  { %906 = vst.msk [vmem:[%s2169_s3 + $0x8] sm:$0xff] %vm904_vm2, %v901_v37  ;;  %v898_v9 = vadd.f32 %v981_v30, %v887_v46  ;;  %v882_v13 = vadd.f32 %v1157_v4, %v881_v54 }
 0x1a8   :  { %v902_v18 = vmax.f32 %v898_v9, 0.0  ;;  %v888_v22 = vmax.f32 %v685_v10, %v882_v13 }
 0x1aa   :  { %907 = vst.msk [vmem:[%s2169_s3 + $0x10] sm:$0xff] %vm904_vm2, %v902_v18  ;;  %v899_v29 = vadd.f32 %v981_v30, %v888_v22 }
 0x1ac   :  { %v903_v0 = vmax.f32 %v899_v29, 0.0 }
 0x1ae   :  { %908 = vst.msk [vmem:[%s2169_s3 + $0x18] sm:$0xff] %vm904_vm2, %v903_v0 }

// kernel: net_forward.5
= control target key start
LH: loop header
LB: loop body
LE: loop exit
PB: predicated region body
PF: predicated region fallthrough
CT: control target
= control target key end

     0   :  { %s3386_s0 = inlined_call_operand.vmem [shape: f32[2,800], index: 0, kind: input, shape index: {}]   ;;  %s3387_s1 = inlined_call_operand.vmem [shape: f32[800,500], index: 1, kind: input, shape index: {}]   ;;  %s3388_s2 = inlined_call_operand.vmem [shape: f32[1,500], index: 2, kind: input, shape index: {}]   ;;  %s3389_s3 = inlined_call_operand.vmem [shape: f32[500,10], index: 3, kind: input, shape index: {}]   ;;  %s3390_s4 = inlined_call_operand.vmem [shape: f32[1,10], index: 4, kind: input, shape index: {}]   ;;  %s3391_s5 = inlined_call_operand.hbm [shape: f32[2,10], index: 5, kind: output, shape index: {}]  }
   0x1   :  { %v24_v0 = vld [vmem:[%s3387_s1 + $0x8] sm:$0xff]  ;;  %v26_v2 = vld [vmem:[%s3387_s1 + $0x18] sm:$0xff]  ;;  %v23_v5 = vld [vmem:[%s3387_s1] sm:$0xff] }
   0x2   :  { %v28_v1 = vld [vmem:[%s3387_s1 + $0x28] sm:$0xff]  ;;  %v30_v4 = vld [vmem:[%s3387_s1 + $0x38] sm:$0xff]  ;;  %v27_v6 = vld [vmem:[%s3387_s1 + $0x20] sm:$0xff] }
   0x3   :  { %v1348_v3 = vpack.c.bf16 %v28_v1, %v24_v0  ;;  %v1548_v7 = vpack.c.bf16 %v30_v4, %v26_v2  ;;  %v1350_v8 = vpack.c.bf16 %v27_v6, %v23_v5  ;;  %v25_v9 = vld [vmem:[%s3387_s1 + $0x10] sm:$0xff]  ;;  %v32_v11 = vld [vmem:[%s3387_s1 + $0x48] sm:$0xff]  ;;  %v34_v14 = vld [vmem:[%s3387_s1 + $0x58] sm:$0xff] }
   0x4   :  { %v29_v10 = vld [vmem:[%s3387_s1 + $0x30] sm:$0xff]  ;;  %v36_v13 = vld [vmem:[%s3387_s1 + $0x68] sm:$0xff]  ;;  %v38_v15 = vld [vmem:[%s3387_s1 + $0x78] sm:$0xff] }
   0x5   :  { %1349 = vmatprep.subr.bf16.mxu0 %v1348_v3  ;;  %v1550_v12 = vpack.c.bf16 %v29_v10, %v25_v9  ;;  %1549 = vmatprep.subr.bf16.mxu1 %v1548_v7  ;;  %v1352_v16 = vpack.c.bf16 %v36_v13, %v32_v11  ;;  %v1552_v17 = vpack.c.bf16 %v38_v15, %v34_v14  ;;  %v31_v18 = vld [vmem:[%s3387_s1 + $0x40] sm:$0xff]  ;;  %v33_v20 = vld [vmem:[%s3387_s1 + $0x50] sm:$0xff]  ;;  %v40_v23 = vld [vmem:[%s3387_s1 + $0x88] sm:$0xff] }
   0x6   :  { %1351 = vmatpush1.bf16.msra.mxu0 %v1350_v8  ;;  %v35_v19 = vld [vmem:[%s3387_s1 + $0x60] sm:$0xff]  ;;  %v37_v22 = vld [vmem:[%s3387_s1 + $0x70] sm:$0xff]  ;;  %v44_v24 = vld [vmem:[%s3387_s1 + $0xa8] sm:$0xff] }
   0x7   :  { %1551 = vmatpush1.bf16.msra.mxu1 %v1550_v12  ;;  %v1354_v21 = vpack.c.bf16 %v35_v19, %v31_v18  ;;  %1353 = vmatprep.subr.bf16.mxu0 %v1352_v16  ;;  %v1554_v25 = vpack.c.bf16 %v37_v22, %v33_v20  ;;  %v1356_v26 = vpack.c.bf16 %v44_v24, %v40_v23  ;;  %v42_v27 = vld [vmem:[%s3387_s1 + $0x98] sm:$0xff]  ;;  %v39_v29 = vld [vmem:[%s3387_s1 + $0x80] sm:$0xff]  ;;  %v41_v32 = vld [vmem:[%s3387_s1 + $0x90] sm:$0xff] }
   0x8   :  { %1553 = vmatprep.subr.bf16.mxu1 %v1552_v17  ;;  %v46_v28 = vld [vmem:[%s3387_s1 + $0xb8] sm:$0xff]  ;;  %v43_v31 = vld [vmem:[%s3387_s1 + $0xa0] sm:$0xff]  ;;  %v45_v33 = vld [vmem:[%s3387_s1 + $0xb0] sm:$0xff] }
   0x9   :  { %v1556_v30 = vpack.c.bf16 %v46_v28, %v42_v27  ;;  %v1358_v34 = vpack.c.bf16 %v43_v31, %v39_v29  ;;  %v48_v35 = vld [vmem:[%s3387_s1 + $0xc8] sm:$0xff]  ;;  %v50_v37 = vld [vmem:[%s3387_s1 + $0xd8] sm:$0xff]  ;;  %v1558_v38 = vpack.c.bf16 %v45_v33, %v41_v32  ;;  %v47_v41 = vld [vmem:[%s3387_s1 + $0xc0] sm:$0xff] }
   0xa   :  { %1355 = vmatpush1.bf16.msra.mxu0 %v1354_v21  ;;  %v52_v36 = vld [vmem:[%s3387_s1 + $0xe8] sm:$0xff]  ;;  %v54_v40 = vld [vmem:[%s3387_s1 + $0xf8] sm:$0xff]  ;;  %v51_v42 = vld [vmem:[%s3387_s1 + $0xe0] sm:$0xff] }
   0xb   :  { %1555 = vmatpush1.bf16.msra.mxu1 %v1554_v25  ;;  %1357 = vmatprep.subr.bf16.mxu0 %v1356_v26  ;;  %v1360_v39 = vpack.c.bf16 %v52_v36, %v48_v35  ;;  %v1560_v43 = vpack.c.bf16 %v54_v40, %v50_v37  ;;  %v49_v44 = vld [vmem:[%s3387_s1 + $0xd0] sm:$0xff]  ;;  %v56_v46 = vld [vmem:[%s3387_s1 + $0x108] sm:$0xff]  ;;  %v58_v48 = vld [vmem:[%s3387_s1 + $0x118] sm:$0xff]  ;;  %v1362_v50 = vpack.c.bf16 %v51_v42, %v47_v41 }
   0xc   :  { %1557 = vmatprep.subr.bf16.mxu1 %v1556_v30  ;;  %v53_v45 = vld [vmem:[%s3387_s1 + $0xf0] sm:$0xff]  ;;  %v60_v47 = vld [vmem:[%s3387_s1 + $0x128] sm:$0xff]  ;;  %v62_v49 = vld [vmem:[%s3387_s1 + $0x138] sm:$0xff] }
   0xd   :  { %v1562_v51 = vpack.c.bf16 %v53_v45, %v49_v44  ;;  %v1364_v52 = vpack.c.bf16 %v60_v47, %v56_v46  ;;  %v55_v53 = vld [vmem:[%s3387_s1 + $0x100] sm:$0xff]  ;;  %v57_v55 = vld [vmem:[%s3387_s1 + $0x110] sm:$0xff]  ;;  %v1564_v56 = vpack.c.bf16 %v62_v49, %v58_v48  ;;  %v64_v58 = vld [vmem:[%s3387_s1 + $0x148] sm:$0xff]  ;;  %v425_v46 = vlaneseq }
   0xe   :  { %1359 = vmatpush1.bf16.msra.mxu0 %v1358_v34  ;;  %v59_v54 = vld [vmem:[%s3387_s1 + $0x120] sm:$0xff]  ;;  %v61_v57 = vld [vmem:[%s3387_s1 + $0x130] sm:$0xff]  ;;  %v68_v59 = vld [vmem:[%s3387_s1 + $0x168] sm:$0xff]  ;;  %v1875_v47 = vmov 1983009808  }
   0xf   :  { %1559 = vmatpush1.bf16.msra.mxu1 %v1558_v38  ;;  %1361 = vmatprep.subr.bf16.mxu0 %v1360_v39  ;;  %v66_v60 = vld [vmem:[%s3387_s1 + $0x158] sm:$0xff]  ;;  %v1366_v62 = vpack.c.bf16 %v59_v54, %v55_v53  ;;  %v1566_v63 = vpack.c.bf16 %v61_v57, %v57_v55  ;;  %v1368_v0 = vpack.c.bf16 %v68_v59, %v64_v58  ;;  %v63_v1 = vld [vmem:[%s3387_s1 + $0x140] sm:$0xff]  ;;  %v65_v3 = vld [vmem:[%s3387_s1 + $0x150] sm:$0xff]  ;;  %v449_v48 = vunpack.c.l.s4 %v1875_v47 }
  0x10   :  { %1561 = vmatprep.subr.bf16.mxu1 %v1560_v43  ;;  %v70_v61 = vld [vmem:[%s3387_s1 + $0x178] sm:$0xff]  ;;  %v67_v2 = vld [vmem:[%s3387_s1 + $0x160] sm:$0xff]  ;;  %v69_v5 = vld [vmem:[%s3387_s1 + $0x170] sm:$0xff] }
  0x11   :  { %v1568_v4 = vpack.c.bf16 %v70_v61, %v66_v60  ;;  %v72_v6 = vld [vmem:[%s3387_s1 + $0x188] sm:$0xff]  ;;  %v74_v8 = vld [vmem:[%s3387_s1 + $0x198] sm:$0xff]  ;;  %v1370_v10 = vpack.c.bf16 %v67_v2, %v63_v1  ;;  %v1570_v11 = vpack.c.bf16 %v69_v5, %v65_v3  ;;  %v71_v13 = vld [vmem:[%s3387_s1 + $0x180] sm:$0xff]  ;;  %v2161_v61 = vshrl.u32 %v425_v46, 7 }
  0x12   :  { %1363 = vmatpush1.bf16.msra.mxu0 %v1362_v50  ;;  %v76_v7 = vld [vmem:[%s3387_s1 + $0x1a8] sm:$0xff]  ;;  %v78_v9 = vld [vmem:[%s3387_s1 + $0x1b8] sm:$0xff]  ;;  %v75_v14 = vld [vmem:[%s3387_s1 + $0x1a0] sm:$0xff] }
  0x13   :  { %1563 = vmatpush1.bf16.msra.mxu1 %v1562_v51  ;;  %1365 = vmatprep.subr.bf16.mxu0 %v1364_v52  ;;  %v1372_v12 = vpack.c.bf16 %v76_v7, %v72_v6  ;;  %v73_v15 = vld [vmem:[%s3387_s1 + $0x190] sm:$0xff]  ;;  %v1572_v16 = vpack.c.bf16 %v78_v9, %v74_v8  ;;  %v80_v18 = vld [vmem:[%s3387_s1 + $0x1c8] sm:$0xff]  ;;  %v82_v20 = vld [vmem:[%s3387_s1 + $0x1d8] sm:$0xff]  ;;  %v1374_v22 = vpack.c.bf16 %v75_v14, %v71_v13 }
  0x14   :  { %1565 = vmatprep.subr.bf16.mxu1 %v1564_v56  ;;  %v77_v17 = vld [vmem:[%s3387_s1 + $0x1b0] sm:$0xff]  ;;  %v84_v19 = vld [vmem:[%s3387_s1 + $0x1e8] sm:$0xff]  ;;  %v86_v21 = vld [vmem:[%s3387_s1 + $0x1f8] sm:$0xff] }
  0x15   :  { %v1574_v23 = vpack.c.bf16 %v77_v17, %v73_v15  ;;  %v1376_v24 = vpack.c.bf16 %v84_v19, %v80_v18  ;;  %v79_v25 = vld [vmem:[%s3387_s1 + $0x1c0] sm:$0xff]  ;;  %v81_v27 = vld [vmem:[%s3387_s1 + $0x1d0] sm:$0xff]  ;;  %v1576_v28 = vpack.c.bf16 %v86_v21, %v82_v20  ;;  %v88_v30 = vld [vmem:[%s3387_s1 + $0x208] sm:$0xff] }
  0x16   :  { %1367 = vmatpush1.bf16.msra.mxu0 %v1366_v62  ;;  %v83_v26 = vld [vmem:[%s3387_s1 + $0x1e0] sm:$0xff]  ;;  %v85_v29 = vld [vmem:[%s3387_s1 + $0x1f0] sm:$0xff]  ;;  %v92_v31 = vld [vmem:[%s3387_s1 + $0x228] sm:$0xff]  ;;  %v450_v62 = vunpack.c.0.s8 %v449_v48 }
  0x17   :  { %1567 = vmatpush1.bf16.msra.mxu1 %v1566_v63  ;;  %1369 = vmatprep.subr.bf16.mxu0 %v1368_v0  ;;  %v90_v32 = vld [vmem:[%s3387_s1 + $0x218] sm:$0xff]  ;;  %v1378_v34 = vpack.c.bf16 %v83_v26, %v79_v25  ;;  %v1578_v35 = vpack.c.bf16 %v85_v29, %v81_v27  ;;  %v1380_v36 = vpack.c.bf16 %v92_v31, %v88_v30  ;;  %v87_v37 = vld [vmem:[%s3387_s1 + $0x200] sm:$0xff]  ;;  %v89_v39 = vld [vmem:[%s3387_s1 + $0x210] sm:$0xff] }
  0x18   :  { %1569 = vmatprep.subr.bf16.mxu1 %v1568_v4  ;;  %v94_v33 = vld [vmem:[%s3387_s1 + $0x238] sm:$0xff]  ;;  %v91_v38 = vld [vmem:[%s3387_s1 + $0x220] sm:$0xff]  ;;  %v93_v41 = vld [vmem:[%s3387_s1 + $0x230] sm:$0xff] }
  0x19   :  { %v1580_v40 = vpack.c.bf16 %v94_v33, %v90_v32  ;;  %v96_v42 = vld [vmem:[%s3387_s1 + $0x248] sm:$0xff]  ;;  %v98_v44 = vld [vmem:[%s3387_s1 + $0x258] sm:$0xff]  ;;  %v1382_v49 = vpack.c.bf16 %v91_v38, %v87_v37  ;;  %v1582_v50 = vpack.c.bf16 %v93_v41, %v89_v39  ;;  %v95_v52 = vld [vmem:[%s3387_s1 + $0x240] sm:$0xff] }
  0x1a   :  { %1371 = vmatpush1.bf16.msra.mxu0 %v1370_v10  ;;  %v100_v43 = vld [vmem:[%s3387_s1 + $0x268] sm:$0xff]  ;;  %v102_v45 = vld [vmem:[%s3387_s1 + $0x278] sm:$0xff]  ;;  %v99_v53 = vld [vmem:[%s3387_s1 + $0x260] sm:$0xff] }
  0x1b   :  { %1571 = vmatpush1.bf16.msra.mxu1 %v1570_v11  ;;  %1373 = vmatprep.subr.bf16.mxu0 %v1372_v12  ;;  %v1384_v51 = vpack.c.bf16 %v100_v43, %v96_v42  ;;  %v97_v54 = vld [vmem:[%s3387_s1 + $0x250] sm:$0xff]  ;;  %v1584_v55 = vpack.c.bf16 %v102_v45, %v98_v44  ;;  %v104_v57 = vld [vmem:[%s3387_s1 + $0x288] sm:$0xff]  ;;  %v106_v59 = vld [vmem:[%s3387_s1 + $0x298] sm:$0xff]  ;;  %v1386_v63 = vpack.c.bf16 %v99_v53, %v95_v52 }
  0x1c   :  { %1573 = vmatprep.subr.bf16.mxu1 %v1572_v16  ;;  %v101_v56 = vld [vmem:[%s3387_s1 + $0x270] sm:$0xff]  ;;  %v108_v58 = vld [vmem:[%s3387_s1 + $0x2a8] sm:$0xff]  ;;  %v110_v60 = vld [vmem:[%s3387_s1 + $0x2b8] sm:$0xff]  ;;  %v2188_v11 = vsub.s32 %v450_v62, %v2161_v61 }
  0x1d   :  { %v1586_v0 = vpack.c.bf16 %v101_v56, %v97_v54  ;;  %v1388_v1 = vpack.c.bf16 %v108_v58, %v104_v57  ;;  %v103_v2 = vld [vmem:[%s3387_s1 + $0x280] sm:$0xff]  ;;  %v105_v4 = vld [vmem:[%s3387_s1 + $0x290] sm:$0xff]  ;;  %v1588_v5 = vpack.c.bf16 %v110_v60, %v106_v59  ;;  %v112_v7 = vld [vmem:[%s3387_s1 + $0x2c8] sm:$0xff] }
  0x1e   :  { %1375 = vmatpush1.bf16.msra.mxu0 %v1374_v22  ;;  %v107_v3 = vld [vmem:[%s3387_s1 + $0x2a0] sm:$0xff]  ;;  %v109_v6 = vld [vmem:[%s3387_s1 + $0x2b0] sm:$0xff]  ;;  %v116_v8 = vld [vmem:[%s3387_s1 + $0x2e8] sm:$0xff] }
  0x1f   :  { %1575 = vmatpush1.bf16.msra.mxu1 %v1574_v23  ;;  %1377 = vmatprep.subr.bf16.mxu0 %v1376_v24  ;;  %v114_v9 = vld [vmem:[%s3387_s1 + $0x2d8] sm:$0xff]  ;;  %v1390_v12 = vpack.c.bf16 %v107_v3, %v103_v2  ;;  %v111_v13 = vld [vmem:[%s3387_s1 + $0x2c0] sm:$0xff]  ;;  %v1590_v14 = vpack.c.bf16 %v109_v6, %v105_v4  ;;  %v1392_v15 = vpack.c.bf16 %v116_v8, %v112_v7  ;;  %v113_v17 = vld [vmem:[%s3387_s1 + $0x2d0] sm:$0xff] }
  0x20   :  { %1577 = vmatprep.subr.bf16.mxu1 %v1576_v28  ;;  %v118_v10 = vld [vmem:[%s3387_s1 + $0x2f8] sm:$0xff]  ;;  %v115_v16 = vld [vmem:[%s3387_s1 + $0x2e0] sm:$0xff]  ;;  %v117_v18 = vld [vmem:[%s3387_s1 + $0x2f0] sm:$0xff] }
  0x21   :  { %v1592_v19 = vpack.c.bf16 %v118_v10, %v114_v9  ;;  %v120_v20 = vld [vmem:[%s3387_s1 + $0x308] sm:$0xff]  ;;  %v2211_v22 = vld [vmem:[%s3386_s0] sm:$0xff]  ;;  %v122_v23 = vld [vmem:[%s3387_s1 + $0x318] sm:$0xff]  ;;  %v1394_v26 = vpack.c.bf16 %v115_v16, %v111_v13  ;;  %v1594_v27 = vpack.c.bf16 %v117_v18, %v113_v17 }
  0x22   :  { %1379 = vmatpush1.bf16.msra.mxu0 %v1378_v34  ;;  %v124_v21 = vld [vmem:[%s3387_s1 + $0x328] sm:$0xff]  ;;  %v126_v24 = vld [vmem:[%s3387_s1 + $0x338] sm:$0xff]  ;;  %v2221_v25 = vrot.slane %v2211_v22, %v2188_v11  ;;  %v119_v29 = vld [vmem:[%s3387_s1 + $0x300] sm:$0xff]  ;;  %v447_v8 = vcombine.high %v2211_v22, %v2211_v22 }
  0x23   :  { %1579 = vmatpush1.bf16.msra.mxu1 %v1578_v35  ;;  %1381 = vmatprep.subr.bf16.mxu0 %v1380_v36  ;;  %v1396_v28 = vpack.c.bf16 %v124_v21, %v120_v20  ;;  %v123_v30 = vld [vmem:[%s3387_s1 + $0x320] sm:$0xff]  ;;  %v121_v31 = vld [vmem:[%s3387_s1 + $0x310] sm:$0xff]  ;;  %v1596_v33 = vpack.c.bf16 %v126_v24, %v122_v23  ;;  %v128_v35 = vld [vmem:[%s3387_s1 + $0x348] sm:$0xff] }
  0x24   :  { %1581 = vmatprep.subr.bf16.mxu1 %v1580_v40  ;;  %v462_v32 = vcombine.high %v2221_v25, %v2221_v25  ;;  %v125_v34 = vld [vmem:[%s3387_s1 + $0x330] sm:$0xff]  ;;  %v132_v36 = vld [vmem:[%s3387_s1 + $0x368] sm:$0xff]  ;;  %v130_v37 = vld [vmem:[%s3387_s1 + $0x358] sm:$0xff]  ;;  %v1398_v39 = vpack.c.bf16 %v123_v30, %v119_v29  ;;  %v2342_v24 = vrot.slane %v447_v8, %v2188_v11 }
  0x25   :  { %v134_v38 = vld [vmem:[%s3387_s1 + $0x378] sm:$0xff]  ;;  %v1598_v40 = vpack.c.bf16 %v125_v34, %v121_v31  ;;  %v1400_v41 = vpack.c.bf16 %v132_v36, %v128_v35  ;;  %v127_v42 = vld [vmem:[%s3387_s1 + $0x340] sm:$0xff]  ;;  %v129_v44 = vld [vmem:[%s3387_s1 + $0x350] sm:$0xff] }
  0x26   :  { %1383 = vmatpush1.bf16.msra.mxu0 %v1382_v49  ;;  %553 = vmatprep.mubr.f32.mxu0 %v462_v32  ;;  %v131_v43 = vld [vmem:[%s3387_s1 + $0x360] sm:$0xff]  ;;  %v1600_v45 = vpack.c.bf16 %v134_v38, %v130_v37  ;;  %v133_v46 = vld [vmem:[%s3387_s1 + $0x370] sm:$0xff]  ;;  %v136_v47 = vld [vmem:[%s3387_s1 + $0x388] sm:$0xff]  ;;  %v463_v38 = vcombine.high %v2342_v24, %v2342_v24 }
  0x27   :  { %1583 = vmatpush1.bf16.msra.mxu1 %v1582_v50  ;;  %1385 = vmatprep.subr.bf16.mxu0 %v1384_v51  ;;  %v140_v48 = vld [vmem:[%s3387_s1 + $0x3a8] sm:$0xff]  ;;  %v138_v49 = vld [vmem:[%s3387_s1 + $0x398] sm:$0xff]  ;;  %v1402_v51 = vpack.c.bf16 %v131_v43, %v127_v42  ;;  %v1602_v52 = vpack.c.bf16 %v133_v46, %v129_v44  ;;  %v135_v54 = vld [vmem:[%s3387_s1 + $0x380] sm:$0xff] }
  0x28   :  { %1585 = vmatprep.subr.bf16.mxu1 %v1584_v55  ;;  %837 = vmatprep.mubr.f32.mxu1 %v462_v32  ;;  %v142_v50 = vld [vmem:[%s3387_s1 + $0x3b8] sm:$0xff]  ;;  %v1404_v53 = vpack.c.bf16 %v140_v48, %v136_v47  ;;  %v139_v55 = vld [vmem:[%s3387_s1 + $0x3a0] sm:$0xff]  ;;  %v137_v56 = vld [vmem:[%s3387_s1 + $0x390] sm:$0xff] }
  0x29   :  { %v1604_v57 = vpack.c.bf16 %v142_v50, %v138_v49  ;;  %v141_v58 = vld [vmem:[%s3387_s1 + $0x3b0] sm:$0xff]  ;;  %v144_v59 = vld [vmem:[%s3387_s1 + $0x3c8] sm:$0xff]  ;;  %v146_v62 = vld [vmem:[%s3387_s1 + $0x3d8] sm:$0xff] }
  0x2a   :  { %1387 = vmatpush1.bf16.msra.mxu0 %v1386_v63  ;;  %v148_v60 = vld [vmem:[%s3387_s1 + $0x3e8] sm:$0xff]  ;;  %v150_v63 = vld [vmem:[%s3387_s1 + $0x3f8] sm:$0xff]  ;;  %v143_v3 = vld [vmem:[%s3387_s1 + $0x3c0] sm:$0xff] }
  0x2b   :  { %1587 = vmatpush1.bf16.msra.mxu1 %v1586_v0  ;;  %1389 = vmatprep.subr.bf16.mxu0 %v1388_v1  ;;  %v1406_v0 = vpack.c.bf16 %v139_v55, %v135_v54  ;;  %v1606_v1 = vpack.c.bf16 %v141_v58, %v137_v56  ;;  %v1408_v2 = vpack.c.bf16 %v148_v60, %v144_v59  ;;  %v147_v4 = vld [vmem:[%s3387_s1 + $0x3e0] sm:$0xff]  ;;  %v149_v7 = vld [vmem:[%s3387_s1 + $0x3f0] sm:$0xff]  ;;  %v152_v9 = vld [vmem:[%s3387_s1 + $0x408] sm:$0xff] }
  0x2c   :  { %1589 = vmatprep.subr.bf16.mxu1 %v1588_v5  ;;  %v145_v5 = vld [vmem:[%s3387_s1 + $0x3d0] sm:$0xff]  ;;  %v1608_v6 = vpack.c.bf16 %v150_v63, %v146_v62  ;;  %v156_v10 = vld [vmem:[%s3387_s1 + $0x428] sm:$0xff]  ;;  %v158_v13 = vld [vmem:[%s3387_s1 + $0x438] sm:$0xff] }
  0x2d   :  { %v1412_v16 = vpack.c.bf16 %v156_v10, %v152_v9  ;;  %v151_v17 = vld [vmem:[%s3387_s1 + $0x400] sm:$0xff]  ;;  %v157_v21 = vld [vmem:[%s3387_s1 + $0x430] sm:$0xff]  ;;  %v160_v22 = vld [vmem:[%s3387_s1 + $0x448] sm:$0xff] }
  0x2e   :  { %1391 = vmatpush1.bf16.msra.mxu0 %v1390_v12  ;;  %v154_v12 = vld [vmem:[%s3387_s1 + $0x418] sm:$0xff]  ;;  %v155_v18 = vld [vmem:[%s3387_s1 + $0x420] sm:$0xff]  ;;  %v164_v23 = vld [vmem:[%s3387_s1 + $0x468] sm:$0xff] }
  0x2f   :  { %1591 = vmatpush1.bf16.msra.mxu1 %v1590_v14  ;;  %1393 = vmatprep.subr.bf16.mxu0 %v1392_v15  ;;  %v1410_v14 = vpack.c.bf16 %v147_v4, %v143_v3  ;;  %v1610_v15 = vpack.c.bf16 %v149_v7, %v145_v5  ;;  %v1612_v20 = vpack.c.bf16 %v158_v13, %v154_v12  ;;  %v159_v31 = vld [vmem:[%s3387_s1 + $0x440] sm:$0xff]  ;;  %v165_v35 = vld [vmem:[%s3387_s1 + $0x470] sm:$0xff]  ;;  %v168_v36 = vld [vmem:[%s3387_s1 + $0x488] sm:$0xff] }
  0x30   :  { %1593 = vmatprep.subr.bf16.mxu1 %v1592_v19  ;;  %v153_v19 = vld [vmem:[%s3387_s1 + $0x410] sm:$0xff]  ;;  %v1416_v30 = vpack.c.bf16 %v164_v23, %v160_v22  ;;  %v163_v32 = vld [vmem:[%s3387_s1 + $0x460] sm:$0xff]  ;;  %v172_v37 = vld [vmem:[%s3387_s1 + $0x4a8] sm:$0xff] }
  0x31   :  { %v1614_v29 = vpack.c.bf16 %v157_v21, %v153_v19  ;;  %v1420_v43 = vpack.c.bf16 %v172_v37, %v168_v36  ;;  %v167_v44 = vld [vmem:[%s3387_s1 + $0x480] sm:$0xff]  ;;  %v169_v46 = vld [vmem:[%s3387_s1 + $0x490] sm:$0xff]  ;;  %v176_v48 = vld [vmem:[%s3387_s1 + $0x4c8] sm:$0xff] }
  0x32   :  { %1395 = vmatpush1.bf16.msra.mxu0 %v1394_v26  ;;  %v162_v26 = vld [vmem:[%s3387_s1 + $0x458] sm:$0xff]  ;;  %v180_v49 = vld [vmem:[%s3387_s1 + $0x4e8] sm:$0xff]  ;;  %v175_v55 = vld [vmem:[%s3387_s1 + $0x4c0] sm:$0xff] }
  0x33   :  { %1595 = vmatpush1.bf16.msra.mxu1 %v1594_v27  ;;  %1397 = vmatprep.subr.bf16.mxu0 %v1396_v28  ;;  %v166_v27 = vld [vmem:[%s3387_s1 + $0x478] sm:$0xff]  ;;  %v1414_v28 = vpack.c.bf16 %v155_v18, %v151_v17  ;;  %v1424_v54 = vpack.c.bf16 %v180_v49, %v176_v48  ;;  %v179_v56 = vld [vmem:[%s3387_s1 + $0x4e0] sm:$0xff]  ;;  %v181_v59 = vld [vmem:[%s3387_s1 + $0x4f0] sm:$0xff] }
  0x34   :  { %1597 = vmatprep.subr.bf16.mxu1 %v1596_v33  ;;  %v161_v33 = vld [vmem:[%s3387_s1 + $0x450] sm:$0xff]  ;;  %v1616_v34 = vpack.c.bf16 %v166_v27, %v162_v26  ;;  %v178_v50 = vld [vmem:[%s3387_s1 + $0x4d8] sm:$0xff]  ;;  %v184_v60 = vld [vmem:[%s3387_s1 + $0x508] sm:$0xff] }
  0x35   :  { %v1618_v42 = vpack.c.bf16 %v165_v35, %v161_v33  ;;  %v188_v62 = vld [vmem:[%s3387_s1 + $0x528] sm:$0xff]  ;;  %v186_v63 = vld [vmem:[%s3387_s1 + $0x518] sm:$0xff]  ;;  %v183_v4 = vld [vmem:[%s3387_s1 + $0x500] sm:$0xff] }
  0x36   :  { %1399 = vmatpush1.bf16.msra.mxu0 %v1398_v39  ;;  %v170_v39 = vld [vmem:[%s3387_s1 + $0x498] sm:$0xff]  ;;  %v1428_v3 = vpack.c.bf16 %v188_v62, %v184_v60  ;;  %v187_v5 = vld [vmem:[%s3387_s1 + $0x520] sm:$0xff]  ;;  %v189_v8 = vld [vmem:[%s3387_s1 + $0x530] sm:$0xff] }
  0x37   :  { %1599 = vmatpush1.bf16.msra.mxu1 %v1598_v40  ;;  %1401 = vmatprep.subr.bf16.mxu0 %v1400_v41  ;;  %v174_v40 = vld [vmem:[%s3387_s1 + $0x4b8] sm:$0xff]  ;;  %v1418_v41 = vpack.c.bf16 %v163_v32, %v159_v31  ;;  %v192_v9 = vld [vmem:[%s3387_s1 + $0x548] sm:$0xff]  ;;  %v191_v17 = vld [vmem:[%s3387_s1 + $0x540] sm:$0xff] }
  0x38   :  { %1601 = vmatprep.subr.bf16.mxu1 %v1600_v45  ;;  %v171_v45 = vld [vmem:[%s3387_s1 + $0x4a0] sm:$0xff]  ;;  %v1620_v47 = vpack.c.bf16 %v174_v40, %v170_v39  ;;  %v196_v10 = vld [vmem:[%s3387_s1 + $0x568] sm:$0xff]  ;;  %v194_v12 = vld [vmem:[%s3387_s1 + $0x558] sm:$0xff] }
  0x39   :  { %v198_v13 = vld [vmem:[%s3387_s1 + $0x578] sm:$0xff]  ;;  %v195_v18 = vld [vmem:[%s3387_s1 + $0x560] sm:$0xff]  ;;  %v193_v19 = vld [vmem:[%s3387_s1 + $0x550] sm:$0xff] }
  0x3a   :  { %1403 = vmatpush1.bf16.msra.mxu0 %v1402_v51  ;;  %v182_v51 = vld [vmem:[%s3387_s1 + $0x4f8] sm:$0xff]  ;;  %v197_v21 = vld [vmem:[%s3387_s1 + $0x570] sm:$0xff]  ;;  %v200_v22 = vld [vmem:[%s3387_s1 + $0x588] sm:$0xff] }
  0x3b   :  { %1603 = vmatpush1.bf16.msra.mxu1 %v1602_v52  ;;  %1405 = vmatprep.subr.bf16.mxu0 %v1404_v53  ;;  %v1422_v52 = vpack.c.bf16 %v171_v45, %v167_v44  ;;  %v1624_v58 = vpack.c.bf16 %v182_v51, %v178_v50  ;;  %v204_v23 = vld [vmem:[%s3387_s1 + $0x5a8] sm:$0xff]  ;;  %v202_v26 = vld [vmem:[%s3387_s1 + $0x598] sm:$0xff]  ;;  %v199_v31 = vld [vmem:[%s3387_s1 + $0x580] sm:$0xff] }
  0x3c   :  { %1605 = vmatprep.subr.bf16.mxu1 %v1604_v57  ;;  %v177_v57 = vld [vmem:[%s3387_s1 + $0x4d0] sm:$0xff]  ;;  %v206_v27 = vld [vmem:[%s3387_s1 + $0x5b8] sm:$0xff]  ;;  %v203_v32 = vld [vmem:[%s3387_s1 + $0x5a0] sm:$0xff] }
  0x3d   :  { %v201_v33 = vld [vmem:[%s3387_s1 + $0x590] sm:$0xff]  ;;  %v208_v36 = vld [vmem:[%s3387_s1 + $0x5c8] sm:$0xff]  ;;  %v214_v39 = vld [vmem:[%s3387_s1 + $0x5f8] sm:$0xff]  ;;  %v1438_v40 = vpack.c.bf16 %v203_v32, %v199_v31 }
  0x3e   :  { %1407 = vmatpush1.bf16.msra.mxu0 %v1406_v0  ;;  %v190_v0 = vld [vmem:[%s3387_s1 + $0x538] sm:$0xff]  ;;  %v205_v35 = vld [vmem:[%s3387_s1 + $0x5b0] sm:$0xff]  ;;  %v212_v37 = vld [vmem:[%s3387_s1 + $0x5e8] sm:$0xff] }
  0x3f   :  { %1607 = vmatpush1.bf16.msra.mxu1 %v1606_v1  ;;  %1409 = vmatprep.subr.bf16.mxu0 %v1408_v2  ;;  %v1426_v1 = vpack.c.bf16 %v179_v56, %v175_v55  ;;  %v1626_v2 = vpack.c.bf16 %v181_v59, %v177_v57  ;;  %v1628_v7 = vpack.c.bf16 %v190_v0, %v186_v63  ;;  %v211_v44 = vld [vmem:[%s3387_s1 + $0x5e0] sm:$0xff]  ;;  %v209_v45 = vld [vmem:[%s3387_s1 + $0x5d0] sm:$0xff]  ;;  %v220_v48 = vld [vmem:[%s3387_s1 + $0x628] sm:$0xff] }
  0x40   :  { %1609 = vmatprep.subr.bf16.mxu1 %v1608_v6  ;;  %v185_v6 = vld [vmem:[%s3387_s1 + $0x510] sm:$0xff]  ;;  %v218_v49 = vld [vmem:[%s3387_s1 + $0x618] sm:$0xff]  ;;  %v219_v55 = vld [vmem:[%s3387_s1 + $0x620] sm:$0xff] }
  0x41   :  { %v222_v50 = vld [vmem:[%s3387_s1 + $0x638] sm:$0xff]  ;;  %v217_v56 = vld [vmem:[%s3387_s1 + $0x610] sm:$0xff]  ;;  %v224_v59 = vld [vmem:[%s3387_s1 + $0x648] sm:$0xff] }
  0x42   :  { %1411 = vmatpush1.bf16.msra.mxu0 %v1410_v14  ;;  %v1430_v14 = vpack.c.bf16 %v187_v5, %v183_v4  ;;  %v1644_v57 = vpack.c.bf16 %v222_v50, %v218_v49  ;;  %v228_v60 = vld [vmem:[%s3387_s1 + $0x668] sm:$0xff]  ;;  %v226_v62 = vld [vmem:[%s3387_s1 + $0x658] sm:$0xff]  ;;  %v227_v4 = vld [vmem:[%s3387_s1 + $0x660] sm:$0xff] }
  0x43   :  { %1611 = vmatpush1.bf16.msra.mxu1 %v1610_v15  ;;  %1413 = vmatprep.subr.bf16.mxu0 %v1412_v16  ;;  %v1630_v15 = vpack.c.bf16 %v189_v8, %v185_v6  ;;  %v1432_v16 = vpack.c.bf16 %v196_v10, %v192_v9  ;;  %v230_v63 = vld [vmem:[%s3387_s1 + $0x678] sm:$0xff]  ;;  %v225_v5 = vld [vmem:[%s3387_s1 + $0x650] sm:$0xff]  ;;  %v232_v8 = vld [vmem:[%s3387_s1 + $0x688] sm:$0xff] }
  0x44   :  { %1613 = vmatprep.subr.bf16.mxu1 %v1612_v20  ;;  %v1632_v20 = vpack.c.bf16 %v198_v13, %v194_v12  ;;  %v1648_v6 = vpack.c.bf16 %v230_v63, %v226_v62  ;;  %v236_v9 = vld [vmem:[%s3387_s1 + $0x6a8] sm:$0xff]  ;;  %v234_v10 = vld [vmem:[%s3387_s1 + $0x698] sm:$0xff]  ;;  %v243_v31 = vld [vmem:[%s3387_s1 + $0x6e0] sm:$0xff] }
  0x45   :  { %554 = vmatmul.mubr.f32.vlgmr.msra.gmra.mrb[0].mxu0 %v2221_v25  ;;  %v238_v12 = vld [vmem:[%s3387_s1 + $0x6b8] sm:$0xff]  ;;  %v241_v32 = vld [vmem:[%s3387_s1 + $0x6d0] sm:$0xff] }
  0x46   :  { %1415 = vmatpush1.bf16.msra.mxu0 %v1414_v28  ;;  %838 = vmatmul.mubr.f32.vlgmr.msra.gmra.mrb[0].mxu1 %v2221_v25  ;;  %v173_v25 = vld [vmem:[%s3387_s1 + $0x4b0] sm:$0xff]  ;;  %v1434_v28 = vpack.c.bf16 %v195_v18, %v191_v17  ;;  %v235_v17 = vld [vmem:[%s3387_s1 + $0x6a0] sm:$0xff]  ;;  %v262_v49 = vld [vmem:[%s3387_s1 + $0x778] sm:$0xff] }
  0x47   :  { %1615 = vmatpush1.bf16.msra.mxu1 %v1614_v29  ;;  %1417 = vmatprep.subr.bf16.mxu0 %v1416_v30  ;;  %v1622_v53 = vpack.c.bf16 %v173_v25, %v169_v46  ;;  %v1634_v29 = vpack.c.bf16 %v197_v21, %v193_v19  ;;  %v1436_v30 = vpack.c.bf16 %v204_v23, %v200_v22  ;;  %v216_v25 = vld [vmem:[%s3387_s1 + $0x608] sm:$0xff]  ;;  %v233_v18 = vld [vmem:[%s3387_s1 + $0x690] sm:$0xff]  ;;  %v242_v23 = vld [vmem:[%s3387_s1 + $0x6d8] sm:$0xff] }
  0x48   :  { %1617 = vmatprep.subr.bf16.mxu1 %v1616_v34  ;;  %624 = vmatprep.mubr.f32.mxu0 %v463_v38  ;;  %v1636_v34 = vpack.c.bf16 %v206_v27, %v202_v26  ;;  %v1652_v19 = vpack.c.bf16 %v238_v12, %v234_v10  ;;  %v240_v21 = vld [vmem:[%s3387_s1 + $0x6c8] sm:$0xff]  ;;  %v246_v26 = vld [vmem:[%s3387_s1 + $0x6f8] sm:$0xff] }
  0x49   :  { %908 = vmatprep.mubr.f32.mxu1 %v463_v38  ;;  %v210_v38 = vld [vmem:[%s3387_s1 + $0x5d8] sm:$0xff]  ;;  %v244_v22 = vld [vmem:[%s3387_s1 + $0x6e8] sm:$0xff] }
  0x4a   :  { %1419 = vmatpush1.bf16.msra.mxu0 %v1418_v41  ;;  %v1638_v41 = vpack.c.bf16 %v205_v35, %v201_v33  ;;  %v1640_v46 = vpack.c.bf16 %v214_v39, %v210_v38  ;;  %v1656_v33 = vpack.c.bf16 %v246_v26, %v242_v23  ;;  %v248_v35 = vld [vmem:[%s3387_s1 + $0x708] sm:$0xff]  ;;  %v254_v38 = vld [vmem:[%s3387_s1 + $0x738] sm:$0xff] }
  0x4b   :  { %1619 = vmatpush1.bf16.msra.mxu1 %v1618_v42  ;;  %1421 = vmatprep.subr.bf16.mxu0 %v1420_v43  ;;  %v1440_v42 = vpack.c.bf16 %v212_v37, %v208_v36  ;;  %v207_v43 = vld [vmem:[%s3387_s1 + $0x5c0] sm:$0xff]  ;;  %v252_v36 = vld [vmem:[%s3387_s1 + $0x728] sm:$0xff]  ;;  %v250_v37 = vld [vmem:[%s3387_s1 + $0x718] sm:$0xff] }
  0x4c   :  { %1621 = vmatprep.subr.bf16.mxu1 %v1620_v47  ;;  %v213_v47 = vld [vmem:[%s3387_s1 + $0x5f0] sm:$0xff]  ;;  %v1442_v51 = vpack.c.bf16 %v211_v44, %v207_v43  ;;  %v251_v43 = vld [vmem:[%s3387_s1 + $0x720] sm:$0xff]  ;;  %v270_v62 = vld [vmem:[%s3387_s1 + $0x7b8] sm:$0xff] }
  0x4d   :  { %v249_v44 = vld [vmem:[%s3387_s1 + $0x710] sm:$0xff]  ;;  %v278_v10 = vld [vmem:[%s3387_s1 + $0x7f8] sm:$0xff] }
  0x4e   :  { %1423 = vmatpush1.bf16.msra.mxu0 %v1422_v52  ;;  %v1642_v52 = vpack.c.bf16 %v213_v47, %v209_v45  ;;  %v1660_v45 = vpack.c.bf16 %v254_v38, %v250_v37  ;;  %v256_v47 = vld [vmem:[%s3387_s1 + $0x748] sm:$0xff]  ;;  %v286_v23 = vld [vmem:[%s3387_s1 + $0x838] sm:$0xff] }
  0x4f   :  { %1623 = vmatpush1.bf16.msra.mxu1 %v1622_v53  ;;  %1425 = vmatprep.subr.bf16.mxu0 %v1424_v54  ;;  %v1444_v53 = vpack.c.bf16 %v220_v48, %v216_v25  ;;  %v215_v54 = vld [vmem:[%s3387_s1 + $0x600] sm:$0xff]  ;;  %v260_v25 = vld [vmem:[%s3387_s1 + $0x768] sm:$0xff]  ;;  %v258_v48 = vld [vmem:[%s3387_s1 + $0x758] sm:$0xff] }
  0x50   :  { %1625 = vmatprep.subr.bf16.mxu1 %v1624_v58  ;;  %v221_v58 = vld [vmem:[%s3387_s1 + $0x630] sm:$0xff]  ;;  %v1446_v0 = vpack.c.bf16 %v219_v55, %v215_v54  ;;  %v259_v54 = vld [vmem:[%s3387_s1 + $0x760] sm:$0xff]  ;;  %v294_v37 = vld [vmem:[%s3387_s1 + $0x878] sm:$0xff] }
  0x51   :  { %v257_v55 = vld [vmem:[%s3387_s1 + $0x750] sm:$0xff] }
  0x52   :  { %1427 = vmatpush1.bf16.msra.mxu0 %v1426_v1  ;;  %v1646_v1 = vpack.c.bf16 %v221_v58, %v217_v56  ;;  %v1664_v56 = vpack.c.bf16 %v262_v49, %v258_v48  ;;  %v264_v58 = vld [vmem:[%s3387_s1 + $0x788] sm:$0xff]  ;;  %v298_v49 = vld [vmem:[%s3387_s1 + $0x898] sm:$0xff] }
  0x53   :  { %1627 = vmatpush1.bf16.msra.mxu1 %v1626_v2  ;;  %1429 = vmatprep.subr.bf16.mxu0 %v1428_v3  ;;  %v1448_v2 = vpack.c.bf16 %v228_v60, %v224_v59  ;;  %v223_v3 = vld [vmem:[%s3387_s1 + $0x640] sm:$0xff]  ;;  %v268_v59 = vld [vmem:[%s3387_s1 + $0x7a8] sm:$0xff]  ;;  %v266_v60 = vld [vmem:[%s3387_s1 + $0x798] sm:$0xff] }
  0x54   :  { %1629 = vmatprep.subr.bf16.mxu1 %v1628_v7  ;;  %v229_v7 = vld [vmem:[%s3387_s1 + $0x670] sm:$0xff]  ;;  %v1450_v13 = vpack.c.bf16 %v227_v4, %v223_v3  ;;  %v267_v3 = vld [vmem:[%s3387_s1 + $0x7a0] sm:$0xff]  ;;  %v300_v48 = vld [vmem:[%s3387_s1 + $0x8a8] sm:$0xff] }
  0x55   :  { %v265_v4 = vld [vmem:[%s3387_s1 + $0x790] sm:$0xff] }
  0x56   :  { %1431 = vmatpush1.bf16.msra.mxu0 %v1430_v14  ;;  %v1650_v14 = vpack.c.bf16 %v229_v7, %v225_v5  ;;  %v1668_v5 = vpack.c.bf16 %v270_v62, %v266_v60  ;;  %v272_v7 = vld [vmem:[%s3387_s1 + $0x7c8] sm:$0xff]  ;;  %v306_v62 = vld [vmem:[%s3387_s1 + $0x8d8] sm:$0xff] }
  0x57   :  { %1631 = vmatpush1.bf16.msra.mxu1 %v1630_v15  ;;  %1433 = vmatprep.subr.bf16.mxu0 %v1432_v16  ;;  %v1452_v15 = vpack.c.bf16 %v236_v9, %v232_v8  ;;  %v231_v16 = vld [vmem:[%s3387_s1 + $0x680] sm:$0xff]  ;;  %v276_v8 = vld [vmem:[%s3387_s1 + $0x7e8] sm:$0xff]  ;;  %v274_v9 = vld [vmem:[%s3387_s1 + $0x7d8] sm:$0xff] }
  0x58   :  { %1633 = vmatprep.subr.bf16.mxu1 %v1632_v20  ;;  %v237_v20 = vld [vmem:[%s3387_s1 + $0x6b0] sm:$0xff]  ;;  %v1454_v27 = vpack.c.bf16 %v235_v17, %v231_v16  ;;  %v275_v16 = vld [vmem:[%s3387_s1 + $0x7e0] sm:$0xff]  ;;  %v308_v60 = vld [vmem:[%s3387_s1 + $0x8e8] sm:$0xff] }
  0x59   :  { %v273_v17 = vld [vmem:[%s3387_s1 + $0x7d0] sm:$0xff] }
  0x5a   :  { %1435 = vmatpush1.bf16.msra.mxu0 %v1434_v28  ;;  %v1654_v28 = vpack.c.bf16 %v237_v20, %v233_v18  ;;  %v1672_v18 = vpack.c.bf16 %v278_v10, %v274_v9  ;;  %v280_v20 = vld [vmem:[%s3387_s1 + $0x808] sm:$0xff]  ;;  %v314_v10 = vld [vmem:[%s3387_s1 + $0x918] sm:$0xff] }
  0x5b   :  { %1635 = vmatpush1.bf16.msra.mxu1 %v1634_v29  ;;  %1437 = vmatprep.subr.bf16.mxu0 %v1436_v30  ;;  %v1456_v29 = vpack.c.bf16 %v244_v22, %v240_v21  ;;  %v239_v30 = vld [vmem:[%s3387_s1 + $0x6c0] sm:$0xff]  ;;  %v284_v21 = vld [vmem:[%s3387_s1 + $0x828] sm:$0xff]  ;;  %v282_v22 = vld [vmem:[%s3387_s1 + $0x818] sm:$0xff] }
  0x5c   :  { %1637 = vmatprep.subr.bf16.mxu1 %v1636_v34  ;;  %v245_v34 = vld [vmem:[%s3387_s1 + $0x6f0] sm:$0xff]  ;;  %v1458_v39 = vpack.c.bf16 %v243_v31, %v239_v30  ;;  %v283_v30 = vld [vmem:[%s3387_s1 + $0x820] sm:$0xff]  ;;  %v316_v9 = vld [vmem:[%s3387_s1 + $0x928] sm:$0xff] }
  0x5d   :  { %v281_v31 = vld [vmem:[%s3387_s1 + $0x810] sm:$0xff] }
  0x5e   :  { %1439 = vmatpush1.bf16.msra.mxu0 %v1438_v40  ;;  %v1658_v40 = vpack.c.bf16 %v245_v34, %v241_v32  ;;  %v1676_v32 = vpack.c.bf16 %v286_v23, %v282_v22  ;;  %v288_v34 = vld [vmem:[%s3387_s1 + $0x848] sm:$0xff]  ;;  %v322_v23 = vld [vmem:[%s3387_s1 + $0x958] sm:$0xff] }
  0x5f   :  { %1639 = vmatpush1.bf16.msra.mxu1 %v1638_v41  ;;  %1441 = vmatprep.subr.bf16.mxu0 %v1440_v42  ;;  %v1460_v41 = vpack.c.bf16 %v252_v36, %v248_v35  ;;  %v247_v42 = vld [vmem:[%s3387_s1 + $0x700] sm:$0xff]  ;;  %v292_v35 = vld [vmem:[%s3387_s1 + $0x868] sm:$0xff]  ;;  %v290_v36 = vld [vmem:[%s3387_s1 + $0x858] sm:$0xff] }
  0x60   :  { %1641 = vmatprep.subr.bf16.mxu1 %v1640_v46  ;;  %v253_v46 = vld [vmem:[%s3387_s1 + $0x730] sm:$0xff]  ;;  %v1462_v50 = vpack.c.bf16 %v251_v43, %v247_v42  ;;  %v287_v42 = vld [vmem:[%s3387_s1 + $0x840] sm:$0xff]  ;;  %v324_v22 = vld [vmem:[%s3387_s1 + $0x968] sm:$0xff] }
  0x61   :  { %v291_v43 = vld [vmem:[%s3387_s1 + $0x860] sm:$0xff] }
  0x62   :  { %1443 = vmatpush1.bf16.msra.mxu0 %v1442_v51  ;;  %v1662_v51 = vpack.c.bf16 %v253_v46, %v249_v44  ;;  %v289_v44 = vld [vmem:[%s3387_s1 + $0x850] sm:$0xff]  ;;  %v1680_v46 = vpack.c.bf16 %v294_v37, %v290_v36  ;;  %v332_v36 = vld [vmem:[%s3387_s1 + $0x9a8] sm:$0xff]  ;;  %v330_v37 = vld [vmem:[%s3387_s1 + $0x998] sm:$0xff] }
  0x63   :  { %1643 = vmatpush1.bf16.msra.mxu1 %v1642_v52  ;;  %1445 = vmatprep.subr.bf16.mxu0 %v1444_v53  ;;  %v1464_v52 = vpack.c.bf16 %v260_v25, %v256_v47  ;;  %v255_v53 = vld [vmem:[%s3387_s1 + $0x740] sm:$0xff]  ;;  %v293_v47 = vld [vmem:[%s3387_s1 + $0x870] sm:$0xff]  ;;  %v296_v25 = vld [vmem:[%s3387_s1 + $0x888] sm:$0xff] }
  0x64   :  { %1645 = vmatprep.subr.bf16.mxu1 %v1644_v57  ;;  %v261_v57 = vld [vmem:[%s3387_s1 + $0x770] sm:$0xff]  ;;  %v1466_v63 = vpack.c.bf16 %v259_v54, %v255_v53  ;;  %v1682_v53 = vpack.c.bf16 %v293_v47, %v289_v44  ;;  %v1484_v54 = vpack.c.bf16 %v300_v48, %v296_v25 }
  0x66   :  { %1447 = vmatpush1.bf16.msra.mxu0 %v1446_v0  ;;  %v1666_v0 = vpack.c.bf16 %v261_v57, %v257_v55  ;;  %v295_v55 = vld [vmem:[%s3387_s1 + $0x880] sm:$0xff]  ;;  %v297_v57 = vld [vmem:[%s3387_s1 + $0x890] sm:$0xff] }
  0x67   :  { %1647 = vmatpush1.bf16.msra.mxu1 %v1646_v1  ;;  %1449 = vmatprep.subr.bf16.mxu0 %v1448_v2  ;;  %v1468_v1 = vpack.c.bf16 %v268_v59, %v264_v58  ;;  %v263_v2 = vld [vmem:[%s3387_s1 + $0x780] sm:$0xff]  ;;  %v304_v59 = vld [vmem:[%s3387_s1 + $0x8c8] sm:$0xff] }
  0x68   :  { %1649 = vmatprep.subr.bf16.mxu1 %v1648_v6  ;;  %v269_v6 = vld [vmem:[%s3387_s1 + $0x7b0] sm:$0xff]  ;;  %v1470_v12 = vpack.c.bf16 %v267_v3, %v263_v2  ;;  %v1488_v2 = vpack.c.bf16 %v308_v60, %v304_v59  ;;  %v303_v3 = vld [vmem:[%s3387_s1 + $0x8c0] sm:$0xff] }
  0x6a   :  { %1451 = vmatpush1.bf16.msra.mxu0 %v1450_v13  ;;  %v1670_v13 = vpack.c.bf16 %v269_v6, %v265_v4  ;;  %v307_v4 = vld [vmem:[%s3387_s1 + $0x8e0] sm:$0xff] }
  0x6b   :  { %1651 = vmatpush1.bf16.msra.mxu1 %v1650_v14  ;;  %1453 = vmatprep.subr.bf16.mxu0 %v1452_v15  ;;  %v1472_v14 = vpack.c.bf16 %v276_v8, %v272_v7  ;;  %v271_v15 = vld [vmem:[%s3387_s1 + $0x7c0] sm:$0xff]  ;;  %v309_v7 = vld [vmem:[%s3387_s1 + $0x8f0] sm:$0xff]  ;;  %v312_v8 = vld [vmem:[%s3387_s1 + $0x908] sm:$0xff] }
  0x6c   :  { %1653 = vmatprep.subr.bf16.mxu1 %v1652_v19  ;;  %v277_v19 = vld [vmem:[%s3387_s1 + $0x7f0] sm:$0xff]  ;;  %v1474_v26 = vpack.c.bf16 %v275_v16, %v271_v15  ;;  %v1492_v15 = vpack.c.bf16 %v316_v9, %v312_v8  ;;  %v311_v16 = vld [vmem:[%s3387_s1 + $0x900] sm:$0xff] }
  0x6e   :  { %1455 = vmatpush1.bf16.msra.mxu0 %v1454_v27  ;;  %v1674_v27 = vpack.c.bf16 %v277_v19, %v273_v17  ;;  %v315_v17 = vld [vmem:[%s3387_s1 + $0x920] sm:$0xff] }
  0x6f   :  { %1655 = vmatpush1.bf16.msra.mxu1 %v1654_v28  ;;  %1457 = vmatprep.subr.bf16.mxu0 %v1456_v29  ;;  %v1476_v28 = vpack.c.bf16 %v284_v21, %v280_v20  ;;  %v279_v29 = vld [vmem:[%s3387_s1 + $0x800] sm:$0xff]  ;;  %v317_v20 = vld [vmem:[%s3387_s1 + $0x930] sm:$0xff]  ;;  %v320_v21 = vld [vmem:[%s3387_s1 + $0x948] sm:$0xff] }
  0x70   :  { %1657 = vmatprep.subr.bf16.mxu1 %v1656_v33  ;;  %v285_v33 = vld [vmem:[%s3387_s1 + $0x830] sm:$0xff]  ;;  %v1478_v38 = vpack.c.bf16 %v283_v30, %v279_v29  ;;  %v1496_v29 = vpack.c.bf16 %v324_v22, %v320_v21  ;;  %v319_v30 = vld [vmem:[%s3387_s1 + $0x940] sm:$0xff] }
  0x72   :  { %1459 = vmatpush1.bf16.msra.mxu0 %v1458_v39  ;;  %v2741_v39 = vld [vmem:[%s3386_s0 + $0x8] sm:$0x3f] }
  0x73   :  { %1659 = vmatpush1.bf16.msra.mxu1 %v1658_v40  ;;  %1461 = vmatprep.subr.bf16.mxu0 %v1460_v41  ;;  %v1678_v40 = vpack.c.bf16 %v285_v33, %v281_v31  ;;  %v1480_v41 = vpack.c.bf16 %v292_v35, %v288_v34  ;;  %v323_v31 = vld [vmem:[%s3387_s1 + $0x960] sm:$0xff]  ;;  %v325_v34 = vld [vmem:[%s3387_s1 + $0x970] sm:$0xff]  ;;  %v328_v35 = vld [vmem:[%s3387_s1 + $0x988] sm:$0xff] }
  0x74   :  { %1661 = vmatprep.subr.bf16.mxu1 %v1660_v45  ;;  %v2754_v45 = vrot.slane %v2741_v39, %v2188_v11 }
  0x76   :  { %1463 = vmatpush1.bf16.msra.mxu0 %v1462_v50  ;;  %v302_v50 = vld [vmem:[%s3387_s1 + $0x8b8] sm:$0xff] }
  0x77   :  { %1663 = vmatpush1.bf16.msra.mxu1 %v1662_v51  ;;  %1465 = vmatprep.subr.bf16.mxu0 %v1464_v52  ;;  %v479_v51 = vcombine.high %v2754_v45, %v2754_v45  ;;  %v1482_v52 = vpack.c.bf16 %v291_v43, %v287_v42  ;;  %v1684_v58 = vpack.c.bf16 %v302_v50, %v298_v49 }
  0x78   :  { %1665 = vmatprep.subr.bf16.mxu1 %v1664_v56  ;;  %v299_v56 = vld [vmem:[%s3387_s1 + $0x8a0] sm:$0xff] }
  0x7a   :  { %1467 = vmatpush1.bf16.msra.mxu0 %v1466_v63  ;;  %v310_v63 = vld [vmem:[%s3387_s1 + $0x8f8] sm:$0xff] }
  0x7b   :  { %1667 = vmatpush1.bf16.msra.mxu1 %v1666_v0  ;;  %1469 = vmatprep.subr.bf16.mxu0 %v1468_v1  ;;  %v1486_v0 = vpack.c.bf16 %v299_v56, %v295_v55  ;;  %v1688_v6 = vpack.c.bf16 %v310_v63, %v306_v62 }
  0x7c   :  { %1669 = vmatprep.subr.bf16.mxu1 %v1668_v5  ;;  %v305_v5 = vld [vmem:[%s3387_s1 + $0x8d0] sm:$0xff] }
  0x7e   :  { %1471 = vmatpush1.bf16.msra.mxu0 %v1470_v12  ;;  %v318_v12 = vld [vmem:[%s3387_s1 + $0x938] sm:$0xff] }
  0x7f   :  { %1671 = vmatpush1.bf16.msra.mxu1 %v1670_v13  ;;  %1473 = vmatprep.subr.bf16.mxu0 %v1472_v14  ;;  %v1490_v13 = vpack.c.bf16 %v307_v4, %v303_v3  ;;  %v1690_v14 = vpack.c.bf16 %v309_v7, %v305_v5  ;;  %v1692_v19 = vpack.c.bf16 %v318_v12, %v314_v10 }
  0x80   :  { %1673 = vmatprep.subr.bf16.mxu1 %v1672_v18  ;;  %v313_v18 = vld [vmem:[%s3387_s1 + $0x910] sm:$0xff] }
  0x82   :  { %1475 = vmatpush1.bf16.msra.mxu0 %v1474_v26  ;;  %v326_v26 = vld [vmem:[%s3387_s1 + $0x978] sm:$0xff] }
  0x83   :  { %1675 = vmatpush1.bf16.msra.mxu1 %v1674_v27  ;;  %1477 = vmatprep.subr.bf16.mxu0 %v1476_v28  ;;  %v1494_v27 = vpack.c.bf16 %v315_v17, %v311_v16  ;;  %v1694_v28 = vpack.c.bf16 %v317_v20, %v313_v18  ;;  %v1696_v33 = vpack.c.bf16 %v326_v26, %v322_v23 }
  0x84   :  { %1677 = vmatprep.subr.bf16.mxu1 %v1676_v32  ;;  %v321_v32 = vld [vmem:[%s3387_s1 + $0x950] sm:$0xff] }
  0x85   :  { %625 = vmatmul.mubr.f32.vlgmr.msra.gmra.mrb[0].mxu0 %v2342_v24 }
  0x86   :  { %1479 = vmatpush1.bf16.msra.mxu0 %v1478_v38  ;;  %909 = vmatmul.mubr.f32.vlgmr.msra.gmra.mrb[0].mxu1 %v2342_v24  ;;  %v301_v24 = vld [vmem:[%s3387_s1 + $0x8b0] sm:$0xff]  ;;  %v334_v38 = vld [vmem:[%s3387_s1 + $0x9b8] sm:$0xff] }
  0x87   :  { %1679 = vmatpush1.bf16.msra.mxu1 %v1678_v40  ;;  %1481 = vmatprep.subr.bf16.mxu0 %v1480_v41  ;;  %v1686_v1 = vpack.c.bf16 %v301_v24, %v297_v57 }
  0x88   :  { %1681 = vmatprep.subr.bf16.mxu1 %v1680_v46  ;;  %695 = vmatprep.mubr.f32.mxu0 %v479_v51 }
  0x89   :  { %979 = vmatprep.mubr.f32.mxu1 %v479_v51 }
  0x8a   :  { %1483 = vmatpush1.bf16.msra.mxu0 %v1482_v52 }
  0x8b   :  { %1683 = vmatpush1.bf16.msra.mxu1 %v1682_v53  ;;  %1485 = vmatprep.subr.bf16.mxu0 %v1484_v54 }
  0x8c   :  { %1685 = vmatprep.subr.bf16.mxu1 %v1684_v58 }
  0x8e   :  { %1487 = vmatpush1.bf16.msra.mxu0 %v1486_v0 }
  0x8f   :  { %1687 = vmatpush1.bf16.msra.mxu1 %v1686_v1  ;;  %1489 = vmatprep.subr.bf16.mxu0 %v1488_v2 }
  0x90   :  { %1689 = vmatprep.subr.bf16.mxu1 %v1688_v6 }
  0x92   :  { %1491 = vmatpush1.bf16.msra.mxu0 %v1490_v13 }
  0x93   :  { %1691 = vmatpush1.bf16.msra.mxu1 %v1690_v14  ;;  %1493 = vmatprep.subr.bf16.mxu0 %v1492_v15 }
  0x94   :  { %1693 = vmatprep.subr.bf16.mxu1 %v1692_v19 }
  0x95   :  { %10 = vsyncpa [#allocation3], 0  ;;  %v1498_v40 = vpack.c.bf16 %v323_v31, %v319_v30  ;;  %v1698_v41 = vpack.c.bf16 %v325_v34, %v321_v32  ;;  %v1500_v42 = vpack.c.bf16 %v332_v36, %v328_v35  ;;  %v327_v43 = vld [vmem:[%s3387_s1 + $0x980] sm:$0xff]  ;;  %v329_v46 = vld [vmem:[%s3387_s1 + $0x990] sm:$0xff]  ;;  %v1700_v47 = vpack.c.bf16 %v334_v38, %v330_v37 }
  0x96   :  { %1495 = vmatpush1.bf16.msra.mxu0 %v1494_v27  ;;  %v331_v44 = vld [vmem:[%s3387_s1 + $0x9a0] sm:$0xff]  ;;  %v333_v25 = vld [vmem:[%s3387_s1 + $0x9b0] sm:$0xff]  ;;  %v336_v48 = vld [vmem:[%s3387_s1 + $0x9c8] sm:$0xff]  ;;  %vm486_vm0 = vcmask 261120   ;;  %vm1135_vm1 = vcmask 1043456   ;;  %vm1131_vm2 = vcmask 949248  }
  0x97   :  { %1695 = vmatpush1.bf16.msra.mxu1 %v1694_v28  ;;  %1497 = vmatprep.subr.bf16.mxu0 %v1496_v29  ;;  %v340_v49 = vld [vmem:[%s3387_s1 + $0x9e8] sm:$0xff]  ;;  %v338_v50 = vld [vmem:[%s3387_s1 + $0x9d8] sm:$0xff]  ;;  %v1502_v52 = vpack.c.bf16 %v331_v44, %v327_v43  ;;  %v1702_v53 = vpack.c.bf16 %v333_v25, %v329_v46  ;;  %v335_v55 = vld [vmem:[%s3387_s1 + $0x9c0] sm:$0xff]  ;;  %vm1279_vm3 = vcmask 74752  }
  0x98   :  { %1697 = vmatprep.subr.bf16.mxu1 %v1696_v33  ;;  %v342_v51 = vld [vmem:[%s3387_s1 + $0x9f8] sm:$0xff]  ;;  %v1504_v54 = vpack.c.bf16 %v340_v49, %v336_v48  ;;  %v339_v56 = vld [vmem:[%s3387_s1 + $0x9e0] sm:$0xff]  ;;  %v337_v57 = vld [vmem:[%s3387_s1 + $0x9d0] sm:$0xff] }
  0x99   :  { %v1704_v58 = vpack.c.bf16 %v342_v51, %v338_v50  ;;  %v341_v24 = vld [vmem:[%s3387_s1 + $0x9f0] sm:$0xff]  ;;  %v344_v59 = vld [vmem:[%s3387_s1 + $0xa08] sm:$0xff]  ;;  %v346_v62 = vld [vmem:[%s3387_s1 + $0xa18] sm:$0xff]  ;;  %v1506_v0 = vpack.c.bf16 %v339_v56, %v335_v55 }
  0x9a   :  { %1499 = vmatpush1.bf16.msra.mxu0 %v1498_v40  ;;  %v348_v60 = vld [vmem:[%s3387_s1 + $0xa28] sm:$0xff]  ;;  %v350_v63 = vld [vmem:[%s3387_s1 + $0xa38] sm:$0xff]  ;;  %v1706_v1 = vpack.c.bf16 %v341_v24, %v337_v57  ;;  %v343_v3 = vld [vmem:[%s3387_s1 + $0xa00] sm:$0xff] }
  0x9b   :  { %1699 = vmatpush1.bf16.msra.mxu1 %v1698_v41  ;;  %1501 = vmatprep.subr.bf16.mxu0 %v1500_v42  ;;  %v1508_v2 = vpack.c.bf16 %v348_v60, %v344_v59  ;;  %v347_v4 = vld [vmem:[%s3387_s1 + $0xa20] sm:$0xff]  ;;  %v345_v5 = vld [vmem:[%s3387_s1 + $0xa10] sm:$0xff]  ;;  %v1708_v6 = vpack.c.bf16 %v350_v63, %v346_v62  ;;  %v352_v8 = vld [vmem:[%s3387_s1 + $0xa48] sm:$0xff] }
  0x9c   :  { %1701 = vmatprep.subr.bf16.mxu1 %v1700_v47  ;;  %v349_v7 = vld [vmem:[%s3387_s1 + $0xa30] sm:$0xff]  ;;  %v356_v9 = vld [vmem:[%s3387_s1 + $0xa68] sm:$0xff]  ;;  %v354_v10 = vld [vmem:[%s3387_s1 + $0xa58] sm:$0xff]  ;;  %v1510_v13 = vpack.c.bf16 %v347_v4, %v343_v3 }
  0x9d   :  { %v358_v12 = vld [vmem:[%s3387_s1 + $0xa78] sm:$0xff]  ;;  %v1710_v14 = vpack.c.bf16 %v349_v7, %v345_v5  ;;  %v1512_v15 = vpack.c.bf16 %v356_v9, %v352_v8  ;;  %v351_v16 = vld [vmem:[%s3387_s1 + $0xa40] sm:$0xff]  ;;  %v353_v18 = vld [vmem:[%s3387_s1 + $0xa50] sm:$0xff] }
  0x9e   :  { %1503 = vmatpush1.bf16.msra.mxu0 %v1502_v52  ;;  %v355_v17 = vld [vmem:[%s3387_s1 + $0xa60] sm:$0xff]  ;;  %v1712_v19 = vpack.c.bf16 %v358_v12, %v354_v10  ;;  %v357_v20 = vld [vmem:[%s3387_s1 + $0xa70] sm:$0xff]  ;;  %v360_v21 = vld [vmem:[%s3387_s1 + $0xa88] sm:$0xff] }
  0x9f   :  { %1703 = vmatpush1.bf16.msra.mxu1 %v1702_v53  ;;  %1505 = vmatprep.subr.bf16.mxu0 %v1504_v54  ;;  %v364_v22 = vld [vmem:[%s3387_s1 + $0xaa8] sm:$0xff]  ;;  %v362_v23 = vld [vmem:[%s3387_s1 + $0xa98] sm:$0xff]  ;;  %v1514_v27 = vpack.c.bf16 %v355_v17, %v351_v16  ;;  %v1714_v28 = vpack.c.bf16 %v357_v20, %v353_v18  ;;  %v359_v30 = vld [vmem:[%s3387_s1 + $0xa80] sm:$0xff] }
  0xa0   :  { %1705 = vmatprep.subr.bf16.mxu1 %v1704_v58  ;;  %v366_v26 = vld [vmem:[%s3387_s1 + $0xab8] sm:$0xff]  ;;  %v1516_v29 = vpack.c.bf16 %v364_v22, %v360_v21  ;;  %v363_v31 = vld [vmem:[%s3387_s1 + $0xaa0] sm:$0xff]  ;;  %v361_v32 = vld [vmem:[%s3387_s1 + $0xa90] sm:$0xff] }
  0xa1   :  { %v1716_v33 = vpack.c.bf16 %v366_v26, %v362_v23  ;;  %v365_v34 = vld [vmem:[%s3387_s1 + $0xab0] sm:$0xff]  ;;  %v368_v35 = vld [vmem:[%s3387_s1 + $0xac8] sm:$0xff]  ;;  %v370_v37 = vld [vmem:[%s3387_s1 + $0xad8] sm:$0xff]  ;;  %v1518_v40 = vpack.c.bf16 %v363_v31, %v359_v30 }
  0xa2   :  { %1507 = vmatpush1.bf16.msra.mxu0 %v1506_v0  ;;  %v372_v36 = vld [vmem:[%s3387_s1 + $0xae8] sm:$0xff]  ;;  %v374_v38 = vld [vmem:[%s3387_s1 + $0xaf8] sm:$0xff]  ;;  %v1718_v41 = vpack.c.bf16 %v365_v34, %v361_v32  ;;  %v367_v43 = vld [vmem:[%s3387_s1 + $0xac0] sm:$0xff] }
  0xa3   :  { %1707 = vmatpush1.bf16.msra.mxu1 %v1706_v1  ;;  %1509 = vmatprep.subr.bf16.mxu0 %v1508_v2  ;;  %v1520_v42 = vpack.c.bf16 %v372_v36, %v368_v35  ;;  %v371_v44 = vld [vmem:[%s3387_s1 + $0xae0] sm:$0xff]  ;;  %v369_v46 = vld [vmem:[%s3387_s1 + $0xad0] sm:$0xff]  ;;  %v1720_v47 = vpack.c.bf16 %v374_v38, %v370_v37  ;;  %v376_v48 = vld [vmem:[%s3387_s1 + $0xb08] sm:$0xff] }
  0xa4   :  { %1709 = vmatprep.subr.bf16.mxu1 %v1708_v6  ;;  %v373_v25 = vld [vmem:[%s3387_s1 + $0xaf0] sm:$0xff]  ;;  %v380_v49 = vld [vmem:[%s3387_s1 + $0xb28] sm:$0xff]  ;;  %v378_v50 = vld [vmem:[%s3387_s1 + $0xb18] sm:$0xff]  ;;  %v1522_v52 = vpack.c.bf16 %v371_v44, %v367_v43 }
  0xa5   :  { %v382_v51 = vld [vmem:[%s3387_s1 + $0xb38] sm:$0xff]  ;;  %v1722_v53 = vpack.c.bf16 %v373_v25, %v369_v46  ;;  %v1524_v54 = vpack.c.bf16 %v380_v49, %v376_v48  ;;  %v375_v55 = vld [vmem:[%s3387_s1 + $0xb00] sm:$0xff]  ;;  %v377_v57 = vld [vmem:[%s3387_s1 + $0xb10] sm:$0xff] }
  0xa6   :  { %1511 = vmatpush1.bf16.msra.mxu0 %v1510_v13  ;;  %v379_v56 = vld [vmem:[%s3387_s1 + $0xb20] sm:$0xff]  ;;  %v1724_v58 = vpack.c.bf16 %v382_v51, %v378_v50  ;;  %v381_v24 = vld [vmem:[%s3387_s1 + $0xb30] sm:$0xff]  ;;  %v384_v59 = vld [vmem:[%s3387_s1 + $0xb48] sm:$0xff] }
  0xa7   :  { %1711 = vmatpush1.bf16.msra.mxu1 %v1710_v14  ;;  %1513 = vmatprep.subr.bf16.mxu0 %v1512_v15  ;;  %v388_v60 = vld [vmem:[%s3387_s1 + $0xb68] sm:$0xff]  ;;  %v386_v62 = vld [vmem:[%s3387_s1 + $0xb58] sm:$0xff]  ;;  %v1526_v0 = vpack.c.bf16 %v379_v56, %v375_v55  ;;  %v1726_v1 = vpack.c.bf16 %v381_v24, %v377_v57  ;;  %v383_v3 = vld [vmem:[%s3387_s1 + $0xb40] sm:$0xff]  ;;  %v464_v55 = vcombine.high %v2741_v39, %v2741_v39  ;;  %v1877_v24 = vmov 0.0  }
  0xa8   :  { %1713 = vmatprep.subr.bf16.mxu1 %v1712_v19  ;;  %v390_v63 = vld [vmem:[%s3387_s1 + $0xb78] sm:$0xff]  ;;  %v1528_v2 = vpack.c.bf16 %v388_v60, %v384_v59  ;;  %v387_v4 = vld [vmem:[%s3387_s1 + $0xb60] sm:$0xff]  ;;  %v385_v5 = vld [vmem:[%s3387_s1 + $0xb50] sm:$0xff] }
  0xa9   :  { %v1728_v6 = vpack.c.bf16 %v390_v63, %v386_v62  ;;  %v389_v7 = vld [vmem:[%s3387_s1 + $0xb70] sm:$0xff]  ;;  %v392_v8 = vld [vmem:[%s3387_s1 + $0xb88] sm:$0xff]  ;;  %v394_v10 = vld [vmem:[%s3387_s1 + $0xb98] sm:$0xff]  ;;  %v1530_v13 = vpack.c.bf16 %v387_v4, %v383_v3 }
  0xaa   :  { %1515 = vmatpush1.bf16.msra.mxu0 %v1514_v27  ;;  %v396_v9 = vld [vmem:[%s3387_s1 + $0xba8] sm:$0xff]  ;;  %v398_v12 = vld [vmem:[%s3387_s1 + $0xbb8] sm:$0xff]  ;;  %v1730_v14 = vpack.c.bf16 %v389_v7, %v385_v5  ;;  %v391_v16 = vld [vmem:[%s3387_s1 + $0xb80] sm:$0xff] }
  0xab   :  { %1715 = vmatpush1.bf16.msra.mxu1 %v1714_v28  ;;  %1517 = vmatprep.subr.bf16.mxu0 %v1516_v29  ;;  %v1532_v15 = vpack.c.bf16 %v396_v9, %v392_v8  ;;  %v395_v17 = vld [vmem:[%s3387_s1 + $0xba0] sm:$0xff]  ;;  %v393_v18 = vld [vmem:[%s3387_s1 + $0xb90] sm:$0xff]  ;;  %v1732_v19 = vpack.c.bf16 %v398_v12, %v394_v10  ;;  %v400_v21 = vld [vmem:[%s3387_s1 + $0xbc8] sm:$0xff] }
  0xac   :  { %1717 = vmatprep.subr.bf16.mxu1 %v1716_v33  ;;  %v397_v20 = vld [vmem:[%s3387_s1 + $0xbb0] sm:$0xff]  ;;  %v404_v22 = vld [vmem:[%s3387_s1 + $0xbe8] sm:$0xff]  ;;  %v402_v23 = vld [vmem:[%s3387_s1 + $0xbd8] sm:$0xff]  ;;  %v1534_v27 = vpack.c.bf16 %v395_v17, %v391_v16 }
  0xad   :  { %v406_v26 = vld [vmem:[%s3387_s1 + $0xbf8] sm:$0xff]  ;;  %v1734_v28 = vpack.c.bf16 %v397_v20, %v393_v18  ;;  %v1536_v29 = vpack.c.bf16 %v404_v22, %v400_v21  ;;  %v399_v30 = vld [vmem:[%s3387_s1 + $0xbc0] sm:$0xff]  ;;  %v401_v32 = vld [vmem:[%s3387_s1 + $0xbd0] sm:$0xff] }
  0xae   :  { %1519 = vmatpush1.bf16.msra.mxu0 %v1518_v40  ;;  %v403_v31 = vld [vmem:[%s3387_s1 + $0xbe0] sm:$0xff]  ;;  %v1736_v33 = vpack.c.bf16 %v406_v26, %v402_v23  ;;  %v405_v34 = vld [vmem:[%s3387_s1 + $0xbf0] sm:$0xff]  ;;  %v408_v35 = vld [vmem:[%s3387_s1 + $0xc08] sm:$0xff] }
  0xaf   :  { %1719 = vmatpush1.bf16.msra.mxu1 %v1718_v41  ;;  %1521 = vmatprep.subr.bf16.mxu0 %v1520_v42  ;;  %v412_v36 = vld [vmem:[%s3387_s1 + $0xc28] sm:$0xff]  ;;  %v1538_v37 = vpack.c.bf16 %v403_v31, %v399_v30  ;;  %v1738_v38 = vpack.c.bf16 %v405_v34, %v401_v32  ;;  %v407_v41 = vld [vmem:[%s3387_s1 + $0xc00] sm:$0xff]  ;;  %v410_v51 = vld [vmem:[%s3387_s1 + $0xc18] sm:$0xff] }
  0xb0   :  { %1721 = vmatprep.subr.bf16.mxu1 %v1720_v47  ;;  %v1540_v40 = vpack.c.bf16 %v412_v36, %v408_v35  ;;  %v411_v42 = vld [vmem:[%s3387_s1 + $0xc20] sm:$0xff]  ;;  %v416_v43 = vld [vmem:[%s3387_s1 + $0xc48] sm:$0xff]  ;;  %v1095_v56 = vld [vmem:[%s3389_s3 + $0x110] sm:$0xff] }
  0xb1   :  { %v420_v44 = vld [vmem:[%s3387_s1 + $0xc68] sm:$0xff]  ;;  %v1093_v46 = vld [vmem:[%s3389_s3 + $0x100] sm:$0xff]  ;;  %v1542_v25 = vpack.c.bf16 %v411_v42, %v407_v41  ;;  %v1096_v57 = vld [vmem:[%s3389_s3 + $0x118] sm:$0xff] }
  0xb2   :  { %1523 = vmatpush1.bf16.msra.mxu0 %v1522_v52  ;;  %v1094_v47 = vld [vmem:[%s3389_s3 + $0x108] sm:$0xff]  ;;  %v1544_v48 = vpack.c.bf16 %v420_v44, %v416_v43  ;;  %v415_v49 = vld [vmem:[%s3387_s1 + $0xc40] sm:$0xff]  ;;  %v414_v52 = vld [vmem:[%s3387_s1 + $0xc38] sm:$0xff]  ;;  %v1784_v63 = vpack.c.bf16 %v1096_v57, %v1095_v56 }
  0xb3   :  { %1723 = vmatpush1.bf16.msra.mxu1 %v1722_v53  ;;  %1525 = vmatprep.subr.bf16.mxu0 %v1524_v54  ;;  %v419_v50 = vld [vmem:[%s3387_s1 + $0xc60] sm:$0xff]  ;;  %v1876_v53 = vmov 0.0|0.0   ;;  %v1781_v54 = vpack.c.bf16 %v1094_v47, %v1093_v46  ;;  %v1740_v59 = vpack.c.bf16 %v414_v52, %v410_v51  ;;  %v409_v39 = vld [vmem:[%s3387_s1 + $0xc10] sm:$0xff]  ;;  %v418_v62 = vld [vmem:[%s3387_s1 + $0xc58] sm:$0xff] }
  0xb4   :  { %1725 = vmatprep.subr.bf16.mxu1 %v1724_v58  ;;  %v1546_v58 = vpack.c.bf16 %v419_v50, %v415_v49  ;;  %v413_v60 = vld [vmem:[%s3387_s1 + $0xc30] sm:$0xff]  ;;  %v1077_v7 = vld [vmem:[%s3389_s3 + $0x80] sm:$0xff]  ;;  %v1078_v8 = vld [vmem:[%s3389_s3 + $0x88] sm:$0xff] }
  0xb5   :  { %v1742_v3 = vpack.c.bf16 %v413_v60, %v409_v39  ;;  %v417_v5 = vld [vmem:[%s3387_s1 + $0xc50] sm:$0xff]  ;;  %v1100_v10 = vld [vmem:[%s3389_s3 + $0x138] sm:$0xff]  ;;  %v1102_v20 = vld [vmem:[%s3389_s3 + $0x148] sm:$0xff] }
  0xb6   :  { %1527 = vmatpush1.bf16.msra.mxu0 %v1526_v0  ;;  %v478_v0 = vrot.slane %v464_v55, %v2188_v11  ;;  %v421_v11 = vld [vmem:[%s3387_s1 + $0xc70] sm:$0xff]  ;;  %v1080_v18 = vld [vmem:[%s3389_s3 + $0x98] sm:$0xff]  ;;  %v1065_v34 = vld [vmem:[%s3389_s3 + $0x20] sm:$0xff] }
  0xb7   :  { %1727 = vmatpush1.bf16.msra.mxu1 %v1726_v1  ;;  %1529 = vmatprep.subr.bf16.mxu0 %v1528_v2  ;;  %v1097_v1 = vld [vmem:[%s3389_s3 + $0x120] sm:$0xff]  ;;  %v1098_v2 = vld [vmem:[%s3389_s3 + $0x128] sm:$0xff]  ;;  %v1099_v9 = vld [vmem:[%s3389_s3 + $0x130] sm:$0xff]  ;;  %v1746_v12 = vpack.c.bf16 %v421_v11, %v417_v5 }
  0xb8   :  { %1729 = vmatprep.subr.bf16.mxu1 %v1728_v6  ;;  %v1787_v6 = vpack.c.bf16 %v1098_v2, %v1097_v1  ;;  %v1790_v16 = vpack.c.bf16 %v1100_v10, %v1099_v9  ;;  %v1079_v17 = vld [vmem:[%s3389_s3 + $0x90] sm:$0xff]  ;;  %v1064_v26 = vld [vmem:[%s3389_s3 + $0x18] sm:$0xff]  ;;  %v1066_v35 = vld [vmem:[%s3389_s3 + $0x28] sm:$0xff] }
  0xb9   :  { %v1752_v22 = vpack.c.bf16 %v1080_v18, %v1079_v17  ;;  %v1063_v23 = vld [vmem:[%s3389_s3 + $0x10] sm:$0xff]  ;;  %v1104_v31 = vld [vmem:[%s3389_s3 + $0x158] sm:$0xff]  ;;  %v1106_v41 = vld [vmem:[%s3389_s3 + $0x168] sm:$0xff]  ;;  %v1758_v42 = vpack.c.bf16 %v1066_v35, %v1065_v34 }
  0xba   :  { %1531 = vmatpush1.bf16.msra.mxu0 %v1530_v13  ;;  %v1748_v13 = vpack.c.bf16 %v1078_v8, %v1077_v7  ;;  %v1103_v30 = vld [vmem:[%s3389_s3 + $0x150] sm:$0xff]  ;;  %v1754_v32 = vpack.c.bf16 %v1064_v26, %v1063_v23  ;;  %v1068_v46 = vld [vmem:[%s3389_s3 + $0x38] sm:$0xff]  ;;  %v1109_v55 = vld [vmem:[%s3389_s3 + $0x180] sm:$0xff] }
  0xbb   :  { %1731 = vmatpush1.bf16.msra.mxu1 %v1730_v14  ;;  %1533 = vmatprep.subr.bf16.mxu0 %v1532_v15  ;;  %v1061_v14 = vld [vmem:[%s3389_s3] sm:$0xff]  ;;  %v1062_v15 = vld [vmem:[%s3389_s3 + $0x8] sm:$0xff]  ;;  %v1796_v36 = vpack.c.bf16 %v1104_v31, %v1103_v30  ;;  %v1067_v44 = vld [vmem:[%s3389_s3 + $0x30] sm:$0xff] }
  0xbc   :  { %1733 = vmatprep.subr.bf16.mxu1 %v1732_v19  ;;  %v1101_v19 = vld [vmem:[%s3389_s3 + $0x140] sm:$0xff]  ;;  %v1750_v21 = vpack.c.bf16 %v1062_v15, %v1061_v14  ;;  %v1107_v49 = vld [vmem:[%s3389_s3 + $0x170] sm:$0xff]  ;;  %v1108_v50 = vld [vmem:[%s3389_s3 + $0x178] sm:$0xff]  ;;  %v1762_v51 = vpack.c.bf16 %v1068_v46, %v1067_v44 }
  0xbd   :  { %v1110_v56 = vld [vmem:[%s3389_s3 + $0x188] sm:$0xff]  ;;  %v1069_v60 = vld [vmem:[%s3389_s3 + $0x40] sm:$0xff]  ;;  %v1087_v2 = vld [vmem:[%s3389_s3 + $0xd0] sm:$0xff] }
  0xbe   :  { %1535 = vmatpush1.bf16.msra.mxu0 %v1534_v27  ;;  %v1793_v27 = vpack.c.bf16 %v1102_v20, %v1101_v19  ;;  %v1805_v57 = vpack.c.bf16 %v1110_v56, %v1109_v55  ;;  %v1071_v5 = vld [vmem:[%s3389_s3 + $0x50] sm:$0xff]  ;;  %v1072_v11 = vld [vmem:[%s3389_s3 + $0x58] sm:$0xff]  ;;  %v1089_v9 = vld [vmem:[%s3389_s3 + $0xe0] sm:$0xff] }
  0xbf   :  { %1735 = vmatpush1.bf16.msra.mxu1 %v1734_v28  ;;  %1537 = vmatprep.subr.bf16.mxu0 %v1536_v29  ;;  %v1081_v28 = vld [vmem:[%s3389_s3 + $0xa0] sm:$0xff]  ;;  %v1082_v29 = vld [vmem:[%s3389_s3 + $0xa8] sm:$0xff]  ;;  %v1115_v7 = vld [vmem:[%s3389_s3 + $0x1b0] sm:$0xff] }
  0xc0   :  { %1737 = vmatprep.subr.bf16.mxu1 %v1736_v33  ;;  %v1756_v33 = vpack.c.bf16 %v1082_v29, %v1081_v28  ;;  %v1116_v8 = vld [vmem:[%s3389_s3 + $0x1b8] sm:$0xff]  ;;  %v1073_v14 = vld [vmem:[%s3389_s3 + $0x60] sm:$0xff]  ;;  %v1074_v15 = vld [vmem:[%s3389_s3 + $0x68] sm:$0xff] }
  0xc1   :  { %v1814_v10 = vpack.c.bf16 %v1116_v8, %v1115_v7  ;;  %v1117_v17 = vld [vmem:[%s3389_s3 + $0x1c0] sm:$0xff]  ;;  %v1118_v18 = vld [vmem:[%s3389_s3 + $0x1c8] sm:$0xff]  ;;  %v1091_v20 = vld [vmem:[%s3389_s3 + $0xf0] sm:$0xff] }
  0xc2   :  { %1539 = vmatpush1.bf16.msra.mxu0 %v1538_v37  ;;  %v1083_v37 = vld [vmem:[%s3389_s3 + $0xb0] sm:$0xff]  ;;  %v1817_v19 = vpack.c.bf16 %v1118_v18, %v1117_v17  ;;  %v1076_v26 = vld [vmem:[%s3389_s3 + $0x78] sm:$0xff]  ;;  %v1121_v31 = vld [vmem:[%s3389_s3 + $0x1e0] sm:$0xff] }
  0xc3   :  { %1739 = vmatpush1.bf16.msra.mxu1 %v1738_v38  ;;  %1541 = vmatprep.subr.bf16.mxu0 %v1540_v40  ;;  %v1084_v38 = vld [vmem:[%s3389_s3 + $0xb8] sm:$0xff]  ;;  %v1105_v40 = vld [vmem:[%s3389_s3 + $0x160] sm:$0xff]  ;;  %v1075_v23 = vld [vmem:[%s3389_s3 + $0x70] sm:$0xff] }
  0xc4   :  { %1780 = vmatprep.subr.bf16.mxu1 %v1876_v53  ;;  %v1760_v43 = vpack.c.bf16 %v1084_v38, %v1083_v37  ;;  %v1799_v47 = vpack.c.bf16 %v1106_v41, %v1105_v40  ;;  %v1119_v28 = vld [vmem:[%s3389_s3 + $0x1d0] sm:$0xff]  ;;  %v1120_v29 = vld [vmem:[%s3389_s3 + $0x1d8] sm:$0xff]  ;;  %v431_v37 = vsub.s32 1, %v2161_v61  ;;  %v423_v38 = vld [vmem:[%s3388_s2] sm:$0xf] }
  0xc5   :  { %696 = vmatmul.mubr.f32.vlgmr.msra.gmra.mrb[0].mxu0 %v2754_v45  ;;  %v1820_v30 = vpack.c.bf16 %v1120_v29, %v1119_v28  ;;  %v1123_v34 = vld [vmem:[%s3389_s3 + $0x1f0] sm:$0xf] }
  0xc6   :  { %980 = vmatmul.mubr.f32.vlgmr.msra.gmra.mrb[0].mxu1 %v2754_v45  ;;  %1543 = vmatpush1.bf16.msra.mxu0 %v1542_v25  ;;  %v422_v45 = vld [vmem:[%s3387_s1 + $0xc78] sm:$0xff]  ;;  %v1085_v25 = vld [vmem:[%s3389_s3 + $0xc0] sm:$0xff]  ;;  %v432_v41 = vrot.slane %v423_v38, %v431_v37 }
  0xc7   :  { %1545 = vmatprep.subr.bf16.mxu0 %v1544_v48  ;;  %766 = vmatprep.mubr.f32.mxu0 %v1877_v24  ;;  %v1744_v4 = vpack.c.bf16 %v422_v45, %v418_v62  ;;  %v1086_v48 = vld [vmem:[%s3389_s3 + $0xc8] sm:$0xff] }
  0xc8   :  { %1782 = vmatpush1.bf16.msra.mxu1 %v1781_v54  ;;  %v1764_v52 = vpack.c.bf16 %v1086_v48, %v1085_v25  ;;  %v1802_v54 = vpack.c.bf16 %v1108_v50, %v1107_v49  ;;  %v1070_v62 = vld [vmem:[%s3389_s3 + $0x48] sm:$0xff] }
  0xc9   :  { %1783 = vmatprep.subr.bf16.mxu1 %v1876_v53  ;;  %v1766_v45 = vpack.c.bf16 %v1070_v62, %v1069_v60  ;;  %v1310_v62 = vld [vmem:[%s3390_s4] ss:$0 sm:$0xff]  ;;  %s1878_s4 = smov [#allocation2]  }
  0xca   :  { %1547 = vmatpush1.bf16.msra.mxu0 %v1546_v58  ;;  %v1111_v58 = vld [vmem:[%s3389_s3 + $0x190] sm:$0xff]  ;;  %s1300_s30 = sshll.u32 %s1878_s4, 4  ;;  %s1301_s30 = int_to_ptr.vmem [resolvable:$true] %s1300_s30 }
  0xcb   :  { %1741 = vmatprep.subr.bf16.mxu0 %v1740_v59  ;;  %v1112_v59 = vld [vmem:[%s3389_s3 + $0x198] sm:$0xff]  ;;  %s1851_s6 = scalar_lea.vmem %s1301_s30, 32  ;;  %p1856_p1 = scmp.lt.s32.totalorder %s1301_s30, %s1301_s30 }
  0xcc   :  { %1785 = vmatpush1.bf16.msra.mxu1 %v1784_v63  ;;  %v1808_v39 = vpack.c.bf16 %v1112_v59, %v1111_v58  ;;  %v1113_v63 = vld [vmem:[%s3389_s3 + $0x1a0] sm:$0xff]  ;;  %p1852_p0 = scmp.ne.s32.totalorder %s1301_s30, %s1851_s6  ;;  %p1857_p2 = scmp.lt.s32.totalorder %s1851_s6, %s1851_s6 }
  0xcd   :  { %1308 = vmatmul.mubr.msk.f32.vlgmr.msra.gmra.mrb[0].mxu0 %vm486_vm0, %v478_v0  ;;  %1786 = vmatprep.subr.bf16.mxu1 %v1876_v53 }
  0xce   :  { %1743 = vmatpush1.bf16.msra.mxu0 %v1742_v3  ;;  %1050 = vmatprep.mubr.f32.mxu0 %v1877_v24  ;;  %v1088_v3 = vld [vmem:[%s3389_s3 + $0xd8] sm:$0xff]  ;;  %p1858_p3 = por %p1857_p2, %p1856_p1 }
  0xcf   :  { %1745 = vmatprep.subr.bf16.mxu0 %v1744_v4  ;;  %v1768_v4 = vpack.c.bf16 %v1088_v3, %v1087_v2 }
  0xd0   :  { %1788 = vmatpush1.bf16.msra.mxu1 %v1787_v6  ;;  %v1770_v6 = vpack.c.bf16 %v1072_v11, %v1071_v5  ;;  %p1859_p4 = pnand %p1858_p3, %p1852_p0 }
  0xd1   :  { %1789 = vmatprep.subr.bf16.mxu1 %v1876_v53 }
  0xd2   :  { %1747 = vmatpush1.bf16.msra.mxu0 %v1746_v12  ;;  %v1090_v12 = vld [vmem:[%s3389_s3 + $0xe8] sm:$0xff] }
  0xd3   :  { %1749 = vmatprep.subr.bf16.mxu0 %v1748_v13  ;;  %v1772_v13 = vpack.c.bf16 %v1090_v12, %v1089_v9 }
  0xd4   :  { %1791 = vmatpush1.bf16.msra.mxu1 %v1790_v16  ;;  %v1774_v16 = vpack.c.bf16 %v1074_v15, %v1073_v14 }
  0xd5   :  { %1309 = vmatmul.mubr.msk.f32.vlgmr.msra.gmra.mrb[2].mxu0 %vm486_vm0, %v478_v0  ;;  %1792 = vmatprep.subr.bf16.mxu1 %v1876_v53  ;;  %v1114_v0 = vld [vmem:[%s3389_s3 + $0x1a8] sm:$0xff] }
  0xd6   :  { %1751 = vmatpush3.bf16.msra.mxu0 %v1750_v21  ;;  %v1811_v1 = vpack.c.bf16 %v1114_v0, %v1113_v63  ;;  %v1092_v21 = vld [vmem:[%s3389_s3 + $0xf8] sm:$0xff] }
  0xd7   :  { %1753 = vmatprep.subr.bf16.mxu0 %v1752_v22  ;;  %v1776_v22 = vpack.c.bf16 %v1092_v21, %v1091_v20 }
  0xd8   :  { %1794 = vmatpush1.bf16.msra.mxu1 %v1793_v27  ;;  %v1778_v27 = vpack.c.bf16 %v1076_v26, %v1075_v23 }
  0xd9   :  { %1795 = vmatprep.subr.bf16.mxu1 %v1876_v53 }
  0xda   :  { %1755 = vmatpush3.bf16.msra.mxu0 %v1754_v32  ;;  %v1122_v32 = vld [vmem:[%s3389_s3 + $0x1e8] sm:$0xff] }
  0xdb   :  { %1757 = vmatprep.subr.bf16.mxu0 %v1756_v33  ;;  %v1823_v33 = vpack.c.bf16 %v1122_v32, %v1121_v31 }
  0xdc   :  { %1797 = vmatpush1.bf16.msra.mxu1 %v1796_v36 }
  0xdd   :  { %1798 = vmatprep.subr.bf16.mxu1 %v1876_v53 }
  0xde   :  { %1759 = vmatpush3.bf16.msra.mxu0 %v1758_v42  ;;  %v439_v42 = vsub.s32 3, %v2161_v61 }
  0xdf   :  { %1761 = vmatprep.subr.bf16.mxu0 %v1760_v43 }
  0xe0   :  { %1800 = vmatpush1.bf16.msra.mxu1 %v1799_v47  ;;  %v440_v48 = vrot.slane %v423_v38, %v439_v42 }
  0xe1   :  { %1801 = vmatprep.subr.bf16.mxu1 %v1876_v53 }
  0xe2   :  { %1763 = vmatpush3.bf16.msra.mxu0 %v1762_v51 }
  0xe3   :  { %1765 = vmatprep.subr.bf16.mxu0 %v1764_v52 }
  0xe4   :  { %1803 = vmatpush1.bf16.msra.mxu1 %v1802_v54 }
  0xe5   :  { %1804 = vmatprep.subr.bf16.mxu1 %v1876_v53 }
  0xe6   :  { %1767 = vmatpush3.bf16.msra.mxu0 %v1766_v45 }
  0xe7   :  { %1769 = vmatprep.subr.bf16.mxu0 %v1768_v4 }
  0xe8   :  { %1806 = vmatpush1.bf16.msra.mxu1 %v1805_v57 }
  0xe9   :  { %1807 = vmatprep.subr.bf16.mxu1 %v1876_v53 }
  0xea   :  { %1771 = vmatpush3.bf16.msra.mxu0 %v1770_v6 }
  0xeb   :  { %1773 = vmatprep.subr.bf16.mxu0 %v1772_v13 }
  0xec   :  { %1809 = vmatpush1.bf16.msra.mxu1 %v1808_v39 }
  0xed   :  { %1810 = vmatprep.subr.bf16.mxu1 %v1876_v53 }
  0xee   :  { %1775 = vmatpush3.bf16.msra.mxu0 %v1774_v16 }
  0xef   :  { %1777 = vmatprep.subr.bf16.mxu0 %v1776_v22 }
  0xf0   :  { %1812 = vmatpush1.bf16.msra.mxu1 %v1811_v1 }
  0xf1   :  { %1813 = vmatprep.subr.bf16.mxu1 %v1876_v53 }
  0xf2   :  { %1779 = vmatpush3.bf16.msra.mxu0 %v1778_v27 }
  0xf4   :  { %1815 = vmatpush1.bf16.msra.mxu1 %v1814_v10 }
  0xf5   :  { %1816 = vmatprep.subr.bf16.mxu1 %v1876_v53 }
  0xf8   :  { %1818 = vmatpush1.bf16.msra.mxu1 %v1817_v19 }
  0xf9   :  { %1819 = vmatprep.subr.bf16.mxu1 %v1876_v53 }
  0xfc   :  { %1821 = vmatpush1.bf16.msra.mxu1 %v1820_v30 }
  0xfd   :  { %1822 = vmatprep.subr.bf16.mxu1 %v1876_v53  ;;  %v427_v53 = vsub.s32 0, %v2161_v61 }
  0xff   :  { %v428_v40 = vrot.slane %v423_v38, %v427_v53 }
 0x100   :  { %1824 = vmatpush1.bf16.msra.mxu1 %v1823_v33 }
 0x101   :  { %1269 = vmatprep.subr.mxu1 %v1877_v24  ;;  %v435_v24 = vsub.s32 2, %v2161_v61 }
 0x103   :  { %v436_v25 = vrot.slane %v423_v38, %v435_v24 }
 0x104   :  { %1311 = vmatpush1.msk.msra.mxu1 %vm1135_vm1, %v1123_v34 }
 0x199   :  { %v981_v35 = vpop.f32.mrb[0].mxu1 }
 0x19a   :  { %v983_v36 = vpop.f32.mrb[1].mxu1  ;;  %v1827_v51 = vadd.f32 %v981_v35, %v436_v25 }
 0x19b   :  { %v1829_v52 = vadd.f32 %v983_v36, %v440_v48 }
 0x1a0   :  { %v768_v43 = vpop.f32.mrb[0].mxu0 }
 0x1a1   :  { %v1825_v44 = vadd.f32 %v768_v43, %v428_v40  ;;  %v770_v46 = vpop.f32.mrb[1].mxu0 }
 0x1a2   :  { %v1826_v47 = vadd.f32 %v770_v46, %v432_v41 }
 0x1a3   :  { %v1057_v50 = vmax.f32 %v1825_v44, 0.0 }
 0x1a4   :  { %v1058_v49 = vmax.f32 %v1826_v47, 0.0 }
 0x1a6   :  { %1203 = vmatprep.mubr.f32.mxu0 %v1058_v49 }
 0x1a7   :  { %1204 = vmatmul.mubr.f32.vlgmr.msra.gmra.mrb[4].mxu0 %v1057_v50 }
 0x1a8   :  { %v1052_v54 = vpop.f32.mrb[2].mxu0 }
 0x1a9   :  { %v1828_v55 = vadd.f32 %v1827_v51, %v1052_v54  ;;  %v1054_v56 = vpop.f32.mrb[3].mxu0 }
 0x1aa   :  { %v1830_v57 = vadd.f32 %v1829_v52, %v1054_v56 }
 0x1ab   :  { %v1059_v59 = vmax.f32 %v1828_v55, 0.0 }
 0x1ac   :  { %v1060_v58 = vmax.f32 %v1830_v57, 0.0 }
 0x1ae   :  { %1312 = vmatprep.mubr.msk.f32.mxu1 %vm1131_vm2, %v1060_v58 }
 0x1af   :  { %1274 = vmatmul.mubr.f32.vlgmr.msra.gmra.mrb[2].mxu1 %v1059_v59 }
 0x27a   :  { %v1345_v61 = vpop.f32.mrb[4].mxu0 }
 0x27b   :  { %v1346_v39 = vpop.f32.mrb[5].mxu0 }
 0x27c   :  { %v1347_v60 = vadd.f32 %v1346_v39, %v1345_v61 }
 0x27e   :  { %v1206_v45 = vadd.f32 %v1347_v60, %v1310_v62 }
 0x282   :  { %v1275_v63 = vpop.f32.mrb[2].mxu1 }
 0x283   :  { %v1276_v0 = vadd.f32 %v1275_v63, %v1206_v45  ;;  %v1277_v1 = vpop.f32.mrb[3].mxu1 }
 0x285   :  { %v1280_v2 = vsel %vm1279_vm3, %v1276_v0, -inf }
 0x286   :  { %1281 = vmax.xlane.f32.xlu0 %v1280_v2 }
 0x313   :  { %v1282_v3 = vpop.xlane.xlu0 %1281 }
 0x314   :  { %v1283_v4 = vsub.f32 %v1276_v0, %v1282_v3 }
 0x316   :  { %v1284_v5 = vmul.f32 1.442695, %v1283_v4 }
 0x318   :  { %1847 = vpow2.f32 %v1284_v5 }
 0x322   :  { %v1848_v11 = vpop.eup %1847 }
 0x323   :  { %v1286_v6 = vsel %vm1279_vm3, %v1848_v11, 0.0 }
 0x324   :  { %1287 = vadd.xlane.f32.xlu0 %v1286_v6 }
 0x3b1   :  { %v1288_v7 = vpop.xlane.xlu0 %1287 }
 0x3b2   :  { %1849 = vlog2.f32 %v1288_v7 }
 0x3bc   :  { %v1850_v8 = vpop.eup %1849 }
 0x3bd   :  { %v1290_v9 = vmul.f32 0.6931472, %v1850_v8 }
 0x3bf   :  { %v1291_v10 = vadd.f32 %v1290_v9, %v1282_v3 }
 0x3c1   :  { %v1292_v12 = vsub.f32 %v1276_v0, %v1291_v10 }
 0x3c3   :  { %1293 = vst.msk [vmem:[#allocation2] sm:$0x3] %vm1279_vm3, %v1292_v12 }
 0x3c4   :  { %1862 = shalt.err (!%p1859_p4)
}
 0x3c5   :  { %s1863_s9 = scalar_lea.hbm %s3391_s5, 32 }
 0x3c6   :  { %p1864_p5 = scmp.ne.s32.totalorder %s3391_s5, %s1863_s9  ;;  %p1867_p6 = scmp.lt.u32.totalorder %s1863_s9, %s3391_s5 }
 0x3c8   :  { %p1869_p7 = pnand %p1867_p6, %p1864_p5 }
 0x3ca   :  { %1872 = shalt.err (!%p1869_p7)
}
 0x3cb   :  { %1303 = dma.vmem_to_hbm [thread:$0]  %s1301_s30, 32, %s3391_s5, [#allocation3]  }
 0x3cc   :  { %1873 = dma.done.wait [#allocation3], 32  }
 0x3cd   :  { %1874 = vsyncadd [#allocation3], 4294967264 }
 0x3ce   :  { %1307 = vsyncpa [#allocation3], 1 }

</bundles_post_ra>
